<compile_context>
chip_gen: v7x
topology: tpu7x:2x2x1
jax: 0.10.0
libtpu: 0.0.40
codegen_flags: <defaults>
</compile_context>

<pallas_src>
import jax
import jax.numpy as jnp
import numpy as np
from jax import lax
from jax.experimental import pallas as pl
from jax.experimental.pallas import tpu as pltpu


def _pillar_encoder_kernel(x_ref, sb_ref, w_ref, b_ref, out_ref):
    """Fused featurization + folded 1x1-conv/BN + ReLU + max over points.

    x_ref  : (N, 4, TP)  point-slot, raw channel (x,y,z,i), pillar (lanes)
    sb_ref : (4, TP)     rows = [cx, cy, 1/npoints, npoints]
    w_ref  : (3, C, 4)   [W_point, W_coor, W_mean] (BN scale and the duplicated
                         x/y-offset channels already folded in by the wrapper)
    b_ref  : (C, 1)      folded BN bias
    out_ref: (C, TP)     pooled pillar features (channel-major, lane-dense)
    """
    n_slots = x_ref.shape[0]
    c_out, tp = out_ref.shape

    w_point = w_ref[0]                       # (C, 4)
    w_coor = w_ref[1]                        # (C, 4)
    w_mean = w_ref[2]                        # (C, 4)

    sb = sb_ref[...]                         # (4, TP)
    inv_n = sb[2:3, :]                       # (1, TP)
    npts = sb[3:4, :]                        # (1, TP)

    # Per-pillar channel means (sum over point slots; padded slots are
    # zero-filled upstream, matching the reference's assumption).
    sums = jnp.sum(x_ref[...], axis=0)       # (4, TP)
    means = sums * inv_n                     # (4, TP)  (intensity row unused)

    # Per-pillar additive term: -(pillar-center part) - (point-mean part).
    b_pillar = (jnp.dot(w_coor, sb, preferred_element_type=jnp.float32) +
                jnp.dot(w_mean, means, preferred_element_type=jnp.float32))
    neg_b = -b_pillar                        # masked point -> value bn_bias

    # Online max over point slots: one small MXU dot + select + max per slot.
    running = jnp.full((c_out, tp), -jnp.inf, dtype=jnp.float32)
    for n in range(n_slots):
        x_n = x_ref[n]                                                # (4, TP)
        mm = jnp.dot(w_point, x_n, preferred_element_type=jnp.float32)  # (C, TP)
        valid = jnp.float32(n) < npts                                 # (1, TP)
        running = jnp.maximum(running, jnp.where(valid, mm, neg_b))

    # ReLU/max commute and the per-pillar shift is constant over points, so
    # bias-add + ReLU happen once on the pooled tile.
    out_ref[...] = jnp.maximum(running + b_pillar + b_ref[...], 0.0)


def pillar_encoder_forward(pillars, coors_batch, npoints, w, bn_scale, bn_bias,
                           *, vx, vy, x_offset, y_offset, x_l, y_l, bs,
                           tile_p=512):
    """pillars (P,N,4) f32, coors_batch (P,4) i32, npoints (P,) i32, w (9,C)."""
    P, N, _ = pillars.shape
    c_out = w.shape[1]
    assert tile_p % 128 == 0, "tile_p must be a multiple of 128 (lane width)"

    # ---- fold BN scale + duplicated x/y-offset channels into (4 -> C) mats.
    # Reference channel order: [x-cx, y-cy, z, i, x-mx, y-my, z-mz, x-cx, y-cy]
    s = jnp.asarray(bn_scale).reshape(-1)
    w_s = jnp.asarray(w) * s[None, :]                              # (9, C)
    zero = jnp.zeros_like(w_s[0])
    w_point = jnp.stack([w_s[0] + w_s[7] + w_s[4],
                         w_s[1] + w_s[8] + w_s[5],
                         w_s[2] + w_s[6],
                         w_s[3]], axis=0)                          # (4, C)
    w_coor = jnp.stack([-(w_s[0] + w_s[7]), -(w_s[1] + w_s[8]), zero, zero],
                       axis=0)                                     # (4, C)
    w_mean = jnp.stack([-w_s[4], -w_s[5], -w_s[6], zero], axis=0)  # (4, C)
    w_stack = jnp.stack([w_point.T, w_coor.T, w_mean.T], axis=0)   # (3, C, 4)
    bias_col = jnp.asarray(bn_bias).reshape(-1)[:, None]           # (C, 1)

    # ---- pad pillar count to a multiple of tile_p (NaN-safe via inv_n clamp).
    p_pad = ((P + tile_p - 1) // tile_p) * tile_p
    pad = p_pad - P
    pillars_p = jnp.pad(pillars, ((0, pad), (0, 0), (0, 0)))
    npts_f = jnp.pad(npoints.astype(jnp.float32), ((0, pad),))
    coors_f = jnp.pad(coors_batch[:, 1:3].astype(jnp.float32),
                      ((0, pad), (0, 0)))

    # ---- lane-dense layouts (layout plumbing done by XLA in the wrapper).
    x_cm = jnp.transpose(pillars_p, (1, 2, 0))                     # (N, 4, P')
    cx = coors_f[:, 0] * vx + x_offset
    cy = coors_f[:, 1] * vy + y_offset
    inv_n = 1.0 / jnp.maximum(npts_f, 1.0)
    sb = jnp.stack([cx, cy, inv_n, npts_f], axis=0)                # (4, P')

    pooled_t = pl.pallas_call(
        _pillar_encoder_kernel,
        out_shape=jax.ShapeDtypeStruct((c_out, p_pad), jnp.float32),
        grid_spec=pltpu.PrefetchScalarGridSpec(
            num_scalar_prefetch=0,
            grid=(p_pad // tile_p,),
            in_specs=[
                pl.BlockSpec((N, 4, tile_p), lambda i: (0, 0, i)),
                pl.BlockSpec((4, tile_p), lambda i: (0, i)),
                pl.BlockSpec((3, c_out, 4), lambda i: (0, 0, 0)),
                pl.BlockSpec((c_out, 1), lambda i: (0, 0)),
            ],
            out_specs=pl.BlockSpec((c_out, tile_p), lambda i: (0, i)),
        ),
        compiler_params=pltpu.CompilerParams(
            dimension_semantics=("parallel",),
            vmem_limit_bytes=32 * 1024 * 1024),
    )(x_cm, sb, w_stack, bias_col)

    pooled = pooled_t[:, :P].T                                     # (P, C)

    # TODO(synk): data-dependent scatter onto the BEV canvas stays in plain
    # JAX; duplicate (b,x,y) coords are last-write-wins in torch but unordered
    # here (upstream voxelizer produces unique coords).
    canvas = jnp.zeros((bs, x_l, y_l, c_out), jnp.float32)
    canvas = canvas.at[coors_batch[:, 0], coors_batch[:, 1],
                       coors_batch[:, 2]].set(pooled)
    return jnp.transpose(canvas, (0, 3, 2, 1))                     # (bs,C,y,x)


def pillar_encoder_ref(pillars, coors_batch, npoints, w, bn_scale, bn_bias,
                       *, vx, vy, x_offset, y_offset, x_l, y_l, bs):
    """Pure-JAX reference mirroring the PyTorch forward (BN in eval mode)."""
    npts_f = npoints.astype(jnp.float32)[:, None, None]
    offset_pt = pillars[:, :, :3] - (
        jnp.sum(pillars[:, :, :3], axis=1, keepdims=True) / npts_f)
    coors_f = coors_batch.astype(jnp.float32)
    x_off = pillars[:, :, 0:1] - (coors_f[:, None, 1:2] * vx + x_offset)
    y_off = pillars[:, :, 1:2] - (coors_f[:, None, 2:3] * vy + y_offset)
    feats = jnp.concatenate(
        [x_off, y_off, pillars[:, :, 2:4], offset_pt, x_off, y_off], axis=-1)
    ids = jnp.arange(pillars.shape[1])
    mask = (ids[None, :] < npoints[:, None]).astype(jnp.float32)
    feats = feats * mask[:, :, None]
    y = jnp.einsum('pnc,cd->pnd', feats, w, precision=lax.Precision.HIGHEST)
    y = jnp.maximum(y * bn_scale + bn_bias, 0.0)
    pooled = jnp.max(y, axis=1)
    canvas = jnp.zeros((bs, x_l, y_l, w.shape[1]), jnp.float32)
    canvas = canvas.at[coors_batch[:, 0], coors_batch[:, 1],
                       coors_batch[:, 2]].set(pooled)
    return jnp.transpose(canvas, (0, 3, 2, 1))


if __name__ == "__main__":
    # Small, shape-consistent config.
    voxel_size = (1.0, 1.0, 4.0)
    point_cloud_range = (0.0, 0.0, -3.0, 16.0, 16.0, 1.0)
    in_channel = 9        # 4 raw + 3 point-center offsets + 2 pillar-center offsets
    out_channel = 32

    vx, vy = voxel_size[0], voxel_size[1]
    x_offset = voxel_size[0] / 2 + point_cloud_range[0]
    y_offset = voxel_size[1] / 2 + point_cloud_range[1]
    x_l = int((point_cloud_range[3] - point_cloud_range[0]) / voxel_size[0])   # 16
    y_l = int((point_cloud_range[4] - point_cloud_range[1]) / voxel_size[1])   # 16

    bs = 2
    pillars_per_sample = 32
    P = bs * pillars_per_sample          # 64 total pillars
    N = 16                               # max points per pillar

    key = jax.random.PRNGKey(0)
    k_p, k_n, k_w, k_g, k_b, k_m, k_v = jax.random.split(key, 7)

    pillars = jax.random.uniform(k_p, (P, N, 4), jnp.float32, 0.0, 16.0)
    npoints = jax.random.randint(k_n, (P,), 1, N + 1).astype(jnp.int32)

    # unique (x, y) voxel coordinates per sample, batch indices sorted
    pid = np.arange(pillars_per_sample)
    xi = pid % x_l
    yi = pid // x_l
    coors_np = np.concatenate(
        [np.stack([np.full_like(pid, b), xi, yi, np.zeros_like(pid)], axis=1)
         for b in range(bs)], axis=0)
    coors_batch = jnp.asarray(coors_np, dtype=jnp.int32)     # (P, 4)

    # Deterministic synthetic parameters (no checkpoint load).
    # Conv1d(in=9, out=C, k=1, bias=False): torch weight (C, 9, 1) -> here (9, C).
    w = jax.random.normal(k_w, (in_channel, out_channel), jnp.float32) * 0.1
    gamma = jax.random.uniform(k_g, (out_channel,), jnp.float32, 0.5, 1.5)
    beta = jax.random.normal(k_b, (out_channel,), jnp.float32) * 0.1
    running_mean = jax.random.normal(k_m, (out_channel,), jnp.float32) * 0.1
    running_var = jax.random.uniform(k_v, (out_channel,), jnp.float32, 0.5, 1.5)
    eps = 1e-3
    # TODO(synk): BatchNorm1d implemented in inference (folded) mode; training-mode
    # batch statistics would require a global two-pass reduction over all pillars.
    inv_std = gamma / jnp.sqrt(running_var + eps)
    bn_scale = inv_std                                       # (C,)
    bn_bias = beta - running_mean * inv_std                  # (C,)

    out = pillar_encoder_forward(
        pillars, coors_batch, npoints, w, bn_scale, bn_bias,
        vx=vx, vy=vy, x_offset=x_offset, y_offset=y_offset,
        x_l=x_l, y_l=y_l, bs=bs)
    out = jax.block_until_ready(out)

    ref = pillar_encoder_ref(
        pillars, coors_batch, npoints, w, bn_scale, bn_bias,
        vx=vx, vy=vy, x_offset=x_offset, y_offset=y_offset,
        x_l=x_l, y_l=y_l, bs=bs)
    ref = jax.block_until_ready(ref)

    assert out.shape == (bs, out_channel, y_l, x_l), out.shape
    np.testing.assert_allclose(np.asarray(out), np.asarray(ref),
                               rtol=2e-3, atol=2e-3)
    print("KERNEL_OK")
</pallas_src>

<mosaic_0001>
module attributes {stable_mosaic.version = 11 : i64} {
  func.func @_pillar_encoder_kernel(%arg0: i32, %arg1: memref<16x4x512xf32, #tpu.memory_space<vmem>>, %arg2: memref<4x512xf32, #tpu.memory_space<vmem>>, %arg3: memref<3x32x4xf32, #tpu.memory_space<vmem>>, %arg4: memref<32x1xf32, #tpu.memory_space<vmem>>, %arg5: memref<32x512xf32, #tpu.memory_space<vmem>>) attributes {dimension_semantics = [#tpu.dimension_semantics<parallel>], iteration_bounds = array<i64: 1>, scalar_prefetch = 0 : i64, scratch_operands = 0 : i64, tpu.core_type = #tpu.core_type<tc>, window_params = [{transform_indices = @transform_0, window_bounds = array<i64: 16, 4, 512>}, {transform_indices = @transform_1, window_bounds = array<i64: 4, 512>}, {pipeline_mode = #tpu.pipeline_mode<synchronous>, transform_indices = @transform_2, window_bounds = array<i64: 3, 32, 4>}, {pipeline_mode = #tpu.pipeline_mode<synchronous>, transform_indices = @transform_3, window_bounds = array<i64: 32, 1>}, {transform_indices = @transform_4, window_bounds = array<i64: 32, 512>}]} {
    %c0 = arith.constant 0 : index
    %c0_0 = arith.constant 0 : index
    %c0_1 = arith.constant 0 : index
    %0 = vector.load %arg3[%c0, %c0_0, %c0_1] : memref<3x32x4xf32, #tpu.memory_space<vmem>>, vector<1x32x4xf32>
    %1 = vector.shape_cast %0 : vector<1x32x4xf32> to vector<32x4xf32>
    %c1 = arith.constant 1 : index
    %c0_2 = arith.constant 0 : index
    %c0_3 = arith.constant 0 : index
    %2 = vector.load %arg3[%c1, %c0_2, %c0_3] : memref<3x32x4xf32, #tpu.memory_space<vmem>>, vector<1x32x4xf32>
    %3 = vector.shape_cast %2 : vector<1x32x4xf32> to vector<32x4xf32>
    %c2 = arith.constant 2 : index
    %c0_4 = arith.constant 0 : index
    %c0_5 = arith.constant 0 : index
    %4 = vector.load %arg3[%c2, %c0_4, %c0_5] : memref<3x32x4xf32, #tpu.memory_space<vmem>>, vector<1x32x4xf32>
    %5 = vector.shape_cast %4 : vector<1x32x4xf32> to vector<32x4xf32>
    %c0_6 = arith.constant 0 : index
    %c0_7 = arith.constant 0 : index
    %6 = vector.load %arg2[%c0_6, %c0_7] : memref<4x512xf32, #tpu.memory_space<vmem>>, vector<4x512xf32>
    %7 = vector.extract_strided_slice %6 {offsets = [2, 0], sizes = [1, 512], strides = [1, 1]} : vector<4x512xf32> to vector<1x512xf32>
    %8 = vector.extract_strided_slice %6 {offsets = [3, 0], sizes = [1, 512], strides = [1, 1]} : vector<4x512xf32> to vector<1x512xf32>
    %c0_8 = arith.constant 0 : index
    %c0_9 = arith.constant 0 : index
    %c0_10 = arith.constant 0 : index
    %9 = vector.load %arg1[%c0_8, %c0_9, %c0_10] : memref<16x4x512xf32, #tpu.memory_space<vmem>>, vector<16x4x512xf32>
    %cst = arith.constant dense<0.000000e+00> : vector<4x512xf32>
    %10 = vector.multi_reduction <add>, %9, %cst [0] : vector<16x4x512xf32> to vector<4x512xf32>
    %11 = vector.broadcast %7 : vector<1x512xf32> to vector<4x512xf32>
    %12 = arith.mulf %10, %11 : vector<4x512xf32>
    %cst_11 = arith.constant dense<0.000000e+00> : vector<32x512xf32>
    %13 = tpu.matmul %3, %6, %cst_11 {dimension_numbers = #tpu.dot_dimension_numbers<[1], [0], [0], [1], [0, 0, 1, 1], [], []>} : vector<32x4xf32>, vector<4x512xf32>, vector<32x512xf32> -> vector<32x512xf32>
    %cst_12 = arith.constant dense<0.000000e+00> : vector<32x512xf32>
    %14 = tpu.matmul %5, %12, %cst_12 {dimension_numbers = #tpu.dot_dimension_numbers<[1], [0], [0], [1], [0, 0, 1, 1], [], []>} : vector<32x4xf32>, vector<4x512xf32>, vector<32x512xf32> -> vector<32x512xf32>
    %15 = arith.addf %13, %14 : vector<32x512xf32>
    %cst_13 = arith.constant 0.000000e+00 : f32
    %16 = vector.broadcast %cst_13 : f32 to vector<32x512xf32>
    %17 = arith.subf %16, %15 : vector<32x512xf32>
    %cst_14 = arith.constant 0xFF800000 : f32
    %18 = vector.broadcast %cst_14 : f32 to vector<32x512xf32>
    %c0_15 = arith.constant 0 : index
    %c0_16 = arith.constant 0 : index
    %c0_17 = arith.constant 0 : index
    %19 = vector.load %arg1[%c0_15, %c0_16, %c0_17] : memref<16x4x512xf32, #tpu.memory_space<vmem>>, vector<1x4x512xf32>
    %20 = vector.shape_cast %19 : vector<1x4x512xf32> to vector<4x512xf32>
    %cst_18 = arith.constant dense<0.000000e+00> : vector<32x512xf32>
    %21 = tpu.matmul %1, %20, %cst_18 {dimension_numbers = #tpu.dot_dimension_numbers<[1], [0], [0], [1], [0, 0, 1, 1], [], []>} : vector<32x4xf32>, vector<4x512xf32>, vector<32x512xf32> -> vector<32x512xf32>
    %cst_19 = arith.constant 0.000000e+00 : f32
    %22 = vector.broadcast %cst_19 : f32 to vector<1x512xf32>
    %23 = arith.cmpf olt, %22, %8 : vector<1x512xf32>
    %24 = vector.shape_cast %23 : vector<1x512xi1> to vector<1x512xi1>
    %25 = vector.broadcast %24 : vector<1x512xi1> to vector<32x512xi1>
    %26 = arith.select %25, %21, %17 : vector<32x512xi1>, vector<32x512xf32>
    %27 = arith.maximumf %18, %26 : vector<32x512xf32>
    %c1_20 = arith.constant 1 : index
    %c0_21 = arith.constant 0 : index
    %c0_22 = arith.constant 0 : index
    %28 = vector.load %arg1[%c1_20, %c0_21, %c0_22] : memref<16x4x512xf32, #tpu.memory_space<vmem>>, vector<1x4x512xf32>
    %29 = vector.shape_cast %28 : vector<1x4x512xf32> to vector<4x512xf32>
    %cst_23 = arith.constant dense<0.000000e+00> : vector<32x512xf32>
    %30 = tpu.matmul %1, %29, %cst_23 {dimension_numbers = #tpu.dot_dimension_numbers<[1], [0], [0], [1], [0, 0, 1, 1], [], []>} : vector<32x4xf32>, vector<4x512xf32>, vector<32x512xf32> -> vector<32x512xf32>
    %cst_24 = arith.constant 1.000000e+00 : f32
    %31 = vector.broadcast %cst_24 : f32 to vector<1x512xf32>
    %32 = arith.cmpf olt, %31, %8 : vector<1x512xf32>
    %33 = vector.shape_cast %32 : vector<1x512xi1> to vector<1x512xi1>
    %34 = vector.broadcast %33 : vector<1x512xi1> to vector<32x512xi1>
    %35 = arith.select %34, %30, %17 : vector<32x512xi1>, vector<32x512xf32>
    %36 = arith.maximumf %27, %35 : vector<32x512xf32>
    %c2_25 = arith.constant 2 : index
    %c0_26 = arith.constant 0 : index
    %c0_27 = arith.constant 0 : index
    %37 = vector.load %arg1[%c2_25, %c0_26, %c0_27] : memref<16x4x512xf32, #tpu.memory_space<vmem>>, vector<1x4x512xf32>
    %38 = vector.shape_cast %37 : vector<1x4x512xf32> to vector<4x512xf32>
    %cst_28 = arith.constant dense<0.000000e+00> : vector<32x512xf32>
    %39 = tpu.matmul %1, %38, %cst_28 {dimension_numbers = #tpu.dot_dimension_numbers<[1], [0], [0], [1], [0, 0, 1, 1], [], []>} : vector<32x4xf32>, vector<4x512xf32>, vector<32x512xf32> -> vector<32x512xf32>
    %cst_29 = arith.constant 2.000000e+00 : f32
    %40 = vector.broadcast %cst_29 : f32 to vector<1x512xf32>
    %41 = arith.cmpf olt, %40, %8 : vector<1x512xf32>
    %42 = vector.shape_cast %41 : vector<1x512xi1> to vector<1x512xi1>
    %43 = vector.broadcast %42 : vector<1x512xi1> to vector<32x512xi1>
    %44 = arith.select %43, %39, %17 : vector<32x512xi1>, vector<32x512xf32>
    %45 = arith.maximumf %36, %44 : vector<32x512xf32>
    %c3 = arith.constant 3 : index
    %c0_30 = arith.constant 0 : index
    %c0_31 = arith.constant 0 : index
    %46 = vector.load %arg1[%c3, %c0_30, %c0_31] : memref<16x4x512xf32, #tpu.memory_space<vmem>>, vector<1x4x512xf32>
    %47 = vector.shape_cast %46 : vector<1x4x512xf32> to vector<4x512xf32>
    %cst_32 = arith.constant dense<0.000000e+00> : vector<32x512xf32>
    %48 = tpu.matmul %1, %47, %cst_32 {dimension_numbers = #tpu.dot_dimension_numbers<[1], [0], [0], [1], [0, 0, 1, 1], [], []>} : vector<32x4xf32>, vector<4x512xf32>, vector<32x512xf32> -> vector<32x512xf32>
    %cst_33 = arith.constant 3.000000e+00 : f32
    %49 = vector.broadcast %cst_33 : f32 to vector<1x512xf32>
    %50 = arith.cmpf olt, %49, %8 : vector<1x512xf32>
    %51 = vector.shape_cast %50 : vector<1x512xi1> to vector<1x512xi1>
    %52 = vector.broadcast %51 : vector<1x512xi1> to vector<32x512xi1>
    %53 = arith.select %52, %48, %17 : vector<32x512xi1>, vector<32x512xf32>
    %54 = arith.maximumf %45, %53 : vector<32x512xf32>
    %c4 = arith.constant 4 : index
    %c0_34 = arith.constant 0 : index
    %c0_35 = arith.constant 0 : index
    %55 = vector.load %arg1[%c4, %c0_34, %c0_35] : memref<16x4x512xf32, #tpu.memory_space<vmem>>, vector<1x4x512xf32>
    %56 = vector.shape_cast %55 : vector<1x4x512xf32> to vector<4x512xf32>
    %cst_36 = arith.constant dense<0.000000e+00> : vector<32x512xf32>
    %57 = tpu.matmul %1, %56, %cst_36 {dimension_numbers = #tpu.dot_dimension_numbers<[1], [0], [0], [1], [0, 0, 1, 1], [], []>} : vector<32x4xf32>, vector<4x512xf32>, vector<32x512xf32> -> vector<32x512xf32>
    %cst_37 = arith.constant 4.000000e+00 : f32
    %58 = vector.broadcast %cst_37 : f32 to vector<1x512xf32>
    %59 = arith.cmpf olt, %58, %8 : vector<1x512xf32>
    %60 = vector.shape_cast %59 : vector<1x512xi1> to vector<1x512xi1>
    %61 = vector.broadcast %60 : vector<1x512xi1> to vector<32x512xi1>
    %62 = arith.select %61, %57, %17 : vector<32x512xi1>, vector<32x512xf32>
    %63 = arith.maximumf %54, %62 : vector<32x512xf32>
    %c5 = arith.constant 5 : index
    %c0_38 = arith.constant 0 : index
    %c0_39 = arith.constant 0 : index
    %64 = vector.load %arg1[%c5, %c0_38, %c0_39] : memref<16x4x512xf32, #tpu.memory_space<vmem>>, vector<1x4x512xf32>
    %65 = vector.shape_cast %64 : vector<1x4x512xf32> to vector<4x512xf32>
    %cst_40 = arith.constant dense<0.000000e+00> : vector<32x512xf32>
    %66 = tpu.matmul %1, %65, %cst_40 {dimension_numbers = #tpu.dot_dimension_numbers<[1], [0], [0], [1], [0, 0, 1, 1], [], []>} : vector<32x4xf32>, vector<4x512xf32>, vector<32x512xf32> -> vector<32x512xf32>
    %cst_41 = arith.constant 5.000000e+00 : f32
    %67 = vector.broadcast %cst_41 : f32 to vector<1x512xf32>
    %68 = arith.cmpf olt, %67, %8 : vector<1x512xf32>
    %69 = vector.shape_cast %68 : vector<1x512xi1> to vector<1x512xi1>
    %70 = vector.broadcast %69 : vector<1x512xi1> to vector<32x512xi1>
    %71 = arith.select %70, %66, %17 : vector<32x512xi1>, vector<32x512xf32>
    %72 = arith.maximumf %63, %71 : vector<32x512xf32>
    %c6 = arith.constant 6 : index
    %c0_42 = arith.constant 0 : index
    %c0_43 = arith.constant 0 : index
    %73 = vector.load %arg1[%c6, %c0_42, %c0_43] : memref<16x4x512xf32, #tpu.memory_space<vmem>>, vector<1x4x512xf32>
    %74 = vector.shape_cast %73 : vector<1x4x512xf32> to vector<4x512xf32>
    %cst_44 = arith.constant dense<0.000000e+00> : vector<32x512xf32>
    %75 = tpu.matmul %1, %74, %cst_44 {dimension_numbers = #tpu.dot_dimension_numbers<[1], [0], [0], [1], [0, 0, 1, 1], [], []>} : vector<32x4xf32>, vector<4x512xf32>, vector<32x512xf32> -> vector<32x512xf32>
    %cst_45 = arith.constant 6.000000e+00 : f32
    %76 = vector.broadcast %cst_45 : f32 to vector<1x512xf32>
    %77 = arith.cmpf olt, %76, %8 : vector<1x512xf32>
    %78 = vector.shape_cast %77 : vector<1x512xi1> to vector<1x512xi1>
    %79 = vector.broadcast %78 : vector<1x512xi1> to vector<32x512xi1>
    %80 = arith.select %79, %75, %17 : vector<32x512xi1>, vector<32x512xf32>
    %81 = arith.maximumf %72, %80 : vector<32x512xf32>
    %c7 = arith.constant 7 : index
    %c0_46 = arith.constant 0 : index
    %c0_47 = arith.constant 0 : index
    %82 = vector.load %arg1[%c7, %c0_46, %c0_47] : memref<16x4x512xf32, #tpu.memory_space<vmem>>, vector<1x4x512xf32>
    %83 = vector.shape_cast %82 : vector<1x4x512xf32> to vector<4x512xf32>
    %cst_48 = arith.constant dense<0.000000e+00> : vector<32x512xf32>
    %84 = tpu.matmul %1, %83, %cst_48 {dimension_numbers = #tpu.dot_dimension_numbers<[1], [0], [0], [1], [0, 0, 1, 1], [], []>} : vector<32x4xf32>, vector<4x512xf32>, vector<32x512xf32> -> vector<32x512xf32>
    %cst_49 = arith.constant 7.000000e+00 : f32
    %85 = vector.broadcast %cst_49 : f32 to vector<1x512xf32>
    %86 = arith.cmpf olt, %85, %8 : vector<1x512xf32>
    %87 = vector.shape_cast %86 : vector<1x512xi1> to vector<1x512xi1>
    %88 = vector.broadcast %87 : vector<1x512xi1> to vector<32x512xi1>
    %89 = arith.select %88, %84, %17 : vector<32x512xi1>, vector<32x512xf32>
    %90 = arith.maximumf %81, %89 : vector<32x512xf32>
    %c8 = arith.constant 8 : index
    %c0_50 = arith.constant 0 : index
    %c0_51 = arith.constant 0 : index
    %91 = vector.load %arg1[%c8, %c0_50, %c0_51] : memref<16x4x512xf32, #tpu.memory_space<vmem>>, vector<1x4x512xf32>
    %92 = vector.shape_cast %91 : vector<1x4x512xf32> to vector<4x512xf32>
    %cst_52 = arith.constant dense<0.000000e+00> : vector<32x512xf32>
    %93 = tpu.matmul %1, %92, %cst_52 {dimension_numbers = #tpu.dot_dimension_numbers<[1], [0], [0], [1], [0, 0, 1, 1], [], []>} : vector<32x4xf32>, vector<4x512xf32>, vector<32x512xf32> -> vector<32x512xf32>
    %cst_53 = arith.constant 8.000000e+00 : f32
    %94 = vector.broadcast %cst_53 : f32 to vector<1x512xf32>
    %95 = arith.cmpf olt, %94, %8 : vector<1x512xf32>
    %96 = vector.shape_cast %95 : vector<1x512xi1> to vector<1x512xi1>
    %97 = vector.broadcast %96 : vector<1x512xi1> to vector<32x512xi1>
    %98 = arith.select %97, %93, %17 : vector<32x512xi1>, vector<32x512xf32>
    %99 = arith.maximumf %90, %98 : vector<32x512xf32>
    %c9 = arith.constant 9 : index
    %c0_54 = arith.constant 0 : index
    %c0_55 = arith.constant 0 : index
    %100 = vector.load %arg1[%c9, %c0_54, %c0_55] : memref<16x4x512xf32, #tpu.memory_space<vmem>>, vector<1x4x512xf32>
    %101 = vector.shape_cast %100 : vector<1x4x512xf32> to vector<4x512xf32>
    %cst_56 = arith.constant dense<0.000000e+00> : vector<32x512xf32>
    %102 = tpu.matmul %1, %101, %cst_56 {dimension_numbers = #tpu.dot_dimension_numbers<[1], [0], [0], [1], [0, 0, 1, 1], [], []>} : vector<32x4xf32>, vector<4x512xf32>, vector<32x512xf32> -> vector<32x512xf32>
    %cst_57 = arith.constant 9.000000e+00 : f32
    %103 = vector.broadcast %cst_57 : f32 to vector<1x512xf32>
    %104 = arith.cmpf olt, %103, %8 : vector<1x512xf32>
    %105 = vector.shape_cast %104 : vector<1x512xi1> to vector<1x512xi1>
    %106 = vector.broadcast %105 : vector<1x512xi1> to vector<32x512xi1>
    %107 = arith.select %106, %102, %17 : vector<32x512xi1>, vector<32x512xf32>
    %108 = arith.maximumf %99, %107 : vector<32x512xf32>
    %c10 = arith.constant 10 : index
    %c0_58 = arith.constant 0 : index
    %c0_59 = arith.constant 0 : index
    %109 = vector.load %arg1[%c10, %c0_58, %c0_59] : memref<16x4x512xf32, #tpu.memory_space<vmem>>, vector<1x4x512xf32>
    %110 = vector.shape_cast %109 : vector<1x4x512xf32> to vector<4x512xf32>
    %cst_60 = arith.constant dense<0.000000e+00> : vector<32x512xf32>
    %111 = tpu.matmul %1, %110, %cst_60 {dimension_numbers = #tpu.dot_dimension_numbers<[1], [0], [0], [1], [0, 0, 1, 1], [], []>} : vector<32x4xf32>, vector<4x512xf32>, vector<32x512xf32> -> vector<32x512xf32>
    %cst_61 = arith.constant 1.000000e+01 : f32
    %112 = vector.broadcast %cst_61 : f32 to vector<1x512xf32>
    %113 = arith.cmpf olt, %112, %8 : vector<1x512xf32>
    %114 = vector.shape_cast %113 : vector<1x512xi1> to vector<1x512xi1>
    %115 = vector.broadcast %114 : vector<1x512xi1> to vector<32x512xi1>
    %116 = arith.select %115, %111, %17 : vector<32x512xi1>, vector<32x512xf32>
    %117 = arith.maximumf %108, %116 : vector<32x512xf32>
    %c11 = arith.constant 11 : index
    %c0_62 = arith.constant 0 : index
    %c0_63 = arith.constant 0 : index
    %118 = vector.load %arg1[%c11, %c0_62, %c0_63] : memref<16x4x512xf32, #tpu.memory_space<vmem>>, vector<1x4x512xf32>
    %119 = vector.shape_cast %118 : vector<1x4x512xf32> to vector<4x512xf32>
    %cst_64 = arith.constant dense<0.000000e+00> : vector<32x512xf32>
    %120 = tpu.matmul %1, %119, %cst_64 {dimension_numbers = #tpu.dot_dimension_numbers<[1], [0], [0], [1], [0, 0, 1, 1], [], []>} : vector<32x4xf32>, vector<4x512xf32>, vector<32x512xf32> -> vector<32x512xf32>
    %cst_65 = arith.constant 1.100000e+01 : f32
    %121 = vector.broadcast %cst_65 : f32 to vector<1x512xf32>
    %122 = arith.cmpf olt, %121, %8 : vector<1x512xf32>
    %123 = vector.shape_cast %122 : vector<1x512xi1> to vector<1x512xi1>
    %124 = vector.broadcast %123 : vector<1x512xi1> to vector<32x512xi1>
    %125 = arith.select %124, %120, %17 : vector<32x512xi1>, vector<32x512xf32>
    %126 = arith.maximumf %117, %125 : vector<32x512xf32>
    %c12 = arith.constant 12 : index
    %c0_66 = arith.constant 0 : index
    %c0_67 = arith.constant 0 : index
    %127 = vector.load %arg1[%c12, %c0_66, %c0_67] : memref<16x4x512xf32, #tpu.memory_space<vmem>>, vector<1x4x512xf32>
    %128 = vector.shape_cast %127 : vector<1x4x512xf32> to vector<4x512xf32>
    %cst_68 = arith.constant dense<0.000000e+00> : vector<32x512xf32>
    %129 = tpu.matmul %1, %128, %cst_68 {dimension_numbers = #tpu.dot_dimension_numbers<[1], [0], [0], [1], [0, 0, 1, 1], [], []>} : vector<32x4xf32>, vector<4x512xf32>, vector<32x512xf32> -> vector<32x512xf32>
    %cst_69 = arith.constant 1.200000e+01 : f32
    %130 = vector.broadcast %cst_69 : f32 to vector<1x512xf32>
    %131 = arith.cmpf olt, %130, %8 : vector<1x512xf32>
    %132 = vector.shape_cast %131 : vector<1x512xi1> to vector<1x512xi1>
    %133 = vector.broadcast %132 : vector<1x512xi1> to vector<32x512xi1>
    %134 = arith.select %133, %129, %17 : vector<32x512xi1>, vector<32x512xf32>
    %135 = arith.maximumf %126, %134 : vector<32x512xf32>
    %c13 = arith.constant 13 : index
    %c0_70 = arith.constant 0 : index
    %c0_71 = arith.constant 0 : index
    %136 = vector.load %arg1[%c13, %c0_70, %c0_71] : memref<16x4x512xf32, #tpu.memory_space<vmem>>, vector<1x4x512xf32>
    %137 = vector.shape_cast %136 : vector<1x4x512xf32> to vector<4x512xf32>
    %cst_72 = arith.constant dense<0.000000e+00> : vector<32x512xf32>
    %138 = tpu.matmul %1, %137, %cst_72 {dimension_numbers = #tpu.dot_dimension_numbers<[1], [0], [0], [1], [0, 0, 1, 1], [], []>} : vector<32x4xf32>, vector<4x512xf32>, vector<32x512xf32> -> vector<32x512xf32>
    %cst_73 = arith.constant 1.300000e+01 : f32
    %139 = vector.broadcast %cst_73 : f32 to vector<1x512xf32>
    %140 = arith.cmpf olt, %139, %8 : vector<1x512xf32>
    %141 = vector.shape_cast %140 : vector<1x512xi1> to vector<1x512xi1>
    %142 = vector.broadcast %141 : vector<1x512xi1> to vector<32x512xi1>
    %143 = arith.select %142, %138, %17 : vector<32x512xi1>, vector<32x512xf32>
    %144 = arith.maximumf %135, %143 : vector<32x512xf32>
    %c14 = arith.constant 14 : index
    %c0_74 = arith.constant 0 : index
    %c0_75 = arith.constant 0 : index
    %145 = vector.load %arg1[%c14, %c0_74, %c0_75] : memref<16x4x512xf32, #tpu.memory_space<vmem>>, vector<1x4x512xf32>
    %146 = vector.shape_cast %145 : vector<1x4x512xf32> to vector<4x512xf32>
    %cst_76 = arith.constant dense<0.000000e+00> : vector<32x512xf32>
    %147 = tpu.matmul %1, %146, %cst_76 {dimension_numbers = #tpu.dot_dimension_numbers<[1], [0], [0], [1], [0, 0, 1, 1], [], []>} : vector<32x4xf32>, vector<4x512xf32>, vector<32x512xf32> -> vector<32x512xf32>
    %cst_77 = arith.constant 1.400000e+01 : f32
    %148 = vector.broadcast %cst_77 : f32 to vector<1x512xf32>
    %149 = arith.cmpf olt, %148, %8 : vector<1x512xf32>
    %150 = vector.shape_cast %149 : vector<1x512xi1> to vector<1x512xi1>
    %151 = vector.broadcast %150 : vector<1x512xi1> to vector<32x512xi1>
    %152 = arith.select %151, %147, %17 : vector<32x512xi1>, vector<32x512xf32>
    %153 = arith.maximumf %144, %152 : vector<32x512xf32>
    %c15 = arith.constant 15 : index
    %c0_78 = arith.constant 0 : index
    %c0_79 = arith.constant 0 : index
    %154 = vector.load %arg1[%c15, %c0_78, %c0_79] : memref<16x4x512xf32, #tpu.memory_space<vmem>>, vector<1x4x512xf32>
    %155 = vector.shape_cast %154 : vector<1x4x512xf32> to vector<4x512xf32>
    %cst_80 = arith.constant dense<0.000000e+00> : vector<32x512xf32>
    %156 = tpu.matmul %1, %155, %cst_80 {dimension_numbers = #tpu.dot_dimension_numbers<[1], [0], [0], [1], [0, 0, 1, 1], [], []>} : vector<32x4xf32>, vector<4x512xf32>, vector<32x512xf32> -> vector<32x512xf32>
    %cst_81 = arith.constant 1.500000e+01 : f32
    %157 = vector.broadcast %cst_81 : f32 to vector<1x512xf32>
    %158 = arith.cmpf olt, %157, %8 : vector<1x512xf32>
    %159 = vector.shape_cast %158 : vector<1x512xi1> to vector<1x512xi1>
    %160 = vector.broadcast %159 : vector<1x512xi1> to vector<32x512xi1>
    %161 = arith.select %160, %156, %17 : vector<32x512xi1>, vector<32x512xf32>
    %162 = arith.maximumf %153, %161 : vector<32x512xf32>
    %163 = arith.addf %162, %15 : vector<32x512xf32>
    %c0_82 = arith.constant 0 : index
    %c0_83 = arith.constant 0 : index
    %164 = vector.load %arg4[%c0_82, %c0_83] : memref<32x1xf32, #tpu.memory_space<vmem>>, vector<32x1xf32>
    %165 = vector.broadcast %164 : vector<32x1xf32> to vector<32x512xf32>
    %166 = arith.addf %163, %165 : vector<32x512xf32>
    %cst_84 = arith.constant 0.000000e+00 : f32
    %167 = vector.broadcast %cst_84 : f32 to vector<32x512xf32>
    %168 = arith.maximumf %166, %167 : vector<32x512xf32>
    %c0_85 = arith.constant 0 : index
    %c0_86 = arith.constant 0 : index
    %169 = vector.load %arg5[%c0_85, %c0_86] : memref<32x512xf32, #tpu.memory_space<vmem>>, vector<32x512xf32>
    tpu.vector_store %arg5[%c0_85, %c0_86], %168 {strides = array<i32>} : memref<32x512xf32, #tpu.memory_space<vmem>>, vector<32x512xf32>,
    return
  }
  func.func @transform_0(%arg0: i32) -> (i32, i32, i32) {
    %c0_i32 = arith.constant 0 : i32
    %c0_i32_0 = arith.constant 0 : i32
    %c0_i32_1 = arith.constant 0 : i32
    return %c0_i32, %c0_i32_0, %arg0 : i32, i32, i32
  }
  func.func @transform_1(%arg0: i32) -> (i32, i32) {
    %c0_i32 = arith.constant 0 : i32
    %c0_i32_0 = arith.constant 0 : i32
    return %c0_i32, %arg0 : i32, i32
  }
  func.func @transform_2(%arg0: i32) -> (i32, i32, i32) {
    %c0_i32 = arith.constant 0 : i32
    %c0_i32_0 = arith.constant 0 : i32
    %c0_i32_1 = arith.constant 0 : i32
    %c0_i32_2 = arith.constant 0 : i32
    return %c0_i32, %c0_i32_0, %c0_i32_1 : i32, i32, i32
  }
  func.func @transform_3(%arg0: i32) -> (i32, i32) {
    %c0_i32 = arith.constant 0 : i32
    %c0_i32_0 = arith.constant 0 : i32
    %c0_i32_1 = arith.constant 0 : i32
    return %c0_i32, %c0_i32_0 : i32, i32
  }
  func.func @transform_4(%arg0: i32) -> (i32, i32) {
    %c0_i32 = arith.constant 0 : i32
    %c0_i32_0 = arith.constant 0 : i32
    return %c0_i32, %arg0 : i32, i32
  }
}

</mosaic_0001>

<bundles_post_ra>
// kernel: tpu_custom_call.1
= control target key start
LH: loop header
LB: loop body
LE: loop exit
PB: predicated region body
PF: predicated region fallthrough
CT: control target
= control target key end

     0   :  { %9 = vsyncpa [#allocation3], 0  ;;  %s8823_s0 = inlined_call_operand.hbm [shape: f32[16,4,512], index: 0, kind: input, shape index: {}]   ;;  %s8824_s1 = inlined_call_operand.vmem [shape: f32[4,512], index: 1, kind: input, shape index: {}]   ;;  %s8825_s2 = inlined_call_operand.vmem [shape: f32[3,32,4], index: 2, kind: input, shape index: {}]   ;;  %s8826_s3 = inlined_call_operand.vmem [shape: f32[32,1], index: 3, kind: input, shape index: {}]   ;;  %s8827_s4 = inlined_call_operand.hbm [shape: f32[32,512], index: 4, kind: output, shape index: {}]  }
   0x1   :  { %10 = vsyncpa [#allocation4], 0  ;;  %s5478_s15 = smov [#allocation2]   ;;  %s5430_s19 = scalar_lea.hbm %s8823_s0, 4096 }
   0x2   :  { %s16_s16 = sshll.u32 %s5478_s15, 4  ;;  %p5431_p0 = scmp.ne.s32.totalorder %s8823_s0, %s5430_s19  ;;  %s17_s16 = int_to_ptr.vmem [resolvable:$true] %s16_s16 }
   0x3   :  { %p5434_p1 = scmp.lt.u32.totalorder %s5430_s19, %s8823_s0 }
   0x5   :  { %p5436_p2 = pnand %p5434_p1, %p5431_p0 }
   0x7   :  { %5439 = shalt.err (!%p5436_p2)
}
   0x8   :  { %s5440_s24 = scalar_lea.vmem %s17_s16, 4096  ;;  %p5445_p4 = scmp.lt.s32.totalorder %s17_s16, %s17_s16 }
   0x9   :  { %p5441_p3 = scmp.ne.s32.totalorder %s17_s16, %s5440_s24  ;;  %p5446_p5 = scmp.lt.s32.totalorder %s5440_s24, %s5440_s24 }
   0xb   :  { %p5447_p6 = por %p5446_p5, %p5445_p4 }
   0xd   :  { %p5448_p7 = pnand %p5447_p6, %p5441_p3 }
   0xf   :  { %5451 = shalt.err (!%p5448_p7)
}
  0x10   :  { %s5479_s25 = smov 256   ;;  %s5480_s26 = smov 16  }
  0x11   :  { %22 = dma.hbm_to_vmem [thread:$0]  %s8823_s0, 4096, %s17_s16, [#allocation3], %s5479_s25, %s5479_s25, %s5480_s26  }
  0x12   :  { %5474 = dma.done.wait [#allocation3], 4096  }
  0x13   :  { %5475 = vsyncadd [#allocation3], 4294963200  ;;  %v8828_v0 = vmov 0.0   ;;  %v5525_v1 = vld [vmem:[#allocation2] sm:$0xff]  ;;  %v5527_v2 = vld [vmem:[#allocation2 + $0x10] sm:$0xff]  ;;  %vm176_vm0 = vcmask 1043456   ;;  %v303_v3 = vlaneseq }
  0x14   :  { %432 = vmatprep.mubr.f32.mxu0 %v8828_v0  ;;  %521 = vmatprep.mubr.f32.mxu1 %v8828_v0  ;;  %v5529_v4 = vld [vmem:[#allocation2 + $0x20] sm:$0xff]  ;;  %v5531_v5 = vld [vmem:[#allocation2 + $0x30] sm:$0xff]  ;;  %v5537_v7 = vcombine.high %v5525_v1, %v5525_v1  ;;  %v5541_v8 = vcombine.high %v5527_v2, %v5527_v2  ;;  %v5582_v26 = vld [vmem:[#allocation2 + $0x8] sm:$0xff]  ;;  %v177_v50 = vsel %vm176_vm0, %v5525_v1, 0.0  ;;  %v178_v51 = vsel %vm176_vm0, %v5527_v2, 0.0 }
  0x15   :  { %v5533_v6 = vld [vmem:[#allocation2 + $0x40] sm:$0xff]  ;;  %v5545_v9 = vcombine.high %v5529_v4, %v5529_v4  ;;  %v5549_v10 = vcombine.high %v5531_v5, %v5531_v5  ;;  %v5551_v11 = vld [vmem:[#allocation2 + $0x50] sm:$0xff]  ;;  %v5561_v15 = vshrl.u32 %v303_v3, 7  ;;  %v5584_v27 = vld [vmem:[#allocation2 + $0x18] sm:$0xff]  ;;  %v5614_v40 = vcombine.high %v5582_v26, %v5582_v26 }
  0x16   :  { %8906 = vst [vmem:[#allocation8_spill] sm:$0xff] %v5551_v11  ;;  %v208_v12 = vsel %vm176_vm0, %v5537_v7, 0.0  ;;  %v5557_v13 = vcombine.high %v5533_v6, %v5533_v6  ;;  %v209_v14 = vsel %vm176_vm0, %v5541_v8, 0.0  ;;  %v5563_v16 = vld [vmem:[#allocation2 + $0x60] sm:$0xff]  ;;  %v5567_v18 = vcombine.high %v5551_v11, %v5551_v11  ;;  %v5573_v21 = vld [vmem:[#allocation2 + $0x70] sm:$0xff]  ;;  %v5593_v31 = vld [vmem:[#allocation2 + $0x28] sm:$0xff] }
  0x17   :  { %8908 = vst [vmem:[#allocation10_spill] sm:$0xff] %v5561_v15  ;;  %8909 = vst [vmem:[#allocation11_spill] sm:$0xff] %v5563_v16  ;;  %v210_v17 = vadd.f32 %v209_v14, %v208_v12  ;;  %v211_v19 = vsel %vm176_vm0, %v5545_v9, 0.0  ;;  %v213_v20 = vsel %vm176_vm0, %v5549_v10, 0.0  ;;  %v5577_v23 = vcombine.high %v5563_v16, %v5563_v16  ;;  %v5589_v28 = vld [vmem:[%s8824_s1] sm:$0xff]  ;;  %v5601_v34 = vld [vmem:[#allocation2 + $0x38] sm:$0xff] }
  0x18   :  { %8907 = vst [vmem:[#allocation9_spill] sm:$0xff] %v5557_v13  ;;  %8910 = vst [vmem:[#allocation12_spill] sm:$0xff] %v5567_v18  ;;  %v215_v24 = vsel %vm176_vm0, %v5557_v13, 0.0  ;;  %v8830_v25 = vsub.s32 6, %v5561_v15  ;;  %v5591_v29 = vld [vmem:[#allocation2 + $0x80] sm:$0xff]  ;;  %v5597_v32 = vcombine.high %v5573_v21, %v5573_v21  ;;  %v217_v33 = vsel %vm176_vm0, %v5567_v18, 0.0 }
  0x19   :  { %8911 = vst [vmem:[#allocation13_spill] sm:$0xff] %v5573_v21  ;;  %v212_v22 = vadd.f32 %v211_v19, %v210_v17  ;;  %8912 = vst [vmem:[#allocation14_spill] sm:$0xff] %v5577_v23  ;;  %v5603_v35 = vld [vmem:[#allocation2 + $0x90] sm:$0xff]  ;;  %v5605_v36 = vld [vmem:[#allocation2 + $0xa0] sm:$0xff]  ;;  %v5610_v39 = vsub.s32 2, %v5561_v15  ;;  %v5618_v41 = vcombine.high %v5584_v27, %v5584_v27  ;;  %v5622_v42 = vcombine.high %v5591_v29, %v5591_v29 }
  0x1a   :  { %8913 = vst [vmem:[#allocation15_spill] sm:$0xff] %v5597_v32  ;;  %v5607_v37 = vld [vmem:[#allocation2 + $0xb0] sm:$0xff]  ;;  %v219_v43 = vsel %vm176_vm0, %v5577_v23, 0.0  ;;  %v5629_v44 = vrot.slane %v5589_v28, %v8830_v25  ;;  %v5631_v45 = vld [vmem:[#allocation2 + $0x48] sm:$0xff]  ;;  %v5635_v46 = vcombine.high %v5593_v31, %v5593_v31  ;;  %v5637_v47 = vld [vmem:[#allocation2 + $0xc0] sm:$0xff]  ;;  %v5641_v49 = vcombine.high %v5601_v34, %v5601_v34 }
  0x1b   :  { %v214_v30 = vadd.f32 %v213_v20, %v212_v22  ;;  %8914 = vst [vmem:[#allocation16_spill] sm:$0xff] %v5622_v42  ;;  %v5647_v52 = vld [vmem:[#allocation2 + $0xd0] sm:$0xff]  ;;  %v5651_v53 = vcombine.high %v5603_v35, %v5603_v35  ;;  %v5655_v54 = vcombine.high %v5605_v36, %v5605_v36  ;;  %v5659_v55 = vcombine.high %v5607_v37, %v5607_v37  ;;  %v5663_v57 = vld [vmem:[#allocation2 + $0x58] sm:$0xff]  ;;  %v5665_v58 = vld [vmem:[#allocation2 + $0xe0] sm:$0xff] }
  0x1c   :  { %v221_v56 = vsel %vm176_vm0, %v5597_v32, 0.0  ;;  %v5667_v59 = vld [vmem:[#allocation2 + $0xf0] sm:$0xff]  ;;  %v5671_v61 = vcombine.high %v5631_v45, %v5631_v45  ;;  %v270_v62 = vsel %vm176_vm0, %v5614_v40, 0.0  ;;  %v271_v63 = vsel %vm176_vm0, %v5618_v41, 0.0  ;;  %v5681_v14 = vld [vmem:[#allocation2 + $0x68] sm:$0xff] }
  0x1d   :  { %v216_v38 = vadd.f32 %v215_v24, %v214_v30  ;;  %8915 = vst [vmem:[#allocation17_spill] sm:$0xff] %v5651_v53  ;;  %8916 = vst [vmem:[#allocation18_spill] sm:$0xff] %v5655_v54  ;;  %v136_v3 = vcombine.high %v5637_v47, %v5637_v47  ;;  %v223_v12 = vsel %vm176_vm0, %v5622_v42, 0.0  ;;  %v272_v17 = vadd.f32 %v271_v63, %v270_v62  ;;  %v5687_v24 = vld [vmem:[#allocation2 + $0x78] sm:$0xff]  ;;  %v5712_v32 = vld [vmem:[#allocation2 + $0x88] sm:$0xff] }
  0x1e   :  { %8917 = vst [vmem:[#allocation19_spill] sm:$0xff] %v5659_v55  ;;  %8918 = vst [vmem:[#allocation20_spill] sm:$0xff] %v5671_v61  ;;  %v273_v19 = vsel %vm176_vm0, %v5635_v46, 0.0  ;;  %v138_v20 = vcombine.high %v5647_v52, %v5647_v52  ;;  %v5691_v30 = vcombine.high %v5663_v57, %v5663_v57  ;;  %v5705_v63 = vcombine.high %v5681_v14, %v5681_v14 }
  0x1f   :  { %v218_v48 = vadd.f32 %v217_v33, %v216_v38  ;;  %v275_v33 = vsel %vm176_vm0, %v5641_v49, 0.0  ;;  %v140_v38 = vcombine.high %v5665_v58, %v5665_v58  ;;  %v274_v62 = vadd.f32 %v273_v19, %v272_v17 }
  0x20   :  { %8919 = vst [vmem:[#allocation21_spill] sm:$0xff] %v5691_v30  ;;  %8920 = vst [vmem:[#allocation22_spill] sm:$0xff] %v5705_v63  ;;  %v277_v0 = vsel %vm176_vm0, %v5671_v61, 0.0  ;;  %v229_v25 = vsel %vm176_vm0, %v5659_v55, 0.0  ;;  %v231_v42 = vsel %vm176_vm0, %v136_v3, 0.0  ;;  %v233_v23 = vsel %vm176_vm0, %v138_v20, 0.0 }
  0x21   :  { %v220_v60 = vadd.f32 %v219_v43, %v218_v48  ;;  %v142_v43 = vcombine.high %v5667_v59, %v5667_v59  ;;  %v225_v48 = vsel %vm176_vm0, %v5651_v53, 0.0  ;;  %v276_v17 = vadd.f32 %v275_v33, %v274_v62  ;;  %v5724_v3 = vld [vmem:[#allocation2 + $0x98] sm:$0xff]  ;;  %v5728_v33 = vld [vmem:[#allocation2 + $0xa8] sm:$0xff] }
  0x22   :  { %v180_v53 = vsel %vm176_vm0, %v5529_v4, 0.0  ;;  %v235_v55 = vsel %vm176_vm0, %v140_v38, 0.0  ;;  %v182_v61 = vsel %vm176_vm0, %v5531_v5, 0.0  ;;  %vm343_vm1 = vcmask 31744  }
  0x23   :  { %v222_v22 = vadd.f32 %v221_v56, %v220_v60  ;;  %v227_v60 = vsel %vm176_vm0, %v5655_v54, 0.0  ;;  %v179_v54 = vadd.f32 %v178_v51, %v177_v50  ;;  %v278_v18 = vadd.f32 %v277_v0, %v276_v17 }
  0x24   :  { %v5734_v50 = vcombine.high %v5712_v32, %v5712_v32  ;;  %v281_v51 = vsel %vm176_vm0, %v5705_v63, 0.0  ;;  %v237_v38 = vsel %vm176_vm0, %v142_v43, 0.0  ;;  %v330_v0 = vrot.slane %v5629_v44, %v5610_v39 }
  0x25   :  { %v224_v56 = vadd.f32 %v223_v12, %v222_v22  ;;  %v5716_v12 = vcombine.high %v5687_v24, %v5687_v24  ;;  %v279_v22 = vsel %vm176_vm0, %v5691_v30, 0.0  ;;  %v181_v20 = vadd.f32 %v180_v53, %v179_v54  ;;  %v5759_v54 = vld [vmem:[#allocation2 + $0xc8] sm:$0xff] }
  0x26   :  { %8922 = vst [vmem:[#allocation24_spill] sm:$0xff] %v5734_v50  ;;  %v280_v62 = vadd.f32 %v279_v22, %v278_v18  ;;  %v5745_v17 = vcombine.high %v5724_v3, %v5724_v3  ;;  %v5751_v53 = vcombine.high %v5728_v33, %v5728_v33  ;;  %v285_v43 = vsel %vm176_vm0, %v5734_v50, 0.0 }
  0x27   :  { %8921 = vst [vmem:[#allocation23_spill] sm:$0xff] %v5716_v12  ;;  %v226_v19 = vadd.f32 %v225_v48, %v224_v56  ;;  %v5730_v48 = vld [vmem:[#allocation2 + $0xb8] sm:$0xff]  ;;  %v184_v56 = vsel %vm176_vm0, %v5533_v6, 0.0  ;;  %v183_v30 = vadd.f32 %v182_v61, %v181_v20  ;;  %v239_v61 = vsel %vm176_vm0, %v5582_v26, 0.0 }
  0x28   :  { %8923 = vst [vmem:[#allocation25_spill] sm:$0xff] %v5745_v17  ;;  %8924 = vst [vmem:[#allocation26_spill] sm:$0xff] %v5751_v53  ;;  %v5755_v44 = vcombine.high %v5730_v48, %v5730_v48  ;;  %v282_v18 = vadd.f32 %v281_v51, %v280_v62  ;;  %v240_v51 = vsel %vm176_vm0, %v5584_v27, 0.0  ;;  %v242_v62 = vsel %vm176_vm0, %v5593_v31, 0.0 }
  0x29   :  { %v228_v13 = vadd.f32 %v227_v60, %v226_v19  ;;  %v283_v19 = vsel %vm176_vm0, %v5716_v12, 0.0  ;;  %v185_v22 = vadd.f32 %v184_v56, %v183_v30  ;;  %v188_v12 = vsel %vm176_vm0, %v5563_v16, 0.0 }
  0x2a   :  { %8925 = vst [vmem:[#allocation27_spill] sm:$0xff] %v5755_v44  ;;  %v284_v20 = vadd.f32 %v283_v19, %v282_v18  ;;  %v287_v50 = vsel %vm176_vm0, %v5745_v17, 0.0  ;;  %v241_v56 = vadd.f32 %v240_v51, %v239_v61  ;;  %v5777_v19 = vcombine.high %v5759_v54, %v5759_v54 }
  0x2b   :  { %v230_v60 = vadd.f32 %v229_v25, %v228_v13  ;;  %v186_v13 = vsel %vm176_vm0, %v5551_v11, 0.0  ;;  %v190_v16 = vsel %vm176_vm0, %v5573_v21, 0.0  ;;  %v244_v63 = vsel %vm176_vm0, %v5601_v34, 0.0 }
  0x2c   :  { %v187_v30 = vadd.f32 %v186_v13, %v185_v22  ;;  %8926 = vst [vmem:[#allocation28_spill] sm:$0xff] %v5777_v19  ;;  %v286_v18 = vadd.f32 %v285_v43, %v284_v20  ;;  %v243_v13 = vadd.f32 %v242_v62, %v241_v56  ;;  %v192_v43 = vsel %vm176_vm0, %v5591_v29, 0.0 }
  0x2d   :  { %v232_v25 = vadd.f32 %v231_v42, %v230_v60  ;;  %v5771_v60 = vld [vmem:[#allocation2 + $0xd8] sm:$0xff]  ;;  %v246_v20 = vsel %vm176_vm0, %v5631_v45, 0.0  ;;  %vm5146_vm2 = vcmp.gt.f32.partialorder %v5589_v28, 0.0 }
  0x2e   :  { %v189_v17 = vadd.f32 %v188_v12, %v187_v30  ;;  %v5789_v22 = vcombine.high %v5771_v60, %v5771_v60  ;;  %v288_v61 = vadd.f32 %v287_v50, %v286_v18  ;;  %v245_v21 = vadd.f32 %v244_v63, %v243_v13 }
  0x2f   :  { %v234_v42 = vadd.f32 %v233_v23, %v232_v25  ;;  %v5783_v23 = vld [vmem:[#allocation2 + $0xe8] sm:$0xff]  ;;  %v289_v25 = vsel %vm176_vm0, %v5751_v53, 0.0  ;;  %v5797_v53 = vld [vmem:[#allocation2 + $0xf8] sm:$0xff]  ;;  %v194_v50 = vsel %vm176_vm0, %v5603_v35, 0.0  ;;  %v248_v30 = vsel %vm176_vm0, %v5663_v57, 0.0 }
  0x30   :  { %v141_v12 = vcombine.high %v5783_v23, %v5783_v23  ;;  %v290_v62 = vadd.f32 %v289_v25, %v288_v61  ;;  %v196_v18 = vsel %vm176_vm0, %v5605_v36, 0.0  ;;  %v250_v25 = vsel %vm176_vm0, %v5681_v14, 0.0 }
  0x31   :  { %v236_v11 = vadd.f32 %v235_v55, %v234_v42  ;;  %v291_v55 = vsel %vm176_vm0, %v5755_v44, 0.0  ;;  %v191_v42 = vadd.f32 %v190_v16, %v189_v17  ;;  %v293_v16 = vsel %vm176_vm0, %v5777_v19, 0.0 }
  0x32   :  { %v292_v17 = vadd.f32 %v291_v55, %v290_v62  ;;  %v295_v13 = vsel %vm176_vm0, %v5789_v22, 0.0  ;;  %v252_v55 = vsel %vm176_vm0, %v5687_v24, 0.0 }
  0x33   :  { %v238_v51 = vadd.f32 %v237_v38, %v236_v11  ;;  %v5808_v11 = vld [vmem:[%s8824_s1 + $0x8] sm:$0xff]  ;;  %v193_v63 = vadd.f32 %v192_v43, %v191_v42  ;;  %v247_v38 = vadd.f32 %v246_v20, %v245_v21  ;;  %v8927_v21 = vsub.s32 6, %v5561_v15 }
  0x34   :  { %v294_v19 = vadd.f32 %v293_v16, %v292_v17  ;;  %v198_v20 = vsel %vm176_vm0, %v5607_v37, 0.0  ;;  %v297_v42 = vsel %vm176_vm0, %v141_v12, 0.0  ;;  %v202_v15 = vsel %vm176_vm0, %v5647_v52, 0.0 }
  0x35   :  { %v340_v56 = vmul.f32 %v330_v0, %v238_v51  ;;  %v143_v0 = vcombine.high %v5797_v53, %v5797_v53  ;;  %v195_v61 = vadd.f32 %v194_v50, %v193_v63  ;;  %v249_v51 = vadd.f32 %v248_v30, %v247_v38 }
  0x36   :  { %v318_v43 = vrot.slane %v5808_v11, %v8927_v21  ;;  %v296_v44 = vadd.f32 %v295_v13, %v294_v19  ;;  %v200_v50 = vsel %vm176_vm0, %v5637_v47, 0.0  ;;  %v254_v30 = vsel %vm176_vm0, %v5712_v32, 0.0 }
  0x37   :  { %5110 = vmatprep.subr.msk.mxu0 %vm176_vm0, %v340_v56  ;;  %v197_v62 = vadd.f32 %v196_v18, %v195_v61  ;;  %v251_v56 = vadd.f32 %v250_v25, %v249_v51  ;;  %v299_v16 = vsel %vm176_vm0, %v143_v0, 0.0  ;;  %v256_v12 = vsel %vm176_vm0, %v5724_v3, 0.0 }
  0x38   :  { %v298_v17 = vadd.f32 %v297_v42, %v296_v44  ;;  %v338_v21 = vrot.slane %v318_v43, %v5610_v39  ;;  %v306_v47 = vrot.slane %v5589_v28, %v5610_v39  ;;  %v204_v0 = vsel %vm176_vm0, %v5665_v58, 0.0 }
  0x39   :  { %v199_v63 = vadd.f32 %v198_v20, %v197_v62  ;;  %v253_v38 = vadd.f32 %v252_v55, %v251_v56  ;;  %v258_v44 = vsel %vm176_vm0, %v5728_v33, 0.0  ;;  %v206_v52 = vsel %vm176_vm0, %v5667_v59, 0.0 }
  0x3a   :  { %v300_v25 = vadd.f32 %v299_v16, %v298_v17  ;;  %v260_v43 = vsel %vm176_vm0, %v5730_v48, 0.0  ;;  %v326_v55 = vrot.slane %v306_v47, %v5610_v39  ;;  %v262_v58 = vsel %vm176_vm0, %v5759_v54, 0.0 }
  0x3b   :  { %v201_v19 = vadd.f32 %v200_v50, %v199_v63  ;;  %v255_v18 = vadd.f32 %v254_v30, %v253_v38  ;;  %v546_v59 = vcombine.high %v5589_v28, %v5589_v28  ;;  %v314_v16 = vrot.slane %v5808_v11, %v5610_v39  ;;  %v5106_v63 = vld [vmem:[%s8825_s2 + $0x40] sm:$0xff] }
  0x3c   :  { %v342_v51 = vmul.f32 %v338_v21, %v300_v25  ;;  %v266_v38 = vsel %vm176_vm0, %v5783_v23, 0.0  ;;  %v268_v21 = vsel %vm176_vm0, %v5797_v53, 0.0  ;;  %v8928_v47 = vmov 0.0   ;;  %v5107_v23 = vld [vmem:[%s8825_s2 + $0x48] sm:$0xff] }
  0x3d   :  { %v203_v13 = vadd.f32 %v202_v15, %v201_v19  ;;  %v257_v61 = vadd.f32 %v256_v12, %v255_v18  ;;  %v264_v15 = vsel %vm176_vm0, %v5771_v60, 0.0  ;;  %v334_v19 = vrot.slane %v314_v16, %v5610_v39  ;;  %v5108_v39 = vld [vmem:[%s8825_s2 + $0x50] sm:$0xff] }
  0x3e   :  { %5116 = vmatprep.subr.msk.mxu1 %vm176_vm0, %v342_v51  ;;  %v547_v18 = vcombine.high %v5808_v11, %v5808_v11  ;;  %v4203_v51 = vld [vmem:[#allocation2 + $0xd0] sm:$0xff]  ;;  %vm5147_vm3 = vcmp.gt.f32.partialorder %v5808_v11, 0.0  ;;  %vm5161_vm9 = vcmp.gt.f32.partialorder %v5808_v11, 1.0 }
  0x3f   :  { %v205_v20 = vadd.f32 %v204_v0, %v203_v13  ;;  %v259_v42 = vadd.f32 %v258_v44, %v257_v61  ;;  %v5102_v0 = vld [vmem:[%s8825_s2 + $0x20] sm:$0xff] }
  0x40   :  { %v8940_v44 = vld [vmem:[#allocation16_spill] sm:$0xff] }
  0x41   :  { %v207_v62 = vadd.f32 %v206_v52, %v205_v20  ;;  %v261_v56 = vadd.f32 %v260_v43, %v259_v42  ;;  %v8941_v13 = vld [vmem:[#allocation24_spill] sm:$0xff]  ;;  %v8951_v42 = vld [vmem:[#allocation10_spill] sm:$0xff] }
  0x42   :  { %v3938_v61 = vld [vmem:[#allocation2 + $0xc0] sm:$0xff] }
  0x43   :  { %v339_v50 = vmul.f32 %v326_v55, %v207_v62  ;;  %v263_v30 = vadd.f32 %v262_v58, %v261_v56  ;;  %v4468_v52 = vld [vmem:[#allocation2 + $0xe0] sm:$0xff]  ;;  %v6362_v58 = vsub.s32 3, %v8951_v42  ;;  %v6366_v62 = vsub.s32 7, %v8951_v42 }
  0x45   :  { %5111 = vmatpush1.msk.msra.mxu0 %vm176_vm0, %v339_v50  ;;  %v265_v17 = vadd.f32 %v264_v15, %v263_v30 }
  0x46   :  { %5112 = vmatmul.mubr.msk.f32.vlgmr.msra.gmra.mrb[0].mxu0 %vm343_vm1, %v5106_v63  ;;  %5122 = vmatprep.subr.msk.mxu0 %vm176_vm0, %v546_v59 }
  0x47   :  { %v267_v12 = vadd.f32 %v266_v38, %v265_v17  ;;  %5123 = vmatpush1.msk.msra.mxu0 %vm176_vm0, %v5589_v28  ;;  %438 = vmatprep.mubr.f32.mxu0 %v8928_v47 }
  0x48   :  { %5134 = vmatprep.subr.msk.mxu0 %vm176_vm0, %v5537_v7  ;;  %v5109_v7 = vld [vmem:[%s8825_s2 + $0x58] sm:$0xff] }
  0x49   :  { %v269_v53 = vadd.f32 %v268_v21, %v267_v12 }
  0x4a   :  { %5113 = vmatmul.mubr.msk.f32.gmra.mrb[2].mxu0 %vm343_vm1, %v5107_v23 }
  0x4b   :  { %v341_v25 = vmul.f32 %v334_v19, %v269_v53  ;;  %444 = vmatprep.mubr.f32.mxu0 %v8928_v47 }
  0x4d   :  { %5117 = vmatpush1.msk.msra.mxu1 %vm176_vm0, %v341_v25 }
  0x4e   :  { %5118 = vmatmul.mubr.msk.f32.vlgmr.msra.gmra.mrb[0].mxu1 %vm343_vm1, %v5106_v63  ;;  %5128 = vmatprep.subr.msk.mxu1 %vm176_vm0, %v547_v18  ;;  %v6394_v63 = vld [vmem:[#allocation2 + $0xf0] sm:$0xff]  ;;  %v5013_v18 = vld [vmem:[%s8826_s3] sm:$0xff] }
  0x4f   :  { %5129 = vmatpush1.msk.msra.mxu1 %vm176_vm0, %v5808_v11  ;;  %527 = vmatprep.mubr.f32.mxu1 %v8928_v47  ;;  %v4737_v53 = vcombine.high %v6394_v63, %v6394_v63 }
  0x50   :  { %5114 = vmatmul.mubr.msk.f32.gmra.mrb[4].mxu0 %vm343_vm1, %v5108_v39  ;;  %5140 = vmatprep.subr.msk.mxu1 %vm176_vm0, %v5614_v40  ;;  %v5103_v40 = vld [vmem:[%s8825_s2 + $0x28] sm:$0xff] }
  0x51   :  { %450 = vmatprep.mubr.f32.mxu0 %v8928_v47 }
  0x52   :  { %5119 = vmatmul.mubr.msk.f32.gmra.mrb[2].mxu1 %vm343_vm1, %v5107_v23 }
  0x53   :  { %533 = vmatprep.mubr.f32.mxu1 %v8928_v47 }
  0x54   :  { %5115 = vmatmul.mubr.msk.f32.gmra.mrb[6].mxu0 %vm343_vm1, %v5109_v7 }
  0x55   :  { %632 = vmatprep.mubr.f32.mxu0 %v8928_v47 }
  0x56   :  { %5120 = vmatmul.mubr.msk.f32.gmra.mrb[4].mxu1 %vm343_vm1, %v5108_v39 }
  0x57   :  { %539 = vmatprep.mubr.f32.mxu1 %v8928_v47 }
  0x58   :  { %5124 = vmatmul.mubr.msk.f32.vlgmr.msra.gmra.mrb[0].mxu0 %vm343_vm1, %v5102_v0 }
  0x59   :  { %5135 = vmatpush1.msk.msra.mxu0 %vm176_vm0, %v5525_v1  ;;  %638 = vmatprep.mubr.f32.mxu0 %v8928_v47  ;;  %v5104_v1 = vld [vmem:[%s8825_s2 + $0x30] sm:$0xff] }
  0x5a   :  { %5121 = vmatmul.mubr.msk.f32.gmra.mrb[6].mxu1 %vm343_vm1, %v5109_v7  ;;  %5148 = vmatprep.subr.msk.mxu0 %vm176_vm0, %v5541_v8  ;;  %v5105_v8 = vld [vmem:[%s8825_s2 + $0x38] sm:$0xff] }
  0x5b   :  { %721 = vmatprep.mubr.f32.mxu1 %v8928_v47 }
  0x5c   :  { %5125 = vmatmul.mubr.msk.f32.gmra.mrb[2].mxu0 %vm343_vm1, %v5103_v40 }
  0x5d   :  { %644 = vmatprep.mubr.f32.mxu0 %v8928_v47 }
  0x5e   :  { %5130 = vmatmul.mubr.msk.f32.vlgmr.msra.gmra.mrb[0].mxu1 %vm343_vm1, %v5102_v0 }
  0x5f   :  { %5141 = vmatpush1.msk.msra.mxu1 %vm176_vm0, %v5582_v26  ;;  %727 = vmatprep.mubr.f32.mxu1 %v8928_v47  ;;  %v5941_v26 = vld [vmem:[%s8825_s2] sm:$0xff] }
  0x60   :  { %5126 = vmatmul.mubr.msk.f32.gmra.mrb[4].mxu0 %vm343_vm1, %v5104_v1  ;;  %5154 = vmatprep.subr.msk.mxu1 %vm176_vm0, %v5618_v41  ;;  %v5953_v41 = vld [vmem:[%s8825_s2 + $0x8] sm:$0xff] }
  0x61   :  { %650 = vmatprep.mubr.f32.mxu0 %v8928_v47 }
  0x62   :  { %5131 = vmatmul.mubr.msk.f32.gmra.mrb[2].mxu1 %vm343_vm1, %v5103_v40 }
  0x63   :  { %733 = vmatprep.mubr.f32.mxu1 %v8928_v47 }
  0x64   :  { %5127 = vmatmul.mubr.msk.f32.gmra.mrb[6].mxu0 %vm343_vm1, %v5105_v8 }
  0x65   :  { %852 = vmatprep.mubr.f32.mxu0 %v8928_v47 }
  0x66   :  { %5132 = vmatmul.mubr.msk.f32.gmra.mrb[4].mxu1 %vm343_vm1, %v5104_v1  ;;  %v6433_v1 = vld [vmem:[#allocation2 + $0xf8] sm:$0xff] }
  0x67   :  { %739 = vmatprep.mubr.f32.mxu1 %v8928_v47 }
  0x68   :  { %5136 = vmatmul.mubr.msk.f32.vlgmr.msra.gmra.mrb[8].mxu0 %vm343_vm1, %v5941_v26 }
  0x69   :  { %5149 = vmatpush1.msk.msra.mxu0 %vm176_vm0, %v5527_v2  ;;  %858 = vmatprep.mubr.f32.mxu0 %v8928_v47  ;;  %v5965_v2 = vld [vmem:[%s8825_s2 + $0x10] sm:$0xff] }
  0x6a   :  { %5133 = vmatmul.mubr.msk.f32.gmra.mrb[6].mxu1 %vm343_vm1, %v5105_v8  ;;  %5162 = vmatprep.subr.msk.mxu0 %vm176_vm0, %v5545_v9  ;;  %v5980_v9 = vld [vmem:[%s8825_s2 + $0x18] sm:$0xff] }
  0x6b   :  { %941 = vmatprep.mubr.f32.mxu1 %v8928_v47 }
  0x6c   :  { %5137 = vmatmul.mubr.msk.f32.gmra.mrb[10].mxu0 %vm343_vm1, %v5953_v41 }
  0x6d   :  { %864 = vmatprep.mubr.f32.mxu0 %v8928_v47 }
  0x6e   :  { %5142 = vmatmul.mubr.msk.f32.vlgmr.msra.gmra.mrb[8].mxu1 %vm343_vm1, %v5941_v26 }
  0x6f   :  { %5155 = vmatpush1.msk.msra.mxu1 %vm176_vm0, %v5584_v27  ;;  %947 = vmatprep.mubr.f32.mxu1 %v8928_v47  ;;  %v8933_v27 = vld [vmem:[#allocation8_spill] sm:$0xff] }
  0x70   :  { %5138 = vmatmul.mubr.msk.f32.gmra.mrb[12].mxu0 %vm343_vm1, %v5965_v2  ;;  %5168 = vmatprep.subr.msk.mxu1 %vm176_vm0, %v5635_v46  ;;  %v8937_v46 = vld [vmem:[#allocation15_spill] sm:$0xff] }
  0x71   :  { %870 = vmatprep.mubr.f32.mxu0 %v8928_v47 }
  0x72   :  { %5143 = vmatmul.mubr.msk.f32.gmra.mrb[10].mxu1 %vm343_vm1, %v5953_v41 }
  0x73   :  { %953 = vmatprep.mubr.f32.mxu1 %v8928_v47 }
  0x74   :  { %5139 = vmatmul.mubr.msk.f32.gmra.mrb[14].mxu0 %vm343_vm1, %v5980_v9 }
  0x75   :  { %1101 = vmatprep.mubr.f32.mxu0 %v8928_v47 }
  0x76   :  { %5144 = vmatmul.mubr.msk.f32.gmra.mrb[12].mxu1 %vm343_vm1, %v5965_v2 }
  0x77   :  { %959 = vmatprep.mubr.f32.mxu1 %v8928_v47 }
  0x78   :  { %5150 = vmatmul.mubr.msk.f32.vlgmr.msra.gmra.mrb[16].mxu0 %vm343_vm1, %v5941_v26 }
  0x79   :  { %5163 = vmatpush1.msk.msra.mxu0 %vm176_vm0, %v5529_v4  ;;  %1107 = vmatprep.mubr.f32.mxu0 %v8928_v47  ;;  %v8929_v4 = vld [vmem:[#allocation9_spill] sm:$0xff] }
  0x7a   :  { %5145 = vmatmul.mubr.msk.f32.gmra.mrb[14].mxu1 %vm343_vm1, %v5980_v9  ;;  %5176 = vmatprep.subr.msk.mxu0 %vm176_vm0, %v5549_v10  ;;  %v8931_v10 = vld [vmem:[#allocation12_spill] sm:$0xff] }
  0x7b   :  { %1190 = vmatprep.mubr.f32.mxu1 %v8928_v47 }
  0x7c   :  { %5151 = vmatmul.mubr.msk.f32.gmra.mrb[18].mxu0 %vm343_vm1, %v5953_v41 }
  0x7d   :  { %1113 = vmatprep.mubr.f32.mxu0 %v8928_v47 }
  0x7e   :  { %5156 = vmatmul.mubr.msk.f32.vlgmr.msra.gmra.mrb[16].mxu1 %vm343_vm1, %v5941_v26 }
  0x7f   :  { %5169 = vmatpush1.msk.msra.mxu1 %vm176_vm0, %v5593_v31  ;;  %1196 = vmatprep.mubr.f32.mxu1 %v8928_v47  ;;  %v8934_v31 = vld [vmem:[#allocation14_spill] sm:$0xff] }
  0x80   :  { %5152 = vmatmul.mubr.msk.f32.gmra.mrb[20].mxu0 %vm343_vm1, %v5965_v2  ;;  %5182 = vmatprep.subr.msk.mxu1 %vm176_vm0, %v5641_v49  ;;  %v8853_v49 = vmov 0  }
  0x81   :  { %1119 = vmatprep.mubr.f32.mxu0 %v8928_v47  ;;  %5382 = vset.pattern.permute.xlu0 %v8853_v49  ;;  %v968_v28 = vsel %vm5146_vm2, 1, %v8853_v49  ;;  %v969_v17 = vsel %vm5147_vm3, 1, %v8853_v49 }
  0x82   :  { %5157 = vmatmul.mubr.msk.f32.gmra.mrb[18].mxu1 %vm343_vm1, %v5953_v41  ;;  %5383 = vset.pattern.permute.xlu1 %v8853_v49  ;;  %v973_v50 = vrot.slane %v968_v28, %v6362_v58  ;;  %v977_v30 = vrot.slane %v968_v28, %v6366_v62  ;;  %v981_v39 = vrot.slane %v969_v17, %v6362_v58 }
  0x83   :  { %1202 = vmatprep.mubr.f32.mxu1 %v8928_v47  ;;  %5019 = vperm.xlu0 %5382, %v5013_v18   ;;  %v985_v0 = vrot.slane %v969_v17, %v6366_v62 }
  0x84   :  { %5153 = vmatmul.mubr.msk.f32.gmra.mrb[22].mxu0 %vm343_vm1, %v5980_v9  ;;  %v6405_v12 = vrot.slane %v973_v50, %v6362_v58  ;;  %v6412_v23 = vrot.slane %v977_v30, %v6362_v58 }
  0x85   :  { %1366 = vmatprep.mubr.f32.mxu0 %v8928_v47 }
  0x86   :  { %5158 = vmatmul.mubr.msk.f32.gmra.mrb[20].mxu1 %vm343_vm1, %v5965_v2  ;;  %vm1002_vm4 = vcmp.eq.s32.totalorder %v6405_v12, 1  ;;  %vm1003_vm5 = vcmp.eq.s32.totalorder %v6412_v23, 1 }
  0x87   :  { %1208 = vmatprep.mubr.f32.mxu1 %v8928_v47 }
  0x88   :  { %5164 = vmatmul.mubr.msk.f32.vlgmr.msra.gmra.mrb[24].mxu0 %vm343_vm1, %v5941_v26 }
  0x89   :  { %5177 = vmatpush1.msk.msra.mxu0 %vm176_vm0, %v5531_v5  ;;  %1372 = vmatprep.mubr.f32.mxu0 %v8928_v47  ;;  %v8930_v5 = vld [vmem:[#allocation20_spill] sm:$0xff] }
  0x8a   :  { %5159 = vmatmul.mubr.msk.f32.gmra.mrb[22].mxu1 %vm343_vm1, %v5980_v9  ;;  %5190 = vmatprep.subr.msk.mxu0 %vm176_vm0, %v8929_v4 }
  0x8b   :  { %1455 = vmatprep.mubr.f32.mxu1 %v8928_v47 }
  0x8c   :  { %5165 = vmatmul.mubr.msk.f32.gmra.mrb[26].mxu0 %vm343_vm1, %v5953_v41 }
  0x8d   :  { %1378 = vmatprep.mubr.f32.mxu0 %v8928_v47 }
  0x8e   :  { %5170 = vmatmul.mubr.msk.f32.vlgmr.msra.gmra.mrb[24].mxu1 %vm343_vm1, %v5941_v26 }
  0x8f   :  { %5183 = vmatpush1.msk.msra.mxu1 %vm176_vm0, %v5601_v34  ;;  %1461 = vmatprep.mubr.f32.mxu1 %v8928_v47  ;;  %v8935_v34 = vld [vmem:[#allocation22_spill] sm:$0xff] }
  0x90   :  { %5166 = vmatmul.mubr.msk.f32.gmra.mrb[28].mxu0 %vm343_vm1, %v5965_v2  ;;  %5196 = vmatprep.subr.msk.mxu1 %vm176_vm0, %v8930_v5  ;;  %v5014_v5 = vld [vmem:[%s8826_s3 + $0x8] sm:$0xff] }
  0x91   :  { %1384 = vmatprep.mubr.f32.mxu0 %v8928_v47  ;;  %5024 = vperm.xlu0 %5382, %v5014_v5  }
  0x92   :  { %5171 = vmatmul.mubr.msk.f32.gmra.mrb[26].mxu1 %vm343_vm1, %v5953_v41 }
  0x93   :  { %1467 = vmatprep.mubr.f32.mxu1 %v8928_v47 }
  0x94   :  { %5167 = vmatmul.mubr.msk.f32.gmra.mrb[30].mxu0 %vm343_vm1, %v5980_v9 }
  0x95   :  { %1631 = vmatprep.mubr.f32.mxu0 %v8928_v47 }
  0x96   :  { %5172 = vmatmul.mubr.msk.f32.gmra.mrb[28].mxu1 %vm343_vm1, %v5965_v2 }
  0x97   :  { %1473 = vmatprep.mubr.f32.mxu1 %v8928_v47 }
  0x98   :  { %5178 = vmatmul.mubr.msk.f32.vlgmr.msra.gmra.mrb[32].mxu0 %vm343_vm1, %v5941_v26 }
  0x99   :  { %5191 = vmatpush1.msk.msra.mxu0 %vm176_vm0, %v5533_v6  ;;  %1637 = vmatprep.mubr.f32.mxu0 %v8928_v47  ;;  %v8932_v6 = vld [vmem:[#allocation21_spill] sm:$0xff] }
  0x9a   :  { %5173 = vmatmul.mubr.msk.f32.gmra.mrb[30].mxu1 %vm343_vm1, %v5980_v9  ;;  %5204 = vmatprep.subr.msk.mxu0 %vm176_vm0, %v8931_v10 }
  0x9b   :  { %1720 = vmatprep.mubr.f32.mxu1 %v8928_v47 }
  0x9c   :  { %5179 = vmatmul.mubr.msk.f32.gmra.mrb[34].mxu0 %vm343_vm1, %v5953_v41 }
  0x9d   :  { %1643 = vmatprep.mubr.f32.mxu0 %v8928_v47 }
  0x9e   :  { %5184 = vmatmul.mubr.msk.f32.vlgmr.msra.gmra.mrb[32].mxu1 %vm343_vm1, %v5941_v26 }
  0x9f   :  { %5197 = vmatpush1.msk.msra.mxu1 %vm176_vm0, %v5631_v45  ;;  %1726 = vmatprep.mubr.f32.mxu1 %v8928_v47  ;;  %v8936_v45 = vld [vmem:[#allocation11_spill] sm:$0xff] }
  0xa0   :  { %5180 = vmatmul.mubr.msk.f32.gmra.mrb[36].mxu0 %vm343_vm1, %v5965_v2  ;;  %5210 = vmatprep.subr.msk.mxu1 %vm176_vm0, %v8932_v6 }
  0xa1   :  { %1649 = vmatprep.mubr.f32.mxu0 %v8928_v47 }
  0xa2   :  { %5185 = vmatmul.mubr.msk.f32.gmra.mrb[34].mxu1 %vm343_vm1, %v5953_v41 }
  0xa3   :  { %1732 = vmatprep.mubr.f32.mxu1 %v8928_v47 }
  0xa4   :  { %5181 = vmatmul.mubr.msk.f32.gmra.mrb[38].mxu0 %vm343_vm1, %v5980_v9 }
  0xa5   :  { %1896 = vmatprep.mubr.f32.mxu0 %v8928_v47 }
  0xa6   :  { %5186 = vmatmul.mubr.msk.f32.gmra.mrb[36].mxu1 %vm343_vm1, %v5965_v2 }
  0xa7   :  { %1738 = vmatprep.mubr.f32.mxu1 %v8928_v47 }
  0xa8   :  { %5192 = vmatmul.mubr.msk.f32.vlgmr.msra.gmra.mrb[40].mxu0 %vm343_vm1, %v5941_v26 }
  0xa9   :  { %5205 = vmatpush1.msk.msra.mxu0 %vm176_vm0, %v8933_v27  ;;  %1902 = vmatprep.mubr.f32.mxu0 %v8928_v47  ;;  %v6452_v27 = vrot.slane %v981_v39, %v6362_v58  ;;  %v1218_v39 = vsel %vm5161_vm9, 1, %v8853_v49 }
  0xaa   :  { %5187 = vmatmul.mubr.msk.f32.gmra.mrb[38].mxu1 %vm343_vm1, %v5980_v9  ;;  %5218 = vmatprep.subr.msk.mxu0 %vm176_vm0, %v8934_v31  ;;  %v6457_v31 = vld [vmem:[%s8824_s1] sm:$0xff] }
  0xab   :  { %1985 = vmatprep.mubr.f32.mxu1 %v8928_v47  ;;  %vm5160_vm6 = vcmp.gt.f32.partialorder %v6457_v31, 1.0  ;;  %vm1004_vm7 = vcmp.eq.s32.totalorder %v6452_v27, 1  ;;  %vm5174_vm12 = vcmp.gt.f32.partialorder %v6457_v31, 2.0  ;;  %vm5188_vm3 = vcmp.gt.f32.partialorder %v6457_v31, 3.0 }
  0xac   :  { %5193 = vmatmul.mubr.msk.f32.gmra.mrb[42].mxu0 %vm343_vm1, %v5953_v41 }
  0xad   :  { %1908 = vmatprep.mubr.f32.mxu0 %v8928_v47 }
  0xae   :  { %5198 = vmatmul.mubr.msk.f32.vlgmr.msra.gmra.mrb[40].mxu1 %vm343_vm1, %v5941_v26 }
  0xaf   :  { %5211 = vmatpush1.msk.msra.mxu1 %vm176_vm0, %v5663_v57  ;;  %1991 = vmatprep.mubr.f32.mxu1 %v8928_v47  ;;  %v8938_v57 = vld [vmem:[#allocation23_spill] sm:$0xff] }
  0xb0   :  { %5194 = vmatmul.mubr.msk.f32.gmra.mrb[44].mxu0 %vm343_vm1, %v5965_v2  ;;  %5224 = vmatprep.subr.msk.mxu1 %vm176_vm0, %v8935_v34  ;;  %v5015_v34 = vld [vmem:[%s8826_s3 + $0x10] sm:$0xff] }
  0xb1   :  { %1914 = vmatprep.mubr.f32.mxu0 %v8928_v47  ;;  %5029 = vperm.xlu1 %5383, %v5015_v34  }
  0xb2   :  { %5199 = vmatmul.mubr.msk.f32.gmra.mrb[42].mxu1 %vm343_vm1, %v5953_v41 }
  0xb3   :  { %1997 = vmatprep.mubr.f32.mxu1 %v8928_v47 }
  0xb4   :  { %5195 = vmatmul.mubr.msk.f32.gmra.mrb[46].mxu0 %vm343_vm1, %v5980_v9 }
  0xb5   :  { %2161 = vmatprep.mubr.f32.mxu0 %v8928_v47 }
  0xb6   :  { %5200 = vmatmul.mubr.msk.f32.gmra.mrb[44].mxu1 %vm343_vm1, %v5965_v2 }
  0xb7   :  { %2003 = vmatprep.mubr.f32.mxu1 %v8928_v47 }
  0xb8   :  { %5206 = vmatmul.mubr.msk.f32.vlgmr.msra.gmra.mrb[48].mxu0 %vm343_vm1, %v5941_v26 }
  0xb9   :  { %5219 = vmatpush1.msk.msra.mxu0 %vm176_vm0, %v8936_v45  ;;  %2167 = vmatprep.mubr.f32.mxu0 %v8928_v47 }
  0xba   :  { %5201 = vmatmul.mubr.msk.f32.gmra.mrb[46].mxu1 %vm343_vm1, %v5980_v9  ;;  %5232 = vmatprep.subr.msk.mxu0 %vm176_vm0, %v8937_v46 }
  0xbb   :  { %2250 = vmatprep.mubr.f32.mxu1 %v8928_v47 }
  0xbc   :  { %5207 = vmatmul.mubr.msk.f32.gmra.mrb[50].mxu0 %vm343_vm1, %v5953_v41 }
  0xbd   :  { %2173 = vmatprep.mubr.f32.mxu0 %v8928_v47 }
  0xbe   :  { %5212 = vmatmul.mubr.msk.f32.vlgmr.msra.gmra.mrb[48].mxu1 %vm343_vm1, %v5941_v26 }
  0xbf   :  { %5225 = vmatpush1.msk.msra.mxu1 %vm176_vm0, %v5681_v14  ;;  %2256 = vmatprep.mubr.f32.mxu1 %v8928_v47  ;;  %v8939_v14 = vld [vmem:[#allocation13_spill] sm:$0xff] }
  0xc0   :  { %5208 = vmatmul.mubr.msk.f32.gmra.mrb[52].mxu0 %vm343_vm1, %v5965_v2  ;;  %5238 = vmatprep.subr.msk.mxu1 %vm176_vm0, %v8938_v57  ;;  %v6469_v57 = vrot.slane %v985_v0, %v6362_v58 }
  0xc1   :  { %2179 = vmatprep.mubr.f32.mxu0 %v8928_v47 }
  0xc2   :  { %5213 = vmatmul.mubr.msk.f32.gmra.mrb[50].mxu1 %vm343_vm1, %v5953_v41  ;;  %vm1005_vm8 = vcmp.eq.s32.totalorder %v6469_v57, 1 }
  0xc3   :  { %2262 = vmatprep.mubr.f32.mxu1 %v8928_v47 }
  0xc4   :  { %5209 = vmatmul.mubr.msk.f32.gmra.mrb[54].mxu0 %vm343_vm1, %v5980_v9 }
  0xc5   :  { %2426 = vmatprep.mubr.f32.mxu0 %v8928_v47 }
  0xc6   :  { %5214 = vmatmul.mubr.msk.f32.gmra.mrb[52].mxu1 %vm343_vm1, %v5965_v2 }
  0xc7   :  { %2268 = vmatprep.mubr.f32.mxu1 %v8928_v47 }
  0xc8   :  { %5220 = vmatmul.mubr.msk.f32.vlgmr.msra.gmra.mrb[56].mxu0 %vm343_vm1, %v5941_v26 }
  0xc9   :  { %5233 = vmatpush1.msk.msra.mxu0 %vm176_vm0, %v8939_v14  ;;  %2432 = vmatprep.mubr.f32.mxu0 %v8928_v47  ;;  %v4738_v14 = vcombine.high %v6433_v1, %v6433_v1 }
  0xca   :  { %5215 = vmatmul.mubr.msk.f32.gmra.mrb[54].mxu1 %vm343_vm1, %v5980_v9  ;;  %5246 = vmatprep.subr.msk.mxu0 %vm176_vm0, %v8940_v44 }
  0xcb   :  { %2515 = vmatprep.mubr.f32.mxu1 %v8928_v47 }
  0xcc   :  { %5221 = vmatmul.mubr.msk.f32.gmra.mrb[58].mxu0 %vm343_vm1, %v5953_v41 }
  0xcd   :  { %2438 = vmatprep.mubr.f32.mxu0 %v8928_v47 }
  0xce   :  { %5226 = vmatmul.mubr.msk.f32.vlgmr.msra.gmra.mrb[56].mxu1 %vm343_vm1, %v5941_v26 }
  0xcf   :  { %5239 = vmatpush1.msk.msra.mxu1 %vm176_vm0, %v5687_v24  ;;  %2521 = vmatprep.mubr.f32.mxu1 %v8928_v47  ;;  %v8942_v24 = vld [vmem:[#allocation17_spill] sm:$0xff] }
  0xd0   :  { %5222 = vmatmul.mubr.msk.f32.gmra.mrb[60].mxu0 %vm343_vm1, %v5965_v2  ;;  %5252 = vmatprep.subr.msk.mxu1 %vm176_vm0, %v8941_v13 }
  0xd1   :  { %2444 = vmatprep.mubr.f32.mxu0 %v8928_v47 }
  0xd2   :  { %5227 = vmatmul.mubr.msk.f32.gmra.mrb[58].mxu1 %vm343_vm1, %v5953_v41 }
  0xd3   :  { %2527 = vmatprep.mubr.f32.mxu1 %v8928_v47 }
  0xd4   :  { %5223 = vmatmul.mubr.msk.f32.gmra.mrb[62].mxu0 %vm343_vm1, %v5980_v9 }
  0xd5   :  { %2691 = vmatprep.mubr.f32.mxu0 %v8928_v47 }
  0xd6   :  { %5228 = vmatmul.mubr.msk.f32.gmra.mrb[60].mxu1 %vm343_vm1, %v5965_v2 }
  0xd7   :  { %2533 = vmatprep.mubr.f32.mxu1 %v8928_v47 }
  0xd8   :  { %5234 = vmatmul.mubr.msk.f32.vlgmr.msra.gmra.mrb[64].mxu0 %vm343_vm1, %v5941_v26 }
  0xd9   :  { %5247 = vmatpush1.msk.msra.mxu0 %vm176_vm0, %v5591_v29  ;;  %2697 = vmatprep.mubr.f32.mxu0 %v8928_v47  ;;  %v8943_v29 = vld [vmem:[#allocation25_spill] sm:$0xff] }
  0xda   :  { %5229 = vmatmul.mubr.msk.f32.gmra.mrb[62].mxu1 %vm343_vm1, %v5980_v9  ;;  %5260 = vmatprep.subr.msk.mxu0 %vm176_vm0, %v8942_v24 }
  0xdb   :  { %2780 = vmatprep.mubr.f32.mxu1 %v8928_v47 }
  0xdc   :  { %5235 = vmatmul.mubr.msk.f32.gmra.mrb[66].mxu0 %vm343_vm1, %v5953_v41 }
  0xdd   :  { %2703 = vmatprep.mubr.f32.mxu0 %v8928_v47 }
  0xde   :  { %5240 = vmatmul.mubr.msk.f32.vlgmr.msra.gmra.mrb[64].mxu1 %vm343_vm1, %v5941_v26 }
  0xdf   :  { %5253 = vmatpush1.msk.msra.mxu1 %vm176_vm0, %v5712_v32  ;;  %2786 = vmatprep.mubr.f32.mxu1 %v8928_v47  ;;  %v8944_v32 = vld [vmem:[#allocation18_spill] sm:$0xff] }
  0xe0   :  { %5236 = vmatmul.mubr.msk.f32.gmra.mrb[68].mxu0 %vm343_vm1, %v5965_v2  ;;  %5266 = vmatprep.subr.msk.mxu1 %vm176_vm0, %v8943_v29 }
  0xe1   :  { %2709 = vmatprep.mubr.f32.mxu0 %v8928_v47 }
  0xe2   :  { %5241 = vmatmul.mubr.msk.f32.gmra.mrb[66].mxu1 %vm343_vm1, %v5953_v41 }
  0xe3   :  { %2792 = vmatprep.mubr.f32.mxu1 %v8928_v47 }
  0xe4   :  { %5237 = vmatmul.mubr.msk.f32.gmra.mrb[70].mxu0 %vm343_vm1, %v5980_v9 }
  0xe5   :  { %2956 = vmatprep.mubr.f32.mxu0 %v8928_v47 }
  0xe6   :  { %5242 = vmatmul.mubr.msk.f32.gmra.mrb[68].mxu1 %vm343_vm1, %v5965_v2 }
  0xe7   :  { %2798 = vmatprep.mubr.f32.mxu1 %v8928_v47 }
  0xe8   :  { %5248 = vmatmul.mubr.msk.f32.vlgmr.msra.gmra.mrb[72].mxu0 %vm343_vm1, %v5941_v26 }
  0xe9   :  { %5261 = vmatpush1.msk.msra.mxu0 %vm176_vm0, %v5603_v35  ;;  %2962 = vmatprep.mubr.f32.mxu0 %v8928_v47  ;;  %v8945_v35 = vld [vmem:[#allocation26_spill] sm:$0xff] }
  0xea   :  { %5243 = vmatmul.mubr.msk.f32.gmra.mrb[70].mxu1 %vm343_vm1, %v5980_v9  ;;  %5274 = vmatprep.subr.msk.mxu0 %vm176_vm0, %v8944_v32  ;;  %v1217_v32 = vsel %vm5160_vm6, 1, %v8853_v49 }
  0xeb   :  { %3045 = vmatprep.mubr.f32.mxu1 %v8928_v47  ;;  %v1226_v28 = vrot.slane %v1217_v32, %v6366_v62 }
  0xec   :  { %5249 = vmatmul.mubr.msk.f32.gmra.mrb[74].mxu0 %vm343_vm1, %v5953_v41 }
  0xed   :  { %2968 = vmatprep.mubr.f32.mxu0 %v8928_v47 }
  0xee   :  { %5254 = vmatmul.mubr.msk.f32.vlgmr.msra.gmra.mrb[72].mxu1 %vm343_vm1, %v5941_v26 }
  0xef   :  { %5267 = vmatpush1.msk.msra.mxu1 %vm176_vm0, %v5724_v3  ;;  %3051 = vmatprep.mubr.f32.mxu1 %v8928_v47  ;;  %v8946_v3 = vld [vmem:[#allocation19_spill] sm:$0xff] }
  0xf0   :  { %5250 = vmatmul.mubr.msk.f32.gmra.mrb[76].mxu0 %vm343_vm1, %v5965_v2  ;;  %5280 = vmatprep.subr.msk.mxu1 %vm176_vm0, %v8945_v35 }
  0xf1   :  { %2974 = vmatprep.mubr.f32.mxu0 %v8928_v47 }
  0xf2   :  { %5255 = vmatmul.mubr.msk.f32.gmra.mrb[74].mxu1 %vm343_vm1, %v5953_v41 }
  0xf3   :  { %3057 = vmatprep.mubr.f32.mxu1 %v8928_v47 }
  0xf4   :  { %5251 = vmatmul.mubr.msk.f32.gmra.mrb[78].mxu0 %vm343_vm1, %v5980_v9 }
  0xf5   :  { %3221 = vmatprep.mubr.f32.mxu0 %v8928_v47 }
  0xf6   :  { %5256 = vmatmul.mubr.msk.f32.gmra.mrb[76].mxu1 %vm343_vm1, %v5965_v2 }
  0xf7   :  { %3063 = vmatprep.mubr.f32.mxu1 %v8928_v47 }
  0xf8   :  { %5262 = vmatmul.mubr.msk.f32.vlgmr.msra.gmra.mrb[80].mxu0 %vm343_vm1, %v5941_v26 }
  0xf9   :  { %5275 = vmatpush1.msk.msra.mxu0 %vm176_vm0, %v5605_v36  ;;  %3227 = vmatprep.mubr.f32.mxu0 %v8928_v47  ;;  %v8947_v36 = vld [vmem:[#allocation27_spill] sm:$0xff] }
  0xfa   :  { %5257 = vmatmul.mubr.msk.f32.gmra.mrb[78].mxu1 %vm343_vm1, %v5980_v9  ;;  %5288 = vmatprep.subr.msk.mxu0 %vm176_vm0, %v8946_v3 }
  0xfb   :  { %3310 = vmatprep.mubr.f32.mxu1 %v8928_v47 }
  0xfc   :  { %5263 = vmatmul.mubr.msk.f32.gmra.mrb[82].mxu0 %vm343_vm1, %v5953_v41 }
  0xfd   :  { %3233 = vmatprep.mubr.f32.mxu0 %v8928_v47 }
  0xfe   :  { %5268 = vmatmul.mubr.msk.f32.vlgmr.msra.gmra.mrb[80].mxu1 %vm343_vm1, %v5941_v26 }
  0xff   :  { %5281 = vmatpush1.msk.msra.mxu1 %vm176_vm0, %v5728_v33  ;;  %3316 = vmatprep.mubr.f32.mxu1 %v8928_v47  ;;  %v3942_v33 = vcombine.high %v3938_v61, %v3938_v61 }
 0x100   :  { %5264 = vmatmul.mubr.msk.f32.gmra.mrb[84].mxu0 %vm343_vm1, %v5965_v2  ;;  %5294 = vmatprep.subr.msk.mxu1 %vm176_vm0, %v8947_v36  ;;  %v5016_v36 = vld [vmem:[%s8826_s3 + $0x18] sm:$0xff] }
 0x101   :  { %3239 = vmatprep.mubr.f32.mxu0 %v8928_v47  ;;  %5034 = vperm.xlu1 %5383, %v5016_v36  }
 0x102   :  { %5269 = vmatmul.mubr.msk.f32.gmra.mrb[82].mxu1 %vm343_vm1, %v5953_v41 }
 0x103   :  { %3322 = vmatprep.mubr.f32.mxu1 %v8928_v47 }
 0x104   :  { %5265 = vmatmul.mubr.msk.f32.gmra.mrb[86].mxu0 %vm343_vm1, %v5980_v9 }
 0x105   :  { %3486 = vmatprep.mubr.f32.mxu0 %v8928_v47 }
 0x106   :  { %5270 = vmatmul.mubr.msk.f32.gmra.mrb[84].mxu1 %vm343_vm1, %v5965_v2 }
 0x107   :  { %3328 = vmatprep.mubr.f32.mxu1 %v8928_v47 }
 0x108   :  { %5276 = vmatmul.mubr.msk.f32.vlgmr.msra.gmra.mrb[88].mxu0 %vm343_vm1, %v5941_v26 }
 0x109   :  { %5289 = vmatpush1.msk.msra.mxu0 %vm176_vm0, %v5607_v37  ;;  %3492 = vmatprep.mubr.f32.mxu0 %v8928_v47  ;;  %v8948_v37 = vld [vmem:[#allocation28_spill] sm:$0xff] }
 0x10a   :  { %5271 = vmatmul.mubr.msk.f32.gmra.mrb[86].mxu1 %vm343_vm1, %v5980_v9  ;;  %5302 = vmatprep.subr.msk.mxu0 %vm176_vm0, %v3942_v33 }
 0x10b   :  { %3575 = vmatprep.mubr.f32.mxu1 %v8928_v47 }
 0x10c   :  { %5277 = vmatmul.mubr.msk.f32.gmra.mrb[90].mxu0 %vm343_vm1, %v5953_v41 }
 0x10d   :  { %3498 = vmatprep.mubr.f32.mxu0 %v8928_v47 }
 0x10e   :  { %5282 = vmatmul.mubr.msk.f32.vlgmr.msra.gmra.mrb[88].mxu1 %vm343_vm1, %v5941_v26 }
 0x10f   :  { %5295 = vmatpush1.msk.msra.mxu1 %vm176_vm0, %v5730_v48  ;;  %3581 = vmatprep.mubr.f32.mxu1 %v8928_v47  ;;  %v4207_v48 = vcombine.high %v4203_v51, %v4203_v51 }
 0x110   :  { %5278 = vmatmul.mubr.msk.f32.gmra.mrb[92].mxu0 %vm343_vm1, %v5965_v2  ;;  %5308 = vmatprep.subr.msk.mxu1 %vm176_vm0, %v8948_v37 }
 0x111   :  { %3504 = vmatprep.mubr.f32.mxu0 %v8928_v47 }
 0x112   :  { %5283 = vmatmul.mubr.msk.f32.gmra.mrb[90].mxu1 %vm343_vm1, %v5953_v41 }
 0x113   :  { %3587 = vmatprep.mubr.f32.mxu1 %v8928_v47 }
 0x114   :  { %5279 = vmatmul.mubr.msk.f32.gmra.mrb[94].mxu0 %vm343_vm1, %v5980_v9 }
 0x115   :  { %3751 = vmatprep.mubr.f32.mxu0 %v8928_v47 }
 0x116   :  { %5284 = vmatmul.mubr.msk.f32.gmra.mrb[92].mxu1 %vm343_vm1, %v5965_v2 }
 0x117   :  { %3593 = vmatprep.mubr.f32.mxu1 %v8928_v47 }
 0x118   :  { %5290 = vmatmul.mubr.msk.f32.vlgmr.msra.gmra.mrb[96].mxu0 %vm343_vm1, %v5941_v26 }
 0x119   :  { %5303 = vmatpush1.msk.msra.mxu0 %vm176_vm0, %v3938_v61  ;;  %3757 = vmatprep.mubr.f32.mxu0 %v8928_v47 }
 0x11a   :  { %5285 = vmatmul.mubr.msk.f32.gmra.mrb[94].mxu1 %vm343_vm1, %v5980_v9  ;;  %5316 = vmatprep.subr.msk.mxu0 %vm176_vm0, %v4207_v48 }
 0x11b   :  { %3840 = vmatprep.mubr.f32.mxu1 %v8928_v47 }
 0x11c   :  { %5291 = vmatmul.mubr.msk.f32.gmra.mrb[98].mxu0 %vm343_vm1, %v5953_v41 }
 0x11d   :  { %3763 = vmatprep.mubr.f32.mxu0 %v8928_v47 }
 0x11e   :  { %5296 = vmatmul.mubr.msk.f32.vlgmr.msra.gmra.mrb[96].mxu1 %vm343_vm1, %v5941_v26 }
 0x11f   :  { %5309 = vmatpush1.msk.msra.mxu1 %vm176_vm0, %v5759_v54  ;;  %3846 = vmatprep.mubr.f32.mxu1 %v8928_v47  ;;  %v4472_v54 = vcombine.high %v4468_v52, %v4468_v52 }
 0x120   :  { %5292 = vmatmul.mubr.msk.f32.gmra.mrb[100].mxu0 %vm343_vm1, %v5965_v2  ;;  %5322 = vmatprep.subr.msk.mxu1 %vm176_vm0, %v5789_v22  ;;  %v6346_v22 = vld [vmem:[#allocation2 + $0xe8] sm:$0xff] }
 0x121   :  { %3769 = vmatprep.mubr.f32.mxu0 %v8928_v47  ;;  %v4473_v55 = vcombine.high %v6346_v22, %v6346_v22 }
 0x122   :  { %5297 = vmatmul.mubr.msk.f32.gmra.mrb[98].mxu1 %vm343_vm1, %v5953_v41 }
 0x123   :  { %3852 = vmatprep.mubr.f32.mxu1 %v8928_v47 }
 0x124   :  { %5293 = vmatmul.mubr.msk.f32.gmra.mrb[102].mxu0 %vm343_vm1, %v5980_v9 }
 0x125   :  { %4016 = vmatprep.mubr.f32.mxu0 %v8928_v47 }
 0x126   :  { %5298 = vmatmul.mubr.msk.f32.gmra.mrb[100].mxu1 %vm343_vm1, %v5965_v2 }
 0x127   :  { %3858 = vmatprep.mubr.f32.mxu1 %v8928_v47 }
 0x128   :  { %5304 = vmatmul.mubr.msk.f32.vlgmr.msra.gmra.mrb[104].mxu0 %vm343_vm1, %v5941_v26 }
 0x129   :  { %5317 = vmatpush1.msk.msra.mxu0 %vm176_vm0, %v4203_v51  ;;  %4022 = vmatprep.mubr.f32.mxu0 %v8928_v47 }
 0x12a   :  { %5299 = vmatmul.mubr.msk.f32.gmra.mrb[102].mxu1 %vm343_vm1, %v5980_v9  ;;  %5330 = vmatprep.subr.msk.mxu0 %vm176_vm0, %v4472_v54  ;;  %v1222_v54 = vrot.slane %v1217_v32, %v6362_v58 }
 0x12b   :  { %4105 = vmatprep.mubr.f32.mxu1 %v8928_v47  ;;  %v6352_v43 = vpop.f32.mrb[0].mxu0 }
 0x12c   :  { %8949 = vst [vmem:[#allocation9_spill] sm:$0xff] %v6352_v43  ;;  %v6355_v20 = vpop.f32.mrb[1].mxu0  ;;  %5305 = vmatmul.mubr.msk.f32.gmra.mrb[106].mxu0 %vm343_vm1, %v5953_v41  ;;  %v6436_v8 = vsub.f32 0.0, %v6352_v43  ;;  %v6565_v34 = vrot.slane %v1222_v54, %v6362_v58  ;;  %v1230_v54 = vrot.slane %v1218_v39, %v6362_v58 }
 0x12d   :  { %8950 = vst [vmem:[#allocation20_spill] sm:$0xff] %v6355_v20  ;;  %4028 = vmatprep.mubr.f32.mxu0 %v8928_v47  ;;  %v6448_v10 = vsub.f32 0.0, %v6355_v20 }
 0x12e   :  { %5310 = vmatmul.mubr.msk.f32.vlgmr.msra.gmra.mrb[104].mxu1 %vm343_vm1, %v5941_v26  ;;  %8963 = vst [vmem:[#allocation17_spill] sm:$0xff] %v6436_v8  ;;  %vm1251_vm10 = vcmp.eq.s32.totalorder %v6565_v34, 1 }
 0x12f   :  { %5323 = vmatpush1.msk.msra.mxu1 %vm176_vm0, %v5771_v60  ;;  %4111 = vmatprep.mubr.f32.mxu1 %v8928_v47  ;;  %v6374_v56 = vpop.f32.mrb[2].mxu0 }
 0x130   :  { %8952 = vst [vmem:[#allocation12_spill] sm:$0xff] %v6374_v56  ;;  %v6376_v15 = vpop.f32.mrb[3].mxu0  ;;  %5306 = vmatmul.mubr.msk.f32.gmra.mrb[108].mxu0 %vm343_vm1, %v5965_v2  ;;  %5336 = vmatprep.subr.msk.mxu1 %vm176_vm0, %v4473_v55  ;;  %v6484_v24 = vsub.f32 0.0, %v6374_v56 }
 0x131   :  { %8953 = vst [vmem:[#allocation21_spill] sm:$0xff] %v6376_v15  ;;  %v6381_v59 = vpop.f32.mrb[0].mxu1  ;;  %4034 = vmatprep.mubr.f32.mxu0 %v8928_v47  ;;  %v6492_v35 = vsub.f32 0.0, %v6376_v15 }
 0x132   :  { %8954 = vst [vmem:[#allocation8_spill] sm:$0xff] %v6381_v59  ;;  %v6386_v60 = vpop.f32.mrb[1].mxu1  ;;  %5311 = vmatmul.mubr.msk.f32.gmra.mrb[106].mxu1 %vm343_vm1, %v5953_v41  ;;  %v6502_v61 = vsub.f32 0.0, %v6381_v59 }
 0x133   :  { %8955 = vst [vmem:[#allocation14_spill] sm:$0xff] %v6386_v60  ;;  %4117 = vmatprep.mubr.f32.mxu1 %v8928_v47  ;;  %v6392_v16 = vpop.f32.mrb[4].mxu0  ;;  %v6514_v51 = vsub.f32 0.0, %v6386_v60 }
 0x134   :  { %8956 = vst [vmem:[#allocation22_spill] sm:$0xff] %v6392_v16  ;;  %v6396_v38 = vpop.f32.mrb[5].mxu0  ;;  %5307 = vmatmul.mubr.msk.f32.gmra.mrb[110].mxu0 %vm343_vm1, %v5980_v9 }
 0x135   :  { %8957 = vst [vmem:[#allocation11_spill] sm:$0xff] %v6396_v38  ;;  %v6401_v21 = vpop.f32.mrb[2].mxu1  ;;  %4281 = vmatprep.mubr.f32.mxu0 %v8928_v47  ;;  %v6536_v50 = vsub.f32 0.0, %v6396_v38 }
 0x136   :  { %8958 = vst [vmem:[#allocation15_spill] sm:$0xff] %v6401_v21  ;;  %v6407_v19 = vpop.f32.mrb[3].mxu1  ;;  %5312 = vmatmul.mubr.msk.f32.gmra.mrb[108].mxu1 %vm343_vm1, %v5965_v2  ;;  %v6545_v17 = vsub.f32 0.0, %v6401_v21 }
 0x137   :  { %8959 = vst [vmem:[#allocation23_spill] sm:$0xff] %v6407_v19  ;;  %4123 = vmatprep.mubr.f32.mxu1 %v8928_v47  ;;  %v6420_v25 = vpop.f32.mrb[6].mxu0  ;;  %8967 = vst [vmem:[#allocation19_spill] sm:$0xff] %v6536_v50  ;;  %v6556_v0 = vsub.f32 0.0, %v6407_v19 }
 0x138   :  { %8960 = vst [vmem:[#allocation13_spill] sm:$0xff] %v6420_v25  ;;  %v6423_v7 = vpop.f32.mrb[7].mxu0  ;;  %5318 = vmatmul.mubr.msk.f32.vlgmr.msra.gmra.mrb[112].mxu0 %vm343_vm1, %v5941_v26  ;;  %8968 = vst [vmem:[#allocation27_spill] sm:$0xff] %v6545_v17 }
 0x139   :  { %8961 = vst [vmem:[#allocation16_spill] sm:$0xff] %v6423_v7  ;;  %v6428_v40 = vpop.f32.mrb[4].mxu1  ;;  %5331 = vmatpush1.msk.msra.mxu0 %vm176_vm0, %v4468_v52  ;;  %4287 = vmatprep.mubr.f32.mxu0 %v8928_v47  ;;  %8969 = vst [vmem:[#allocation28_spill] sm:$0xff] %v6556_v0  ;;  %v6581_v36 = vsub.f32 0.0, %v6423_v7 }
 0x13a   :  { %8962 = vst [vmem:[#allocation24_spill] sm:$0xff] %v6428_v40  ;;  %v6438_v4 = vpop.f32.mrb[5].mxu1  ;;  %5313 = vmatmul.mubr.msk.f32.gmra.mrb[110].mxu1 %vm343_vm1, %v5980_v9  ;;  %5344 = vmatprep.subr.msk.mxu0 %vm176_vm0, %v4737_v53 }
 0x13b   :  { %8964 = vst [vmem:[#allocation25_spill] sm:$0xff] %v6438_v4  ;;  %4370 = vmatprep.mubr.f32.mxu1 %v8928_v47  ;;  %v854_v6 = vpop.f32.mrb[8].mxu0 }
 0x13c   :  { %v6466_v45 = vsel %vm1002_vm4, %v854_v6, %v6436_v8  ;;  %v856_v46 = vpop.f32.mrb[9].mxu0  ;;  %5319 = vmatmul.mubr.msk.f32.gmra.mrb[114].mxu0 %vm343_vm1, %v5953_v41 }
 0x13d   :  { %v6475_v44 = vpop.f32.mrb[6].mxu1  ;;  %v6480_v13 = vsel %vm1003_vm5, %v856_v46, %v6448_v10  ;;  %4293 = vmatprep.mubr.f32.mxu0 %v8928_v47  ;;  %v6568_v46 = vsub.f32 0.0, %v6420_v25 }
 0x13e   :  { %8965 = vst [vmem:[#allocation18_spill] sm:$0xff] %v6475_v44  ;;  %v6486_v29 = vpop.f32.mrb[7].mxu1  ;;  %5324 = vmatmul.mubr.msk.f32.vlgmr.msra.gmra.mrb[112].mxu1 %vm343_vm1, %v5941_v26 }
 0x13f   :  { %8966 = vst [vmem:[#allocation26_spill] sm:$0xff] %v6486_v29  ;;  %5337 = vmatpush1.msk.msra.mxu1 %vm176_vm0, %v6346_v22  ;;  %4376 = vmatprep.mubr.f32.mxu1 %v8928_v47  ;;  %v860_v3 = vpop.f32.mrb[10].mxu0  ;;  %v6525_v22 = vsub.f32 0.0, %v6392_v16 }
 0x140   :  { %v6508_v33 = vsel %vm1002_vm4, %v860_v3, %v6484_v24  ;;  %v862_v37 = vpop.f32.mrb[11].mxu0  ;;  %5320 = vmatmul.mubr.msk.f32.gmra.mrb[116].mxu0 %vm343_vm1, %v5965_v2  ;;  %5350 = vmatprep.subr.msk.mxu1 %vm176_vm0, %v4738_v14  ;;  %v6578_v3 = vrot.slane %v1226_v28, %v6362_v58 }
 0x141   :  { %v943_v48 = vpop.f32.mrb[8].mxu1  ;;  %v6519_v52 = vsel %vm1003_vm5, %v862_v37, %v6492_v35  ;;  %4299 = vmatprep.mubr.f32.mxu0 %v8928_v47 }
 0x142   :  { %v6530_v55 = vsel %vm1004_vm7, %v943_v48, %v6502_v61  ;;  %v945_v42 = vpop.f32.mrb[9].mxu1  ;;  %5325 = vmatmul.mubr.msk.f32.gmra.mrb[114].mxu1 %vm343_vm1, %v5953_v41  ;;  %vm1252_vm11 = vcmp.eq.s32.totalorder %v6578_v3, 1 }
 0x143   :  { %v6541_v11 = vsel %vm1005_vm8, %v945_v42, %v6514_v51  ;;  %4382 = vmatprep.mubr.f32.mxu1 %v8928_v47  ;;  %v866_v30 = vpop.f32.mrb[12].mxu0  ;;  %v6591_v42 = vsub.f32 0.0, %v6428_v40 }
 0x144   :  { %v6550_v53 = vsel %vm1002_vm4, %v866_v30, %v6525_v22  ;;  %v868_v18 = vpop.f32.mrb[13].mxu0  ;;  %5321 = vmatmul.mubr.msk.f32.gmra.mrb[118].mxu0 %vm343_vm1, %v5980_v9 }
 0x145   :  { %v949_v5 = vpop.f32.mrb[10].mxu1  ;;  %v6561_v6 = vsel %vm1003_vm5, %v868_v18, %v6536_v50  ;;  %4546 = vmatprep.mubr.f32.mxu0 %v8928_v47  ;;  %v1234_v18 = vrot.slane %v1218_v39, %v6366_v62 }
 0x146   :  { %v6573_v14 = vsel %vm1004_vm7, %v949_v5, %v6545_v17  ;;  %v951_v32 = vpop.f32.mrb[11].mxu1  ;;  %5326 = vmatmul.mubr.msk.f32.gmra.mrb[116].mxu1 %vm343_vm1, %v5965_v2  ;;  %v6602_v5 = vsub.f32 0.0, %v6438_v4 }
 0x147   :  { %v6586_v37 = vsel %vm1005_vm8, %v951_v32, %v6556_v0  ;;  %4388 = vmatprep.mubr.f32.mxu1 %v8928_v47  ;;  %v872_v48 = vpop.f32.mrb[14].mxu0 }
 0x148   :  { %v6596_v28 = vsel %vm1002_vm4, %v872_v48, %v6568_v46  ;;  %v874_v30 = vpop.f32.mrb[15].mxu0  ;;  %5332 = vmatmul.mubr.msk.f32.vlgmr.msra.gmra.mrb[120].mxu0 %vm343_vm1, %v5941_v26  ;;  %8970 = vst [vmem:[#allocation10_spill] sm:$0xff] %v6602_v5  ;;  %v6628_v48 = vrot.slane %v1230_v54, %v6362_v58  ;;  %v6645_v54 = vsub.f32 0.0, %v6486_v29 }
 0x149   :  { %v955_v32 = vpop.f32.mrb[12].mxu1  ;;  %v6607_v49 = vsel %vm1003_vm5, %v874_v30, %v6581_v36  ;;  %5345 = vmatpush1.msk.msra.mxu0 %vm176_vm0, %v6394_v63  ;;  %4552 = vmatprep.mubr.f32.mxu0 %v8928_v47  ;;  %v6632_v30 = vsub.f32 0.0, %v6475_v44  ;;  %v8971_v44 = vmov 0  }
 0x14a   :  { %v6616_v12 = vsel %vm1004_vm7, %v955_v32, %v6591_v42  ;;  %v957_v39 = vpop.f32.mrb[13].mxu1  ;;  %5327 = vmatmul.mubr.msk.f32.gmra.mrb[118].mxu1 %vm343_vm1, %v5980_v9  ;;  %v1482_v40 = vsel %vm5174_vm12, 1, %v8971_v44  ;;  %vm1253_vm13 = vcmp.eq.s32.totalorder %v6628_v48, 1 }
 0x14b   :  { %v6624_v23 = vsel %vm1005_vm8, %v957_v39, %v6602_v5  ;;  %4635 = vmatprep.mubr.f32.mxu1 %v8928_v47  ;;  %v1103_v63 = vpop.f32.mrb[16].mxu0  ;;  %v6640_v39 = vrot.slane %v1234_v18, %v6362_v58  ;;  %v1487_v19 = vrot.slane %v1482_v40, %v6362_v58  ;;  %v1491_v21 = vrot.slane %v1482_v40, %v6366_v62 }
 0x14c   :  { %v6637_v32 = vsel %vm1251_vm10, %v1103_v63, %v6436_v8  ;;  %v1105_v7 = vpop.f32.mrb[17].mxu0  ;;  %5333 = vmatmul.mubr.msk.f32.gmra.mrb[122].mxu0 %vm343_vm1, %v5953_v41 }
 0x14d   :  { %v961_v25 = vpop.f32.mrb[14].mxu1  ;;  %v6652_v4 = vsel %vm1252_vm11, %v1105_v7, %v6448_v10  ;;  %4558 = vmatprep.mubr.f32.mxu0 %v8928_v47  ;;  %vm1254_vm14 = vcmp.eq.s32.totalorder %v6640_v39, 1 }
 0x14e   :  { %v6658_v18 = vsel %vm1004_vm7, %v961_v25, %v6632_v30  ;;  %v963_v63 = vpop.f32.mrb[15].mxu1  ;;  %5338 = vmatmul.mubr.msk.f32.vlgmr.msra.gmra.mrb[120].mxu1 %vm343_vm1, %v5941_v26 }
 0x14f   :  { %v6668_v7 = vsel %vm1005_vm8, %v963_v63, %v6645_v54  ;;  %5351 = vmatpush1.msk.msra.mxu1 %vm176_vm0, %v6433_v1  ;;  %4641 = vmatprep.mubr.f32.mxu1 %v8928_v47  ;;  %v1109_v25 = vpop.f32.mrb[18].mxu0 }
 0x150   :  { %v6678_v27 = vsel %vm1251_vm10, %v1109_v25, %v6484_v24  ;;  %v1111_v29 = vpop.f32.mrb[19].mxu0  ;;  %5334 = vmatmul.mubr.msk.f32.gmra.mrb[124].mxu0 %vm343_vm1, %v5965_v2  ;;  %v6694_v25 = vld [vmem:[%s8824_s1 + $0x8] sm:$0xff] }
 0x151   :  { %v1192_v57 = vpop.f32.mrb[16].mxu1  ;;  %v6687_v63 = vsel %vm1252_vm11, %v1111_v29, %v6492_v35  ;;  %4564 = vmatprep.mubr.f32.mxu0 %v8928_v47  ;;  %vm5175_vm15 = vcmp.gt.f32.partialorder %v6694_v25, 2.0  ;;  %vm5189_vm6 = vcmp.gt.f32.partialorder %v6694_v25, 3.0 }
 0x152   :  { %v6700_v1 = vsel %vm1253_vm13, %v1192_v57, %v6502_v61  ;;  %v1194_v38 = vpop.f32.mrb[17].mxu1  ;;  %5339 = vmatmul.mubr.msk.f32.gmra.mrb[122].mxu1 %vm343_vm1, %v5953_v41  ;;  %v1483_v16 = vsel %vm5175_vm15, 1, %v8971_v44 }
 0x153   :  { %v6712_v60 = vsel %vm1254_vm14, %v1194_v38, %v6514_v51  ;;  %4647 = vmatprep.mubr.f32.mxu1 %v8928_v47  ;;  %v1115_v57 = vpop.f32.mrb[20].mxu0 }
 0x154   :  { %v6720_v29 = vsel %vm1251_vm10, %v1115_v57, %v6525_v22  ;;  %v1117_v40 = vpop.f32.mrb[21].mxu0  ;;  %5335 = vmatmul.mubr.msk.f32.gmra.mrb[126].mxu0 %vm343_vm1, %v5980_v9  ;;  %v6734_v57 = vrot.slane %v1487_v19, %v6362_v58 }
 0x155   :  { %v1198_v15 = vpop.f32.mrb[18].mxu1  ;;  %v6730_v56 = vsel %vm1252_vm11, %v1117_v40, %v6536_v50  ;;  %4811 = vmatprep.mubr.f32.mxu0 %v8928_v47  ;;  %v6746_v40 = vrot.slane %v1491_v21, %v6362_v58 }
 0x156   :  { %v6739_v59 = vsel %vm1253_vm13, %v1198_v15, %v6545_v17  ;;  %v1200_v20 = vpop.f32.mrb[19].mxu1  ;;  %5340 = vmatmul.mubr.msk.f32.gmra.mrb[124].mxu1 %vm343_vm1, %v5965_v2  ;;  %v1495_v17 = vrot.slane %v1483_v16, %v6362_v58  ;;  %vm1516_vm0 = vcmp.eq.s32.totalorder %v6734_v57, 1 }
 0x157   :  { %8972 = vst [vmem:[#allocation29_spill] sm:$0xff] %v6739_v59  ;;  %v6753_v19 = vsel %vm1254_vm14, %v1200_v20, %v6556_v0  ;;  %4653 = vmatprep.mubr.f32.mxu1 %v8928_v47  ;;  %v1121_v15 = vpop.f32.mrb[22].mxu0  ;;  %v1499_v20 = vrot.slane %v1483_v16, %v6366_v62  ;;  %vm1517_vm2 = vcmp.eq.s32.totalorder %v6746_v40, 1 }
 0x158   :  { %v6762_v21 = vsel %vm1251_vm10, %v1121_v15, %v6568_v46  ;;  %v1123_v38 = vpop.f32.mrb[23].mxu0  ;;  %5346 = vmatmul.mubr.msk.f32.vlgmr.msra.gmra.mrb[128].mxu0 %vm343_vm1, %v5941_v26  ;;  %v6795_v0 = vrot.slane %v1495_v17, %v6362_v58  ;;  %v8974_v17 = vmax.f32 %v6466_v45, %v6637_v32  ;;  %v8975_v45 = vmax.f32 %v6480_v13, %v6652_v4 }
 0x159   :  { %v1204_v43 = vpop.f32.mrb[20].mxu1  ;;  %v6772_v59 = vsel %vm1252_vm11, %v1123_v38, %v6581_v36  ;;  %4817 = vmatprep.mubr.f32.mxu0 %v8928_v47  ;;  %vm5203_vm11 = vcmp.gt.f32.partialorder %v6694_v25, 4.0 }
 0x15a   :  { %v6779_v34 = vsel %vm1253_vm13, %v1204_v43, %v6591_v42  ;;  %v1206_v15 = vpop.f32.mrb[21].mxu1  ;;  %5341 = vmatmul.mubr.msk.f32.gmra.mrb[126].mxu1 %vm343_vm1, %v5980_v9  ;;  %vm1518_vm4 = vcmp.eq.s32.totalorder %v6795_v0, 1 }
 0x15b   :  { %8973 = vst [vmem:[#allocation30_spill] sm:$0xff] %v6779_v34  ;;  %v6791_v38 = vsel %vm1254_vm14, %v1206_v15, %v6602_v5  ;;  %4900 = vmatprep.mubr.f32.mxu1 %v8928_v47  ;;  %v1368_v43 = vpop.f32.mrb[24].mxu0  ;;  %v6804_v34 = vrot.slane %v1499_v20, %v6362_v58 }
 0x15c   :  { %v1520_v3 = vsel %vm1516_vm0, %v1368_v43, %v6436_v8  ;;  %v1370_v50 = vpop.f32.mrb[25].mxu0  ;;  %5347 = vmatmul.mubr.msk.f32.gmra.mrb[130].mxu0 %vm343_vm1, %v5953_v41 }
 0x15d   :  { %v1210_v15 = vpop.f32.mrb[22].mxu1  ;;  %v6811_v5 = vmax.f32 %v8974_v17, %v1520_v3  ;;  %v1521_v16 = vsel %vm1517_vm2, %v1370_v50, %v6448_v10  ;;  %4823 = vmatprep.mubr.f32.mxu0 %v8928_v47  ;;  %v1747_v3 = vsel %vm5188_vm3, 1, %v8971_v44  ;;  %vm1519_vm5 = vcmp.eq.s32.totalorder %v6804_v34, 1 }
 0x15e   :  { %v6820_v20 = vsel %vm1253_vm13, %v1210_v15, %v6632_v30  ;;  %v1212_v43 = vpop.f32.mrb[23].mxu1  ;;  %5352 = vmatmul.mubr.msk.f32.vlgmr.msra.gmra.mrb[128].mxu1 %vm343_vm1, %v5941_v26  ;;  %v6827_v32 = vmax.f32 %v8975_v45, %v1521_v16  ;;  %v8976_v15 = vmax.f32 %v6508_v33, %v6678_v27  ;;  %v1752_v45 = vrot.slane %v1747_v3, %v6362_v58 }
 0x15f   :  { %v1285_v50 = vmax.f32 %v6658_v18, %v6820_v20  ;;  %v6835_v48 = vsel %vm1254_vm14, %v1212_v43, %v6645_v54  ;;  %4906 = vmatprep.mubr.f32.mxu1 %v8928_v47  ;;  %v1374_v26 = vpop.f32.mrb[26].mxu0  ;;  %v8977_v33 = vmax.f32 %v6519_v52, %v6687_v63  ;;  %vm5216_vm14 = vcmp.gt.f32.partialorder %v6457_v31, 5.0 }
 0x160   :  { %v1524_v13 = vsel %vm1516_vm0, %v1374_v26, %v6484_v24  ;;  %v1376_v16 = vpop.f32.mrb[27].mxu0  ;;  %5348 = vmatmul.mubr.msk.f32.gmra.mrb[132].mxu0 %vm343_vm1, %v5965_v2  ;;  %v8994_v0 = vmax.f32 %v6668_v7, %v6835_v48 }
 0x161   :  { %v1457_v39 = vpop.f32.mrb[24].mxu1  ;;  %v6850_v17 = vmax.f32 %v8976_v15, %v1524_v13  ;;  %v1525_v43 = vsel %vm1517_vm2, %v1376_v16, %v6492_v35  ;;  %4829 = vmatprep.mubr.f32.mxu0 %v8928_v47  ;;  %v1756_v13 = vrot.slane %v1747_v3, %v6366_v62  ;;  %v8978_v16 = vmax.f32 %v6530_v55, %v6700_v1 }
 0x162   :  { %v1522_v2 = vsel %vm1518_vm4, %v1457_v39, %v6502_v61  ;;  %v1459_v26 = vpop.f32.mrb[25].mxu1  ;;  %5353 = vmatmul.mubr.msk.f32.gmra.mrb[130].mxu1 %vm343_vm1, %v5953_v41  ;;  %v6866_v27 = vmax.f32 %v8977_v33, %v1525_v43  ;;  %v8979_v41 = vmax.f32 %v6541_v11, %v6712_v60  ;;  %v1748_v55 = vsel %vm5189_vm6, 1, %v8971_v44  ;;  %v8990_v40 = vld [vmem:[#allocation30_spill] sm:$0xff] }
 0x163   :  { %v6872_v15 = vmax.f32 %v8978_v16, %v1522_v2  ;;  %v1523_v39 = vsel %vm1519_vm5, %v1459_v26, %v6514_v51  ;;  %4912 = vmatprep.mubr.f32.mxu1 %v8928_v47  ;;  %v1380_v4 = vpop.f32.mrb[28].mxu0  ;;  %v8980_v43 = vmax.f32 %v6550_v53, %v6720_v29  ;;  %v8981_v26 = vld [vmem:[#allocation19_spill] sm:$0xff]  ;;  %v6898_v11 = vrot.slane %v1752_v45, %v6362_v58  ;;  %v5426_v16 = vld [vmem:[%s8825_s2 + $0x10] sm:$0xff]  ;;  %v8984_v45 = vld [vmem:[#allocation29_spill] sm:$0xff] }
 0x164   :  { %v6881_v52 = vmax.f32 %v8979_v41, %v1523_v39  ;;  %v1528_v63 = vsel %vm1516_vm0, %v1380_v4, %v6525_v22  ;;  %v1382_v3 = vpop.f32.mrb[29].mxu0  ;;  %5349 = vmatmul.mubr.msk.f32.gmra.mrb[134].mxu0 %vm343_vm1, %v5980_v9  ;;  %v8982_v4 = vld [vmem:[#allocation27_spill] sm:$0xff]  ;;  %v8983_v53 = vmax.f32 %v6561_v6, %v6730_v56  ;;  %v6913_v39 = vrot.slane %v1756_v13, %v6362_v58 }
 0x165   :  { %v1463_v1 = vpop.f32.mrb[26].mxu1  ;;  %v6892_v2 = vmax.f32 %v8980_v43, %v1528_v63  ;;  %v1529_v60 = vsel %vm1517_vm2, %v1382_v3, %v8981_v26  ;;  %v8985_v41 = vmax.f32 %v6573_v14, %v8984_v45  ;;  %v8986_v3 = vld [vmem:[#allocation28_spill] sm:$0xff]  ;;  %v8987_v56 = vmax.f32 %v6586_v37, %v6753_v19  ;;  %v5427_v19 = vld [vmem:[%s8825_s2 + $0x18] sm:$0xff] }
 0x166   :  { %v1526_v33 = vsel %vm1518_vm4, %v1463_v1, %v8982_v4  ;;  %v1465_v9 = vpop.f32.mrb[27].mxu1  ;;  %5354 = vmatmul.mubr.msk.f32.gmra.mrb[132].mxu1 %vm343_vm1, %v5426_v16  ;;  %v6910_v29 = vmax.f32 %v8983_v53, %v1529_v60  ;;  %v1760_v16 = vrot.slane %v1748_v55, %v6362_v58  ;;  %v1764_v60 = vrot.slane %v1748_v55, %v6366_v62 }
 0x167   :  { %v6918_v63 = vmax.f32 %v8985_v41, %v1526_v33  ;;  %v1527_v1 = vsel %vm1519_vm5, %v1465_v9, %v8986_v3  ;;  %4918 = vmatprep.mubr.f32.mxu1 %v8928_v47  ;;  %v1386_v43 = vpop.f32.mrb[30].mxu0  ;;  %v8988_v9 = vmax.f32 %v6596_v28, %v6762_v21  ;;  %vm1781_vm7 = vcmp.eq.s32.totalorder %v6898_v11, 1  ;;  %v8992_v41 = vld [vmem:[#allocation10_spill] sm:$0xff] }
 0x168   :  { %v6928_v6 = vmax.f32 %v8987_v56, %v1527_v1  ;;  %v1532_v14 = vsel %vm1516_vm0, %v1386_v43, %v6568_v46  ;;  %v1388_v13 = vpop.f32.mrb[31].mxu0  ;;  %v8989_v28 = vmax.f32 %v6607_v49, %v6772_v59  ;;  %vm1782_vm8 = vcmp.eq.s32.totalorder %v6913_v39, 1 }
 0x169   :  { %v1469_v33 = vpop.f32.mrb[28].mxu1  ;;  %v6937_v47 = vmax.f32 %v8988_v9, %v1532_v14  ;;  %v1533_v53 = vsel %vm1517_vm2, %v1388_v13, %v6581_v36  ;;  %v8991_v55 = vmax.f32 %v6616_v12, %v8990_v40  ;;  %v6965_v56 = vrot.slane %v1760_v16, %v6362_v58 }
 0x16a   :  { %v1530_v37 = vsel %vm1518_vm4, %v1469_v33, %v6591_v42  ;;  %v1471_v57 = vpop.f32.mrb[29].mxu1  ;;  %5355 = vmatmul.mubr.msk.f32.gmra.mrb[134].mxu1 %vm343_vm1, %v5427_v19  ;;  %v6953_v21 = vmax.f32 %v8989_v28, %v1533_v53  ;;  %vm5202_vm1 = vcmp.gt.f32.partialorder %v6457_v31, 4.0  ;;  %v8993_v49 = vmax.f32 %v6624_v23, %v6791_v38 }
 0x16b   :  { %v6959_v45 = vmax.f32 %v8991_v55, %v1530_v37  ;;  %v1531_v1 = vsel %vm1519_vm5, %v1471_v57, %v8992_v41  ;;  %v1633_v43 = vpop.f32.mrb[32].mxu0  ;;  %v6979_v13 = vrot.slane %v1764_v60, %v6362_v58  ;;  %v2012_v60 = vsel %vm5202_vm1, 1, %v8971_v44 }
 0x16c   :  { %v6971_v59 = vmax.f32 %v8993_v49, %v1531_v1  ;;  %v6976_v12 = vsel %vm1781_vm7, %v1633_v43, %v6436_v8  ;;  %v1635_v14 = vpop.f32.mrb[33].mxu0  ;;  %vm1783_vm9 = vcmp.eq.s32.totalorder %v6965_v56, 1  ;;  %v2017_v7 = vrot.slane %v2012_v60, %v6362_v58 }
 0x16d   :  { %v1475_v33 = vpop.f32.mrb[30].mxu1  ;;  %v6986_v9 = vsel %vm1782_vm8, %v1635_v14, %v6448_v10  ;;  %vm1784_vm10 = vcmp.eq.s32.totalorder %v6979_v13, 1  ;;  %v2021_v43 = vrot.slane %v2012_v60, %v6366_v62  ;;  %v2013_v60 = vsel %vm5203_vm11, 1, %v8971_v44 }
 0x16e   :  { %v1534_v23 = vsel %vm1518_vm4, %v1475_v33, %v6632_v30  ;;  %v1477_v38 = vpop.f32.mrb[31].mxu1  ;;  %v2025_v1 = vrot.slane %v2013_v60, %v6362_v58  ;;  %v2029_v34 = vrot.slane %v2013_v60, %v6366_v62  ;;  %vm5217_vm2 = vcmp.gt.f32.partialorder %v6694_v25, 5.0 }
 0x16f   :  { %v6997_v37 = vmax.f32 %v1285_v50, %v1534_v23  ;;  %v1535_v57 = vsel %vm1519_vm5, %v1477_v38, %v6645_v54  ;;  %v1639_v19 = vpop.f32.mrb[34].mxu0  ;;  %v7064_v49 = vrot.slane %v2021_v43, %v6362_v58  ;;  %vm5230_vm5 = vcmp.gt.f32.partialorder %v6457_v31, 6.0 }
 0x170   :  { %v7006_v28 = vmax.f32 %v8994_v0, %v1535_v57  ;;  %v7012_v18 = vsel %vm1781_vm7, %v1639_v19, %v6484_v24  ;;  %v1641_v20 = vpop.f32.mrb[35].mxu0  ;;  %v7115_v53 = vrot.slane %v2029_v34, %v6362_v58  ;;  %v8998_v34 = vmax.f32 %v6827_v32, %v6986_v9 }
 0x171   :  { %v1722_v50 = vpop.f32.mrb[32].mxu1  ;;  %v7019_v40 = vsel %vm1782_vm8, %v1641_v20, %v6492_v35  ;;  %vm2047_vm13 = vcmp.eq.s32.totalorder %v7064_v49, 1  ;;  %v9011_v49 = vld [vmem:[#allocation10_spill] sm:$0xff] }
 0x172   :  { %v7026_v48 = vsel %vm1783_vm9, %v1722_v50, %v6502_v61  ;;  %v1724_v55 = vpop.f32.mrb[33].mxu1  ;;  %v7054_v50 = vrot.slane %v2017_v7, %v6362_v58  ;;  %vm2049_vm0 = vcmp.eq.s32.totalorder %v7115_v53, 1 }
 0x173   :  { %v7036_v14 = vsel %vm1784_vm10, %v1724_v55, %v6514_v51  ;;  %v1645_v33 = vpop.f32.mrb[36].mxu0 }
 0x174   :  { %v7043_v38 = vsel %vm1781_vm7, %v1645_v33, %v6525_v22  ;;  %v1647_v57 = vpop.f32.mrb[37].mxu0  ;;  %vm2046_vm12 = vcmp.eq.s32.totalorder %v7054_v50, 1 }
 0x175   :  { %v1728_v19 = vpop.f32.mrb[34].mxu1  ;;  %v7051_v20 = vsel %vm1782_vm8, %v1647_v57, %v8981_v26 }
 0x176   :  { %v7059_v55 = vsel %vm1783_vm9, %v1728_v19, %v8982_v4  ;;  %v1730_v33 = vpop.f32.mrb[35].mxu1  ;;  %v7106_v19 = vrot.slane %v2025_v1, %v6362_v58 }
 0x177   :  { %v7071_v7 = vsel %vm1784_vm10, %v1730_v33, %v8986_v3  ;;  %v1651_v57 = vpop.f32.mrb[38].mxu0 }
 0x178   :  { %v7079_v23 = vsel %vm1781_vm7, %v1651_v57, %v6568_v46  ;;  %v1653_v43 = vpop.f32.mrb[39].mxu0  ;;  %vm2048_vm15 = vcmp.eq.s32.totalorder %v7106_v19, 1 }
 0x179   :  { %v1734_v0 = vpop.f32.mrb[36].mxu1  ;;  %v7087_v33 = vsel %vm1782_vm8, %v1653_v43, %v6581_v36  ;;  %vm5231_vm8 = vcmp.gt.f32.partialorder %v6694_v25, 6.0 }
 0x17a   :  { %v7093_v11 = vsel %vm1783_vm9, %v1734_v0, %v6591_v42  ;;  %v1736_v57 = vpop.f32.mrb[37].mxu1 }
 0x17b   :  { %8995 = vst [vmem:[#allocation19_spill] sm:$0xff] %v7093_v11  ;;  %v7103_v39 = vsel %vm1784_vm10, %v1736_v57, %v8992_v41  ;;  %v1898_v43 = vpop.f32.mrb[40].mxu0  ;;  %v8997_v57 = vmax.f32 %v6811_v5, %v6976_v12 }
 0x17c   :  { %8996 = vst [vmem:[#allocation27_spill] sm:$0xff] %v7103_v39  ;;  %v2050_v60 = vsel %vm2046_vm12, %v1898_v43, %v6436_v8  ;;  %v1900_v16 = vpop.f32.mrb[41].mxu0  ;;  %v2277_v39 = vsel %vm5216_vm14, 1, %v8971_v44 }
 0x17d   :  { %v1740_v11 = vpop.f32.mrb[38].mxu1  ;;  %v7120_v41 = vmax.f32 %v8997_v57, %v2050_v60  ;;  %v2051_v1 = vsel %vm2047_vm13, %v1900_v16, %v6448_v10  ;;  %v8999_v60 = vmax.f32 %v6850_v17, %v7012_v18  ;;  %v2286_v17 = vrot.slane %v2277_v39, %v6366_v62 }
 0x17e   :  { %v7128_v0 = vsel %vm1783_vm9, %v1740_v11, %v6632_v30  ;;  %v1742_v43 = vpop.f32.mrb[39].mxu1  ;;  %v7133_v8 = vmax.f32 %v8998_v34, %v2051_v1  ;;  %v2282_v1 = vrot.slane %v2277_v39, %v6362_v58  ;;  %v9001_v18 = vmax.f32 %v6872_v15, %v7026_v48 }
 0x17f   :  { %v7141_v12 = vsel %vm1784_vm10, %v1742_v43, %v6645_v54  ;;  %v1904_v56 = vpop.f32.mrb[42].mxu0  ;;  %v2278_v39 = vsel %vm5217_vm2, 1, %v8971_v44  ;;  %v9003_v48 = vmax.f32 %v6892_v2, %v7043_v38  ;;  %v7206_v2 = vrot.slane %v2286_v17, %v6362_v58 }
 0x180   :  { %v2054_v32 = vsel %vm2046_vm12, %v1904_v56, %v6484_v24  ;;  %v1906_v9 = vpop.f32.mrb[43].mxu0  ;;  %v9000_v56 = vmax.f32 %v6866_v27, %v7019_v40  ;;  %v9005_v38 = vmax.f32 %v6918_v63, %v7059_v55  ;;  %v2294_v63 = vrot.slane %v2278_v39, %v6366_v62 }
 0x181   :  { %v1987_v11 = vpop.f32.mrb[40].mxu1  ;;  %v7153_v13 = vmax.f32 %v8999_v60, %v2054_v32  ;;  %v2055_v57 = vsel %vm2047_vm13, %v1906_v9, %v6492_v35  ;;  %vm2312_vm4 = vcmp.eq.s32.totalorder %v7206_v2, 1  ;;  %v9016_v19 = vmax.f32 %v7006_v28, %v7141_v12 }
 0x182   :  { %v2052_v43 = vsel %vm2048_vm15, %v1987_v11, %v6502_v61  ;;  %v1989_v34 = vpop.f32.mrb[41].mxu1  ;;  %v7166_v16 = vmax.f32 %v9000_v56, %v2055_v57  ;;  %v9002_v11 = vmax.f32 %v6881_v52, %v7036_v14  ;;  %v7195_v52 = vrot.slane %v2282_v1, %v6362_v58 }
 0x183   :  { %v7172_v32 = vmax.f32 %v9001_v18, %v2052_v43  ;;  %v2053_v9 = vsel %vm2049_vm0, %v1989_v34, %v6514_v51  ;;  %v1910_v60 = vpop.f32.mrb[44].mxu0  ;;  %v9004_v56 = vmax.f32 %v6910_v29, %v7051_v20  ;;  %v9006_v29 = vmax.f32 %v6928_v6, %v7071_v7 }
 0x184   :  { %v7180_v5 = vmax.f32 %v9002_v11, %v2053_v9  ;;  %v2058_v27 = vsel %vm2046_vm12, %v1910_v60, %v6525_v22  ;;  %v1912_v40 = vpop.f32.mrb[45].mxu0  ;;  %v2290_v11 = vrot.slane %v2278_v39, %v6362_v58  ;;  %vm2311_vm3 = vcmp.eq.s32.totalorder %v7195_v52, 1 }
 0x185   :  { %v1993_v15 = vpop.f32.mrb[42].mxu1  ;;  %v7189_v57 = vmax.f32 %v9003_v48, %v2058_v27  ;;  %v2059_v43 = vsel %vm2047_vm13, %v1912_v40, %v8981_v26  ;;  %v9007_v40 = vmax.f32 %v6937_v47, %v7079_v23  ;;  %v9008_v7 = vmax.f32 %v6953_v21, %v7087_v33  ;;  %v9009_v47 = vld [vmem:[#allocation19_spill] sm:$0xff] }
 0x186   :  { %v2056_v14 = vsel %vm2048_vm15, %v1993_v15, %v8982_v4  ;;  %v1995_v34 = vpop.f32.mrb[43].mxu1  ;;  %v7203_v18 = vmax.f32 %v9004_v56, %v2059_v43  ;;  %v9010_v23 = vmax.f32 %v6959_v45, %v9009_v47  ;;  %v7253_v56 = vrot.slane %v2290_v11, %v6362_v58  ;;  %v9012_v21 = vld [vmem:[#allocation27_spill] sm:$0xff] }
 0x187   :  { %v7211_v9 = vmax.f32 %v9005_v38, %v2056_v14  ;;  %v2057_v1 = vsel %vm2049_vm0, %v1995_v34, %v8986_v3  ;;  %v1916_v60 = vpop.f32.mrb[46].mxu0  ;;  %v9013_v33 = vmax.f32 %v6971_v59, %v9012_v21  ;;  %vm5244_vm10 = vcmp.gt.f32.partialorder %v6457_v31, 7.0 }
 0x188   :  { %v7220_v20 = vmax.f32 %v9006_v29, %v2057_v1  ;;  %v2062_v17 = vsel %vm2046_vm12, %v1916_v60, %v6568_v46  ;;  %v1918_v27 = vpop.f32.mrb[47].mxu0  ;;  %v9014_v1 = vld [vmem:[#allocation17_spill] sm:$0xff]  ;;  %v7267_v29 = vrot.slane %v2294_v63, %v6362_v58  ;;  %v2542_v63 = vsel %vm5230_vm5, 1, %v8971_v44 }
 0x189   :  { %v1999_v55 = vpop.f32.mrb[44].mxu1  ;;  %v7229_v15 = vmax.f32 %v9007_v40, %v2062_v17  ;;  %v2063_v48 = vsel %vm2047_vm13, %v1918_v27, %v6581_v36  ;;  %vm2313_vm6 = vcmp.eq.s32.totalorder %v7253_v56, 1  ;;  %v2547_v28 = vrot.slane %v2542_v63, %v6362_v58 }
 0x18a   :  { %v2060_v6 = vsel %vm2048_vm15, %v1999_v55, %v6591_v42  ;;  %v2001_v50 = vpop.f32.mrb[45].mxu1  ;;  %v7241_v39 = vmax.f32 %v9008_v7, %v2063_v48  ;;  %v9015_v48 = vmax.f32 %v6997_v37, %v7128_v0  ;;  %vm2314_vm7 = vcmp.eq.s32.totalorder %v7267_v29, 1 }
 0x18b   :  { %v7247_v43 = vmax.f32 %v9010_v23, %v2060_v6  ;;  %v2061_v14 = vsel %vm2049_vm0, %v2001_v50, %v9011_v49  ;;  %v2163_v34 = vpop.f32.mrb[48].mxu0  ;;  %vm5245_vm13 = vcmp.gt.f32.partialorder %v6694_v25, 7.0 }
 0x18c   :  { %v7259_v38 = vmax.f32 %v9013_v33, %v2061_v14  ;;  %v7264_v45 = vsel %vm2311_vm3, %v2163_v34, %v9014_v1  ;;  %v2165_v60 = vpop.f32.mrb[49].mxu0  ;;  %v2551_v33 = vrot.slane %v2542_v63, %v6366_v62  ;;  %v2543_v63 = vsel %vm5231_vm8, 1, %v8971_v44 }
 0x18d   :  { %v2005_v17 = vpop.f32.mrb[46].mxu1  ;;  %v7274_v27 = vsel %vm2312_vm4, %v2165_v60, %v6448_v10  ;;  %v2555_v21 = vrot.slane %v2543_v63, %v6362_v58  ;;  %v2559_v53 = vrot.slane %v2543_v63, %v6366_v62 }
 0x18e   :  { %v2064_v59 = vsel %vm2048_vm15, %v2005_v17, %v6632_v30  ;;  %v2007_v55 = vpop.f32.mrb[47].mxu1  ;;  %v7352_v60 = vrot.slane %v2551_v33, %v6362_v58 }
 0x18f   :  { %v7285_v6 = vmax.f32 %v9015_v48, %v2064_v59  ;;  %v2065_v50 = vsel %vm2049_vm0, %v2007_v55, %v6645_v54  ;;  %v2169_v7 = vpop.f32.mrb[50].mxu0  ;;  %v7403_v40 = vrot.slane %v2559_v53, %v6362_v58  ;;  %v9020_v53 = vmax.f32 %v7133_v8, %v7274_v27 }
 0x190   :  { %v7294_v47 = vmax.f32 %v9016_v19, %v2065_v50  ;;  %v7300_v37 = vsel %vm2311_vm3, %v2169_v7, %v6484_v24  ;;  %v2171_v0 = vpop.f32.mrb[51].mxu0  ;;  %vm2577_vm9 = vcmp.eq.s32.totalorder %v7352_v60, 1  ;;  %v9033_v60 = vld [vmem:[#allocation10_spill] sm:$0xff]  ;;  %vm5258_vm0 = vcmp.gt.f32.partialorder %v6457_v31, 8.0 }
 0x191   :  { %v2252_v23 = vpop.f32.mrb[48].mxu1  ;;  %v7307_v14 = vsel %vm2312_vm4, %v2171_v0, %v6492_v35  ;;  %vm2579_vm12 = vcmp.eq.s32.totalorder %v7403_v40, 1 }
 0x192   :  { %v7314_v12 = vsel %vm2313_vm6, %v2252_v23, %v6502_v61  ;;  %v2254_v34 = vpop.f32.mrb[49].mxu1  ;;  %v7342_v23 = vrot.slane %v2547_v28, %v6362_v58 }
 0x193   :  { %v7324_v17 = vsel %vm2314_vm7, %v2254_v34, %v6514_v51  ;;  %v2175_v59 = vpop.f32.mrb[52].mxu0 }
 0x194   :  { %v7331_v48 = vsel %vm2311_vm3, %v2175_v59, %v6525_v22  ;;  %v2177_v50 = vpop.f32.mrb[53].mxu0  ;;  %vm2576_vm1 = vcmp.eq.s32.totalorder %v7342_v23, 1 }
 0x195   :  { %v2258_v7 = vpop.f32.mrb[50].mxu1  ;;  %v7339_v0 = vsel %vm2312_vm4, %v2177_v50, %v8981_v26 }
 0x196   :  { %v7347_v34 = vsel %vm2313_vm6, %v2258_v7, %v8982_v4  ;;  %v2260_v59 = vpop.f32.mrb[51].mxu1  ;;  %v7394_v7 = vrot.slane %v2555_v21, %v6362_v58 }
 0x197   :  { %v7359_v28 = vsel %vm2314_vm7, %v2260_v59, %v8986_v3  ;;  %v2181_v50 = vpop.f32.mrb[54].mxu0 }
 0x198   :  { %v7367_v55 = vsel %vm2311_vm3, %v2181_v50, %v6568_v46  ;;  %v2183_v33 = vpop.f32.mrb[55].mxu0  ;;  %vm2578_vm11 = vcmp.eq.s32.totalorder %v7394_v7, 1 }
 0x199   :  { %v2264_v19 = vpop.f32.mrb[52].mxu1  ;;  %v7375_v59 = vsel %vm2312_vm4, %v2183_v33, %v6581_v36  ;;  %vm5259_vm4 = vcmp.gt.f32.partialorder %v6694_v25, 8.0 }
 0x19a   :  { %v7381_v52 = vsel %vm2313_vm6, %v2264_v19, %v6591_v42  ;;  %v2266_v50 = vpop.f32.mrb[53].mxu1 }
 0x19b   :  { %9017 = vst [vmem:[#allocation29_spill] sm:$0xff] %v7381_v52  ;;  %v7391_v2 = vsel %vm2314_vm7, %v2266_v50, %v9011_v49  ;;  %v2428_v33 = vpop.f32.mrb[56].mxu0  ;;  %v9019_v50 = vmax.f32 %v7120_v41, %v7264_v45 }
 0x19c   :  { %9018 = vst [vmem:[#allocation28_spill] sm:$0xff] %v7391_v2  ;;  %v2580_v63 = vsel %vm2576_vm1, %v2428_v33, %v9014_v1  ;;  %v2430_v11 = vpop.f32.mrb[57].mxu0  ;;  %v2807_v2 = vsel %vm5244_vm10, 1, %v8971_v44 }
 0x19d   :  { %v2270_v52 = vpop.f32.mrb[54].mxu1  ;;  %v7408_v49 = vmax.f32 %v9019_v50, %v2580_v63  ;;  %v2581_v21 = vsel %vm2577_vm9, %v2430_v11, %v6448_v10  ;;  %v9021_v63 = vmax.f32 %v7153_v13, %v7300_v37  ;;  %v2816_v13 = vrot.slane %v2807_v2, %v6366_v62 }
 0x19e   :  { %v7416_v19 = vsel %vm2313_vm6, %v2270_v52, %v6632_v30  ;;  %v2272_v33 = vpop.f32.mrb[55].mxu1  ;;  %v7421_v1 = vmax.f32 %v9020_v53, %v2581_v21  ;;  %v2812_v21 = vrot.slane %v2807_v2, %v6362_v58  ;;  %v9023_v37 = vmax.f32 %v7172_v32, %v7314_v12 }
 0x19f   :  { %v7429_v45 = vsel %vm2314_vm7, %v2272_v33, %v6645_v54  ;;  %v2434_v56 = vpop.f32.mrb[58].mxu0  ;;  %v2808_v2 = vsel %vm5245_vm13, 1, %v8971_v44  ;;  %v9025_v12 = vmax.f32 %v7189_v57, %v7331_v48  ;;  %v7494_v57 = vrot.slane %v2816_v13, %v6362_v58 }
 0x1a0   :  { %v2584_v8 = vsel %vm2576_vm1, %v2434_v56, %v6484_v24  ;;  %v2436_v27 = vpop.f32.mrb[59].mxu0  ;;  %v9022_v56 = vmax.f32 %v7166_v16, %v7307_v14  ;;  %v9027_v48 = vmax.f32 %v7211_v9, %v7347_v34  ;;  %v2824_v9 = vrot.slane %v2808_v2, %v6366_v62 }
 0x1a1   :  { %v2517_v52 = vpop.f32.mrb[56].mxu1  ;;  %v7441_v29 = vmax.f32 %v9021_v63, %v2584_v8  ;;  %v2585_v50 = vsel %vm2577_vm9, %v2436_v27, %v6492_v35  ;;  %vm2842_vm15 = vcmp.eq.s32.totalorder %v7494_v57, 1  ;;  %v9038_v7 = vmax.f32 %v7294_v47, %v7429_v45 }
 0x1a2   :  { %v2582_v33 = vsel %vm2578_vm11, %v2517_v52, %v6502_v61  ;;  %v2519_v53 = vpop.f32.mrb[57].mxu1  ;;  %v7454_v11 = vmax.f32 %v9022_v56, %v2585_v50  ;;  %v9024_v52 = vmax.f32 %v7180_v5, %v7324_v17  ;;  %v7483_v5 = vrot.slane %v2812_v21, %v6362_v58 }
 0x1a3   :  { %v7460_v8 = vmax.f32 %v9023_v37, %v2582_v33  ;;  %v2583_v27 = vsel %vm2579_vm12, %v2519_v53, %v6514_v51  ;;  %v2440_v63 = vpop.f32.mrb[60].mxu0  ;;  %v9026_v56 = vmax.f32 %v7203_v18, %v7339_v0  ;;  %v9028_v18 = vmax.f32 %v7220_v20, %v7359_v28 }
 0x1a4   :  { %v7468_v41 = vmax.f32 %v9024_v52, %v2583_v27  ;;  %v2588_v16 = vsel %vm2576_vm1, %v2440_v63, %v6525_v22  ;;  %v2442_v14 = vpop.f32.mrb[61].mxu0  ;;  %v2820_v52 = vrot.slane %v2808_v2, %v6362_v58  ;;  %vm2841_vm14 = vcmp.eq.s32.totalorder %v7483_v5, 1 }
 0x1a5   :  { %v2523_v32 = vpop.f32.mrb[58].mxu1  ;;  %v7477_v50 = vmax.f32 %v9025_v12, %v2588_v16  ;;  %v2589_v33 = vsel %vm2577_vm9, %v2442_v14, %v8981_v26  ;;  %v9029_v14 = vmax.f32 %v7229_v15, %v7367_v55  ;;  %v9030_v28 = vmax.f32 %v7241_v39, %v7375_v59  ;;  %v9031_v15 = vld [vmem:[#allocation29_spill] sm:$0xff]  ;;  %v9034_v39 = vld [vmem:[#allocation28_spill] sm:$0xff] }
 0x1a6   :  { %v2586_v17 = vsel %vm2578_vm11, %v2523_v32, %v8982_v4  ;;  %v2525_v53 = vpop.f32.mrb[59].mxu1  ;;  %v7491_v37 = vmax.f32 %v9026_v56, %v2589_v33  ;;  %v9032_v55 = vmax.f32 %v7247_v43, %v9031_v15  ;;  %v7541_v56 = vrot.slane %v2820_v52, %v6362_v58 }
 0x1a7   :  { %v7499_v27 = vmax.f32 %v9027_v48, %v2586_v17  ;;  %v2587_v21 = vsel %vm2579_vm12, %v2525_v53, %v8986_v3  ;;  %v2446_v63 = vpop.f32.mrb[62].mxu0  ;;  %v9035_v59 = vmax.f32 %v7259_v38, %v9034_v39 }
 0x1a8   :  { %v7508_v0 = vmax.f32 %v9028_v18, %v2587_v21  ;;  %v2592_v13 = vsel %vm2576_vm1, %v2446_v63, %v6568_v46  ;;  %v2448_v16 = vpop.f32.mrb[63].mxu0  ;;  %v9036_v21 = vld [vmem:[#allocation17_spill] sm:$0xff]  ;;  %v7555_v18 = vrot.slane %v2824_v9, %v6362_v58  ;;  %v3072_v9 = vsel %vm5258_vm0, 1, %v8971_v44 }
 0x1a9   :  { %v2529_v34 = vpop.f32.mrb[60].mxu1  ;;  %v7517_v32 = vmax.f32 %v9029_v14, %v2592_v13  ;;  %v2593_v12 = vsel %vm2577_vm9, %v2448_v16, %v6581_v36  ;;  %v9037_v14 = vmax.f32 %v7285_v6, %v7416_v19  ;;  %vm2843_vm2 = vcmp.eq.s32.totalorder %v7541_v56, 1 }
 0x1aa   :  { %v2590_v20 = vsel %vm2578_vm11, %v2529_v34, %v6591_v42  ;;  %v2531_v23 = vpop.f32.mrb[61].mxu1  ;;  %v7529_v2 = vmax.f32 %v9030_v28, %v2593_v12  ;;  %vm2844_vm3 = vcmp.eq.s32.totalorder %v7555_v18, 1  ;;  %v3077_v47 = vrot.slane %v3072_v9, %v6362_v58 }
 0x1ab   :  { %v7535_v33 = vmax.f32 %v9032_v55, %v2590_v20  ;;  %v2591_v17 = vsel %vm2579_vm12, %v2531_v23, %v9033_v60  ;;  %v2693_v53 = vpop.f32.mrb[64].mxu0  ;;  %v3081_v39 = vrot.slane %v3072_v9, %v6366_v62  ;;  %v3073_v9 = vsel %vm5259_vm4, 1, %v8971_v44 }
 0x1ac   :  { %v7547_v48 = vmax.f32 %v9035_v59, %v2591_v17  ;;  %v7552_v43 = vsel %vm2841_vm14, %v2693_v53, %v9036_v21  ;;  %v2695_v63 = vpop.f32.mrb[65].mxu0  ;;  %v3085_v59 = vrot.slane %v3073_v9, %v6362_v58  ;;  %v3089_v53 = vrot.slane %v3073_v9, %v6366_v62 }
 0x1ad   :  { %v2535_v13 = vpop.f32.mrb[62].mxu1  ;;  %v2861_v52 = vmax.f32 %v7408_v49, %v7552_v43  ;;  %v7562_v31 = vsel %vm2842_vm15, %v2695_v63, %v6448_v10  ;;  %vm5273_vm9 = vcmp.gt.f32.partialorder %v6694_v25, 9.0 }
 0x1ae   :  { %v2594_v38 = vsel %vm2578_vm11, %v2535_v13, %v6632_v30  ;;  %v2537_v16 = vpop.f32.mrb[63].mxu1  ;;  %v7696_v34 = vrot.slane %v3089_v53, %v6362_v58  ;;  %v9041_v53 = vmax.f32 %v7421_v1, %v7562_v31 }
 0x1af   :  { %v7573_v12 = vmax.f32 %v9037_v14, %v2594_v38  ;;  %v2595_v20 = vsel %vm2579_vm12, %v2537_v16, %v6645_v54  ;;  %v2699_v23 = vpop.f32.mrb[66].mxu0  ;;  %v7640_v38 = vrot.slane %v3081_v39, %v6362_v58 }
 0x1b0   :  { %v7582_v28 = vmax.f32 %v9038_v7, %v2595_v20  ;;  %v7588_v6 = vsel %vm2841_vm14, %v2699_v23, %v6484_v24  ;;  %v2701_v19 = vpop.f32.mrb[67].mxu0  ;;  %vm3109_vm1 = vcmp.eq.s32.totalorder %v7696_v34, 1 }
 0x1b1   :  { %v2782_v15 = vpop.f32.mrb[64].mxu1  ;;  %v7595_v55 = vsel %vm2842_vm15, %v2701_v19, %v6492_v35  ;;  %v7630_v19 = vrot.slane %v3077_v47, %v6362_v58  ;;  %vm3107_vm6 = vcmp.eq.s32.totalorder %v7640_v38, 1  ;;  %v9053_v38 = vld [vmem:[#allocation10_spill] sm:$0xff] }
 0x1b2   :  { %v7602_v45 = vsel %vm2843_vm2, %v2782_v15, %v6502_v61  ;;  %v2784_v17 = vpop.f32.mrb[65].mxu1 }
 0x1b3   :  { %v7612_v63 = vsel %vm2844_vm3, %v2784_v17, %v6514_v51  ;;  %v2705_v13 = vpop.f32.mrb[68].mxu0  ;;  %vm3106_vm5 = vcmp.eq.s32.totalorder %v7630_v19, 1 }
 0x1b4   :  { %v7619_v16 = vsel %vm2841_vm14, %v2705_v13, %v6525_v22  ;;  %v2707_v14 = vpop.f32.mrb[69].mxu0 }
 0x1b5   :  { %v2788_v20 = vpop.f32.mrb[66].mxu1  ;;  %v7627_v7 = vsel %vm2842_vm15, %v2707_v14, %v8981_v26 }
 0x1b6   :  { %v7635_v15 = vsel %vm2843_vm2, %v2788_v20, %v8982_v4  ;;  %v2790_v17 = vpop.f32.mrb[67].mxu1  ;;  %v7682_v20 = vrot.slane %v3085_v59, %v6362_v58 }
 0x1b7   :  { %v7647_v47 = vsel %vm2844_vm3, %v2790_v17, %v8986_v3  ;;  %v2711_v14 = vpop.f32.mrb[70].mxu0 }
 0x1b8   :  { %v7655_v13 = vsel %vm2841_vm14, %v2711_v14, %v6568_v46  ;;  %v2713_v39 = vpop.f32.mrb[71].mxu0  ;;  %vm3108_vm8 = vcmp.eq.s32.totalorder %v7682_v20, 1 }
 0x1b9   :  { %v2794_v23 = vpop.f32.mrb[68].mxu1  ;;  %v7663_v17 = vsel %vm2842_vm15, %v2713_v39, %v6581_v36 }
 0x1ba   :  { %v7669_v5 = vsel %vm2843_vm2, %v2794_v23, %v6591_v42  ;;  %v2796_v14 = vpop.f32.mrb[69].mxu1  ;;  %v7687_v23 = vld [vmem:[%s8824_s1] sm:$0xff] }
 0x1bb   :  { %v7679_v57 = vsel %vm2844_vm3, %v2796_v14, %v9033_v60  ;;  %v2958_v39 = vpop.f32.mrb[72].mxu0  ;;  %9040 = vst [vmem:[#allocation19_spill] sm:$0xff] %v7687_v23  ;;  %vm5272_vm7 = vcmp.gt.f32.partialorder %v7687_v23, 9.0 }
 0x1bc   :  { %9039 = vst [vmem:[#allocation30_spill] sm:$0xff] %v7679_v57  ;;  %v3110_v40 = vsel %vm3106_vm5, %v2958_v39, %v9036_v21  ;;  %v2960_v14 = vpop.f32.mrb[73].mxu0  ;;  %v3337_v57 = vsel %vm5272_vm7, 1, %v8971_v44 }
 0x1bd   :  { %v2800_v59 = vpop.f32.mrb[70].mxu1  ;;  %v7701_v60 = vmax.f32 %v2861_v52, %v3110_v40  ;;  %v3111_v23 = vsel %vm3107_vm6, %v2960_v14, %v6448_v10 }
 0x1be   :  { %v7709_v9 = vsel %vm2843_vm2, %v2800_v59, %v6632_v30  ;;  %v2802_v39 = vpop.f32.mrb[71].mxu1  ;;  %v7714_v21 = vmax.f32 %v9041_v53, %v3111_v23  ;;  %v9042_v23 = vmax.f32 %v7441_v29, %v7588_v6  ;;  %v3342_v59 = vrot.slane %v3337_v57, %v6362_v58 }
 0x1bf   :  { %v2875_v49 = vmax.f32 %v7573_v12, %v7709_v9  ;;  %v7722_v43 = vsel %vm2844_vm3, %v2802_v39, %v6645_v54  ;;  %v2964_v56 = vpop.f32.mrb[74].mxu0  ;;  %v3346_v29 = vrot.slane %v3337_v57, %v6366_v62  ;;  %v9044_v6 = vmax.f32 %v7460_v8, %v7602_v45 }
 0x1c0   :  { %v3114_v1 = vsel %vm3106_vm5, %v2964_v56, %v6484_v24  ;;  %v2966_v31 = vpop.f32.mrb[75].mxu0  ;;  %v9043_v56 = vmax.f32 %v7454_v11, %v7595_v55  ;;  %v3338_v57 = vsel %vm5273_vm9, 1, %v8971_v44  ;;  %v9046_v45 = vmax.f32 %v7477_v50, %v7619_v16 }
 0x1c1   :  { %v3047_v40 = vpop.f32.mrb[72].mxu1  ;;  %v7734_v18 = vmax.f32 %v9042_v23, %v3114_v1  ;;  %v3115_v14 = vsel %vm3107_vm6, %v2966_v31, %v6492_v35  ;;  %v7787_v50 = vrot.slane %v3346_v29, %v6362_v58  ;;  %v9048_v16 = vmax.f32 %v7499_v27, %v7635_v15 }
 0x1c2   :  { %v3112_v39 = vsel %vm3108_vm8, %v3047_v40, %v6502_v61  ;;  %v3049_v53 = vpop.f32.mrb[73].mxu1  ;;  %v7747_v52 = vmax.f32 %v9043_v56, %v3115_v14  ;;  %v9045_v40 = vmax.f32 %v7468_v41, %v7612_v63  ;;  %v7776_v41 = vrot.slane %v3342_v59, %v6362_v58 }
 0x1c3   :  { %v7753_v1 = vmax.f32 %v9044_v6, %v3112_v39  ;;  %v3113_v25 = vsel %vm3109_vm1, %v3049_v53, %v6514_v51  ;;  %v2970_v31 = vpop.f32.mrb[76].mxu0  ;;  %v9047_v56 = vmax.f32 %v7491_v37, %v7627_v7  ;;  %v9049_v37 = vmax.f32 %v7508_v0, %v7647_v47 }
 0x1c4   :  { %v7761_v23 = vmax.f32 %v9045_v40, %v3113_v25  ;;  %v3118_v11 = vsel %vm3106_vm5, %v2970_v31, %v6525_v22  ;;  %v2972_v55 = vpop.f32.mrb[77].mxu0  ;;  %v3350_v40 = vrot.slane %v3338_v57, %v6362_v58  ;;  %v3354_v27 = vrot.slane %v3338_v57, %v6366_v62 }
 0x1c5   :  { %v3053_v8 = vpop.f32.mrb[74].mxu1  ;;  %v7770_v14 = vmax.f32 %v9046_v45, %v3118_v11  ;;  %v3119_v39 = vsel %vm3107_vm6, %v2972_v55, %v8981_v26  ;;  %v9050_v55 = vmax.f32 %v7517_v32, %v7655_v13  ;;  %vm3371_vm10 = vcmp.eq.s32.totalorder %v7776_v41, 1 }
 0x1c6   :  { %v3116_v63 = vsel %vm3108_vm8, %v3053_v8, %v8982_v4  ;;  %v3055_v53 = vpop.f32.mrb[75].mxu1  ;;  %v7784_v6 = vmax.f32 %v9047_v56, %v3119_v39  ;;  %v9051_v47 = vmax.f32 %v7529_v2, %v7663_v17  ;;  %vm3372_vm11 = vcmp.eq.s32.totalorder %v7787_v50, 1  ;;  %v9054_v56 = vld [vmem:[#allocation19_spill] sm:$0xff]  ;;  %v9055_v2 = vld [vmem:[#allocation30_spill] sm:$0xff] }
 0x1c7   :  { %v7792_v25 = vmax.f32 %v9048_v16, %v3116_v63  ;;  %v3117_v59 = vsel %vm3109_vm1, %v3055_v53, %v8986_v3  ;;  %v2976_v31 = vpop.f32.mrb[78].mxu0  ;;  %v9052_v32 = vmax.f32 %v7535_v33, %v7669_v5  ;;  %v7834_v53 = vrot.slane %v3350_v40, %v6362_v58 }
 0x1c8   :  { %v7801_v7 = vmax.f32 %v9049_v37, %v3117_v59  ;;  %v3122_v29 = vsel %vm3106_vm5, %v2976_v31, %v6568_v46  ;;  %v2978_v11 = vpop.f32.mrb[79].mxu0  ;;  %vm5286_vm12 = vcmp.gt.f32.partialorder %v9054_v56, 10.0  ;;  %v9056_v17 = vmax.f32 %v7547_v48, %v9055_v2  ;;  %v9057_v59 = vld [vmem:[#allocation17_spill] sm:$0xff] }
 0x1c9   :  { %v3059_v15 = vpop.f32.mrb[76].mxu1  ;;  %v7810_v8 = vmax.f32 %v9050_v55, %v3122_v29  ;;  %v3123_v45 = vsel %vm3107_vm6, %v2978_v11, %v6581_v36  ;;  %v7848_v31 = vrot.slane %v3354_v27, %v6362_v58  ;;  %v3602_v27 = vsel %vm5286_vm12, 1, %v8971_v44 }
 0x1ca   :  { %v3120_v0 = vsel %vm3108_vm8, %v3059_v15, %v6591_v42  ;;  %v3061_v19 = vpop.f32.mrb[77].mxu1  ;;  %v7822_v57 = vmax.f32 %v9051_v47, %v3123_v45  ;;  %vm3373_vm13 = vcmp.eq.s32.totalorder %v7834_v53, 1  ;;  %v9058_v20 = vmax.f32 %v7582_v28, %v7722_v43  ;;  %v7894_v43 = vld [vmem:[%s8824_s1 + $0x8] sm:$0xff]  ;;  %s5483_s1 = smov [#allocation5]  }
 0x1cb   :  { %v7828_v13 = vmax.f32 %v9052_v32, %v3120_v0  ;;  %v3121_v39 = vsel %vm3109_vm1, %v3061_v19, %v9053_v38  ;;  %v3223_v63 = vpop.f32.mrb[80].mxu0  ;;  %vm3374_vm14 = vcmp.eq.s32.totalorder %v7848_v31, 1  ;;  %v3607_v28 = vrot.slane %v3602_v27, %v6362_v58  ;;  %s5090_s21 = sshll.u32 %s5483_s1, 4  ;;  %s5091_s21 = int_to_ptr.vmem [resolvable:$true] %s5090_s21 }
 0x1cc   :  { %v7840_v16 = vmax.f32 %v9056_v17, %v3121_v39  ;;  %v7845_v33 = vsel %vm3371_vm10, %v3223_v63, %v9057_v59  ;;  %v3225_v5 = vpop.f32.mrb[81].mxu0  ;;  %vm5287_vm15 = vcmp.gt.f32.partialorder %v7894_v43, 10.0  ;;  %v3611_v2 = vrot.slane %v3602_v27, %v6366_v62  ;;  %s5452_s22 = scalar_lea.vmem %s5091_s21, 2048  ;;  %p5457_p9 = scmp.lt.s32.totalorder %s5091_s21, %s5091_s21 }
 0x1cd   :  { %v3065_v37 = vpop.f32.mrb[78].mxu1  ;;  %v7855_v29 = vsel %vm3372_vm11, %v3225_v5, %v6448_v10  ;;  %v3603_v27 = vsel %vm5287_vm15, 1, %v8971_v44  ;;  %vm5300_vm3 = vcmp.gt.f32.partialorder %v9054_v56, 11.0  ;;  %vm5301_vm6 = vcmp.gt.f32.partialorder %v7894_v43, 11.0  ;;  %p5453_p8 = scmp.ne.s32.totalorder %s5091_s21, %s5452_s22  ;;  %p5458_p10 = scmp.lt.s32.totalorder %s5452_s22, %s5452_s22 }
 0x1ce   :  { %v3124_v48 = vsel %vm3108_vm8, %v3065_v37, %v6632_v30  ;;  %v3067_v11 = vpop.f32.mrb[79].mxu1  ;;  %v7938_v17 = vrot.slane %v3611_v2, %v6362_v58  ;;  %v3615_v63 = vrot.slane %v3603_v27, %v6362_v58  ;;  %v3619_v34 = vrot.slane %v3603_v27, %v6366_v62 }
 0x1cf   :  { %v7866_v55 = vmax.f32 %v2875_v49, %v3124_v48  ;;  %v3125_v45 = vsel %vm3109_vm1, %v3067_v11, %v6645_v54  ;;  %v3229_v0 = vpop.f32.mrb[82].mxu0  ;;  %vm5314_vm1 = vcmp.gt.f32.partialorder %v9054_v56, 12.0  ;;  %p5459_p11 = por %p5458_p10, %p5457_p9 }
 0x1d0   :  { %v7875_v19 = vmax.f32 %v9058_v20, %v3125_v45  ;;  %v7881_v12 = vsel %vm3371_vm10, %v3229_v0, %v6484_v24  ;;  %v3231_v9 = vpop.f32.mrb[83].mxu0  ;;  %vm3637_vm2 = vcmp.eq.s32.totalorder %v7938_v17, 1  ;;  %v7989_v15 = vrot.slane %v3619_v34, %v6362_v58  ;;  %v9075_v17 = vld [vmem:[#allocation10_spill] sm:$0xff] }
 0x1d1   :  { %v3312_v49 = vpop.f32.mrb[80].mxu1  ;;  %v7888_v47 = vsel %vm3372_vm11, %v3231_v9, %v6492_v35  ;;  %v9062_v34 = vmax.f32 %v7714_v21, %v7855_v29  ;;  %p5460_p12 = pnand %p5459_p11, %p5453_p8 }
 0x1d2   :  { %v7900_v32 = vsel %vm3373_vm13, %v3312_v49, %v6502_v61  ;;  %v3314_v39 = vpop.f32.mrb[81].mxu1  ;;  %v7928_v49 = vrot.slane %v3607_v28, %v6362_v58  ;;  %vm3639_vm5 = vcmp.eq.s32.totalorder %v7989_v15, 1 }
 0x1d3   :  { %v7910_v5 = vsel %vm3374_vm14, %v3314_v39, %v6514_v51  ;;  %v3235_v37 = vpop.f32.mrb[84].mxu0 }
 0x1d4   :  { %v7917_v11 = vsel %vm3371_vm10, %v3235_v37, %v6525_v22  ;;  %v3237_v45 = vpop.f32.mrb[85].mxu0  ;;  %vm3636_vm0 = vcmp.eq.s32.totalorder %v7928_v49, 1 }
 0x1d5   :  { %v3318_v0 = vpop.f32.mrb[82].mxu1  ;;  %v7925_v9 = vsel %vm3372_vm11, %v3237_v45, %v8981_v26 }
 0x1d6   :  { %v7933_v39 = vsel %vm3373_vm13, %v3318_v0, %v8982_v4  ;;  %v3320_v37 = vpop.f32.mrb[83].mxu1  ;;  %v7980_v0 = vrot.slane %v3615_v63, %v6362_v58 }
 0x1d7   :  { %v7945_v28 = vsel %vm3374_vm14, %v3320_v37, %v8986_v3  ;;  %v3241_v45 = vpop.f32.mrb[86].mxu0 }
 0x1d8   :  { %v7953_v48 = vsel %vm3371_vm10, %v3241_v45, %v6568_v46  ;;  %v3243_v2 = vpop.f32.mrb[87].mxu0  ;;  %vm3638_vm4 = vcmp.eq.s32.totalorder %v7980_v0, 1 }
 0x1d9   :  { %v3324_v20 = vpop.f32.mrb[84].mxu1  ;;  %v7961_v37 = vsel %vm3372_vm11, %v3243_v2, %v6581_v36  ;;  %vm5315_vm11 = vcmp.gt.f32.partialorder %v7894_v43, 12.0 }
 0x1da   :  { %v7967_v41 = vsel %vm3373_vm13, %v3324_v20, %v6591_v42  ;;  %v3326_v45 = vpop.f32.mrb[85].mxu1 }
 0x1db   :  { %9059 = vst [vmem:[#allocation27_spill] sm:$0xff] %v7967_v41  ;;  %v7977_v50 = vsel %vm3374_vm14, %v3326_v45, %v9053_v38  ;;  %v3488_v2 = vpop.f32.mrb[88].mxu0  ;;  %v9061_v45 = vmax.f32 %v7701_v60, %v7845_v33 }
 0x1dc   :  { %9060 = vst [vmem:[#allocation29_spill] sm:$0xff] %v7977_v50  ;;  %v3640_v27 = vsel %vm3636_vm0, %v3488_v2, %v9057_v59  ;;  %v3490_v40 = vpop.f32.mrb[89].mxu0  ;;  %v3867_v50 = vsel %vm5300_vm3, 1, %v8971_v44 }
 0x1dd   :  { %v3330_v41 = vpop.f32.mrb[86].mxu1  ;;  %v7994_v38 = vmax.f32 %v9061_v45, %v3640_v27  ;;  %v3641_v63 = vsel %vm3637_vm2, %v3490_v40, %v6448_v10  ;;  %v9063_v27 = vmax.f32 %v7734_v18, %v7881_v12  ;;  %v3876_v18 = vrot.slane %v3867_v50, %v6366_v62 }
 0x1de   :  { %v8002_v20 = vsel %vm3373_vm13, %v3330_v41, %v6632_v30  ;;  %v3332_v2 = vpop.f32.mrb[87].mxu1  ;;  %v8007_v59 = vmax.f32 %v9062_v34, %v3641_v63  ;;  %v3872_v63 = vrot.slane %v3867_v50, %v6362_v58  ;;  %v9065_v12 = vmax.f32 %v7753_v1, %v7900_v32 }
 0x1df   :  { %v8015_v33 = vsel %vm3374_vm14, %v3332_v2, %v6645_v54  ;;  %v3494_v53 = vpop.f32.mrb[90].mxu0  ;;  %v3868_v50 = vsel %vm5301_vm6, 1, %v8971_v44  ;;  %v9067_v32 = vmax.f32 %v7770_v14, %v7917_v11  ;;  %v8080_v14 = vrot.slane %v3876_v18, %v6362_v58 }
 0x1e0   :  { %v3644_v21 = vsel %vm3636_vm0, %v3494_v53, %v6484_v24  ;;  %v3496_v29 = vpop.f32.mrb[91].mxu0  ;;  %v9064_v53 = vmax.f32 %v7747_v52, %v7888_v47  ;;  %v9069_v11 = vmax.f32 %v7792_v25, %v7933_v39  ;;  %v3884_v25 = vrot.slane %v3868_v50, %v6366_v62 }
 0x1e1   :  { %v3577_v41 = vpop.f32.mrb[88].mxu1  ;;  %v8027_v31 = vmax.f32 %v9063_v27, %v3644_v21  ;;  %v3645_v45 = vsel %vm3637_vm2, %v3496_v29, %v6492_v35  ;;  %vm3902_vm8 = vcmp.eq.s32.totalorder %v8080_v14, 1  ;;  %v9080_v0 = vmax.f32 %v7875_v19, %v8015_v33 }
 0x1e2   :  { %v3642_v2 = vsel %vm3638_vm4, %v3577_v41, %v6502_v61  ;;  %v3579_v34 = vpop.f32.mrb[89].mxu1  ;;  %v8040_v40 = vmax.f32 %v9064_v53, %v3645_v45  ;;  %v9066_v41 = vmax.f32 %v7761_v23, %v7910_v5  ;;  %v8069_v23 = vrot.slane %v3872_v63, %v6362_v58 }
 0x1e3   :  { %v8046_v21 = vmax.f32 %v9065_v12, %v3642_v2  ;;  %v3643_v29 = vsel %vm3639_vm5, %v3579_v34, %v6514_v51  ;;  %v3500_v27 = vpop.f32.mrb[92].mxu0  ;;  %v9068_v53 = vmax.f32 %v7784_v6, %v7925_v9  ;;  %v9070_v6 = vmax.f32 %v7801_v7, %v7945_v28 }
 0x1e4   :  { %v8054_v60 = vmax.f32 %v9066_v41, %v3643_v29  ;;  %v3648_v52 = vsel %vm3636_vm0, %v3500_v27, %v6525_v22  ;;  %v3502_v47 = vpop.f32.mrb[93].mxu0  ;;  %v3880_v41 = vrot.slane %v3868_v50, %v6362_v58  ;;  %vm3901_vm7 = vcmp.eq.s32.totalorder %v8069_v23, 1 }
 0x1e5   :  { %v3583_v1 = vpop.f32.mrb[90].mxu1  ;;  %v8063_v45 = vmax.f32 %v9067_v32, %v3648_v52  ;;  %v3649_v2 = vsel %vm3637_vm2, %v3502_v47, %v8981_v26  ;;  %v9071_v47 = vmax.f32 %v7810_v8, %v7953_v48  ;;  %v9072_v28 = vmax.f32 %v7822_v57, %v7961_v37  ;;  %v9073_v8 = vld [vmem:[#allocation27_spill] sm:$0xff]  ;;  %v9076_v57 = vld [vmem:[#allocation29_spill] sm:$0xff] }
 0x1e6   :  { %v3646_v5 = vsel %vm3638_vm4, %v3583_v1, %v8982_v4  ;;  %v3585_v34 = vpop.f32.mrb[91].mxu1  ;;  %v8077_v12 = vmax.f32 %v9068_v53, %v3649_v2  ;;  %v9074_v48 = vmax.f32 %v7828_v13, %v9073_v8  ;;  %v8127_v53 = vrot.slane %v3880_v41, %v6362_v58 }
 0x1e7   :  { %v8085_v29 = vmax.f32 %v9069_v11, %v3646_v5  ;;  %v3647_v63 = vsel %vm3639_vm5, %v3585_v34, %v8986_v3  ;;  %v3506_v27 = vpop.f32.mrb[94].mxu0  ;;  %v9077_v37 = vmax.f32 %v7840_v16, %v9076_v57  ;;  %vm5328_vm14 = vcmp.gt.f32.partialorder %v9054_v56, 13.0 }
 0x1e8   :  { %v8094_v9 = vmax.f32 %v9070_v6, %v3647_v63  ;;  %v3652_v18 = vsel %vm3636_vm0, %v3506_v27, %v6568_v46  ;;  %v3508_v52 = vpop.f32.mrb[95].mxu0  ;;  %v9078_v63 = vld [vmem:[#allocation17_spill] sm:$0xff]  ;;  %v8141_v6 = vrot.slane %v3884_v25, %v6362_v58  ;;  %v4132_v25 = vsel %vm5314_vm1, 1, %v8971_v44 }
 0x1e9   :  { %v3589_v39 = vpop.f32.mrb[92].mxu1  ;;  %v8103_v1 = vmax.f32 %v9071_v47, %v3652_v18  ;;  %v3653_v32 = vsel %vm3637_vm2, %v3508_v52, %v6581_v36  ;;  %vm3903_vm9 = vcmp.eq.s32.totalorder %v8127_v53, 1  ;;  %v4137_v19 = vrot.slane %v4132_v25, %v6362_v58 }
 0x1ea   :  { %v3650_v7 = vsel %vm3638_vm4, %v3589_v39, %v6591_v42  ;;  %v3591_v49 = vpop.f32.mrb[93].mxu1  ;;  %v8115_v50 = vmax.f32 %v9072_v28, %v3653_v32  ;;  %v9079_v32 = vmax.f32 %v7866_v55, %v8002_v20  ;;  %vm3904_vm10 = vcmp.eq.s32.totalorder %v8141_v6, 1 }
 0x1eb   :  { %v8121_v2 = vmax.f32 %v9074_v48, %v3650_v7  ;;  %v3651_v5 = vsel %vm3639_vm5, %v3591_v49, %v9075_v17  ;;  %v3753_v34 = vpop.f32.mrb[96].mxu0  ;;  %vm5329_vm2 = vcmp.gt.f32.partialorder %v7894_v43, 13.0 }
 0x1ec   :  { %v8133_v11 = vmax.f32 %v9077_v37, %v3651_v5  ;;  %v8138_v13 = vsel %vm3901_vm7, %v3753_v34, %v9078_v63  ;;  %v3755_v27 = vpop.f32.mrb[97].mxu0  ;;  %v4141_v37 = vrot.slane %v4132_v25, %v6366_v62  ;;  %v4133_v25 = vsel %vm5315_vm11, 1, %v8971_v44 }
 0x1ed   :  { %v3595_v18 = vpop.f32.mrb[94].mxu1  ;;  %v8148_v52 = vsel %vm3902_vm8, %v3755_v27, %v6448_v10  ;;  %v4145_v57 = vrot.slane %v4133_v25, %v6362_v58  ;;  %v4149_v15 = vrot.slane %v4133_v25, %v6366_v62 }
 0x1ee   :  { %v3654_v16 = vsel %vm3638_vm4, %v3595_v18, %v6632_v30  ;;  %v3597_v39 = vpop.f32.mrb[95].mxu1  ;;  %v8226_v27 = vrot.slane %v4141_v37, %v6362_v58 }
 0x1ef   :  { %v8159_v7 = vmax.f32 %v9079_v32, %v3654_v16  ;;  %v3655_v49 = vsel %vm3639_vm5, %v3597_v39, %v6645_v54  ;;  %v3759_v28 = vpop.f32.mrb[98].mxu0  ;;  %v8277_v47 = vrot.slane %v4149_v15, %v6362_v58  ;;  %v9084_v15 = vmax.f32 %v8007_v59, %v8148_v52 }
 0x1f0   :  { %v8168_v8 = vmax.f32 %v9080_v0, %v3655_v49  ;;  %v8174_v55 = vsel %vm3901_vm7, %v3759_v28, %v6484_v24  ;;  %v3761_v20 = vpop.f32.mrb[99].mxu0  ;;  %vm4167_vm13 = vcmp.eq.s32.totalorder %v8226_v27, 1  ;;  %v9097_v27 = vld [vmem:[#allocation10_spill] sm:$0xff]  ;;  %vm5342_vm5 = vcmp.gt.f32.partialorder %v9054_v56, 14.0 }
 0x1f1   :  { %v3842_v48 = vpop.f32.mrb[96].mxu1  ;;  %v8181_v5 = vsel %vm3902_vm8, %v3761_v20, %v6492_v35  ;;  %vm4169_vm0 = vcmp.eq.s32.totalorder %v8277_v47, 1 }
 0x1f2   :  { %v8188_v33 = vsel %vm3903_vm9, %v3842_v48, %v6502_v61  ;;  %v3844_v34 = vpop.f32.mrb[97].mxu1  ;;  %v8216_v48 = vrot.slane %v4137_v19, %v6362_v58 }
 0x1f3   :  { %v8198_v18 = vsel %vm3904_vm10, %v3844_v34, %v6514_v51  ;;  %v3765_v16 = vpop.f32.mrb[100].mxu0 }
 0x1f4   :  { %v8205_v32 = vsel %vm3901_vm7, %v3765_v16, %v6525_v22  ;;  %v3767_v49 = vpop.f32.mrb[101].mxu0  ;;  %vm4166_vm12 = vcmp.eq.s32.totalorder %v8216_v48, 1 }
 0x1f5   :  { %v3848_v28 = vpop.f32.mrb[98].mxu1  ;;  %v8213_v20 = vsel %vm3902_vm8, %v3767_v49, %v8981_v26 }
 0x1f6   :  { %v8221_v34 = vsel %vm3903_vm9, %v3848_v28, %v8982_v4  ;;  %v3850_v16 = vpop.f32.mrb[99].mxu1  ;;  %v8268_v28 = vrot.slane %v4145_v57, %v6362_v58 }
 0x1f7   :  { %v8233_v19 = vsel %vm3904_vm10, %v3850_v16, %v8986_v3  ;;  %v3771_v49 = vpop.f32.mrb[102].mxu0 }
 0x1f8   :  { %v8241_v39 = vsel %vm3901_vm7, %v3771_v49, %v6568_v46  ;;  %v3773_v37 = vpop.f32.mrb[103].mxu0  ;;  %vm4168_vm15 = vcmp.eq.s32.totalorder %v8268_v28, 1 }
 0x1f9   :  { %v3854_v0 = vpop.f32.mrb[100].mxu1  ;;  %v8249_v16 = vsel %vm3902_vm8, %v3773_v37, %v6581_v36  ;;  %vm5343_vm8 = vcmp.gt.f32.partialorder %v7894_v43, 14.0 }
 0x1fa   :  { %v8255_v23 = vsel %vm3903_vm9, %v3854_v0, %v6591_v42  ;;  %v3856_v49 = vpop.f32.mrb[101].mxu1 }
 0x1fb   :  { %9081 = vst [vmem:[#allocation28_spill] sm:$0xff] %v8255_v23  ;;  %v8265_v14 = vsel %vm3904_vm10, %v3856_v49, %v9075_v17  ;;  %v4018_v37 = vpop.f32.mrb[104].mxu0  ;;  %v9083_v49 = vmax.f32 %v7994_v38, %v8138_v13 }
 0x1fc   :  { %9082 = vst [vmem:[#allocation19_spill] sm:$0xff] %v8265_v14  ;;  %v4170_v25 = vsel %vm4166_vm12, %v4018_v37, %v9078_v63  ;;  %v4020_v41 = vpop.f32.mrb[105].mxu0  ;;  %v4397_v14 = vsel %vm5328_vm14, 1, %v8971_v44 }
 0x1fd   :  { %v3860_v23 = vpop.f32.mrb[102].mxu1  ;;  %v8282_v17 = vmax.f32 %v9083_v49, %v4170_v25  ;;  %v4171_v57 = vsel %vm4167_vm13, %v4020_v41, %v6448_v10  ;;  %v9085_v25 = vmax.f32 %v8027_v31, %v8174_v55  ;;  %v4406_v31 = vrot.slane %v4397_v14, %v6366_v62 }
 0x1fe   :  { %v8290_v0 = vsel %vm3903_vm9, %v3860_v23, %v6632_v30  ;;  %v3862_v37 = vpop.f32.mrb[103].mxu1  ;;  %v8295_v63 = vmax.f32 %v9084_v15, %v4171_v57  ;;  %v4402_v57 = vrot.slane %v4397_v14, %v6362_v58  ;;  %v9087_v55 = vmax.f32 %v8046_v21, %v8188_v33 }
 0x1ff   :  { %v8303_v13 = vsel %vm3904_vm10, %v3862_v37, %v6645_v54  ;;  %v4024_v53 = vpop.f32.mrb[106].mxu0  ;;  %v4398_v14 = vsel %vm5329_vm2, 1, %v8971_v44  ;;  %v9089_v33 = vmax.f32 %v8063_v45, %v8205_v32  ;;  %v8368_v45 = vrot.slane %v4406_v31, %v6362_v58 }
 0x200   :  { %v4174_v59 = vsel %vm4166_vm12, %v4024_v53, %v6484_v24  ;;  %v4026_v52 = vpop.f32.mrb[107].mxu0  ;;  %v9086_v53 = vmax.f32 %v8040_v40, %v8181_v5  ;;  %v9091_v32 = vmax.f32 %v8085_v29, %v8221_v34  ;;  %v4414_v29 = vrot.slane %v4398_v14, %v6366_v62 }
 0x201   :  { %v4107_v23 = vpop.f32.mrb[104].mxu1  ;;  %v8315_v6 = vmax.f32 %v9085_v25, %v4174_v59  ;;  %v4175_v49 = vsel %vm4167_vm13, %v4026_v52, %v6492_v35  ;;  %vm4432_vm4 = vcmp.eq.s32.totalorder %v8368_v45, 1  ;;  %v9102_v28 = vmax.f32 %v8168_v8, %v8303_v13 }
 0x202   :  { %v4172_v37 = vsel %vm4168_vm15, %v4107_v23, %v6502_v61  ;;  %v4109_v15 = vpop.f32.mrb[105].mxu1  ;;  %v8328_v41 = vmax.f32 %v9086_v53, %v4175_v49  ;;  %v9088_v23 = vmax.f32 %v8054_v60, %v8198_v18  ;;  %v8357_v60 = vrot.slane %v4402_v57, %v6362_v58 }
 0x203   :  { %v8334_v59 = vmax.f32 %v9087_v55, %v4172_v37  ;;  %v4173_v52 = vsel %vm4169_vm0, %v4109_v15, %v6514_v51  ;;  %v4030_v25 = vpop.f32.mrb[108].mxu0  ;;  %v9090_v53 = vmax.f32 %v8077_v12, %v8213_v20  ;;  %v9092_v12 = vmax.f32 %v8094_v9, %v8233_v19 }
 0x204   :  { %v8342_v38 = vmax.f32 %v9088_v23, %v4173_v52  ;;  %v4178_v40 = vsel %vm4166_vm12, %v4030_v25, %v6525_v22  ;;  %v4032_v5 = vpop.f32.mrb[109].mxu0  ;;  %v4410_v23 = vrot.slane %v4398_v14, %v6362_v58  ;;  %vm4431_vm3 = vcmp.eq.s32.totalorder %v8357_v60, 1 }
 0x205   :  { %v4113_v21 = vpop.f32.mrb[106].mxu1  ;;  %v8351_v49 = vmax.f32 %v9089_v33, %v4178_v40  ;;  %v4179_v37 = vsel %vm4167_vm13, %v4032_v5, %v8981_v26  ;;  %v9093_v5 = vmax.f32 %v8103_v1, %v8241_v39  ;;  %v9094_v19 = vmax.f32 %v8115_v50, %v8249_v16  ;;  %v9095_v1 = vld [vmem:[#allocation28_spill] sm:$0xff]  ;;  %v9098_v50 = vld [vmem:[#allocation19_spill] sm:$0xff] }
 0x206   :  { %v4176_v18 = vsel %vm4168_vm15, %v4113_v21, %v8982_v4  ;;  %v4115_v15 = vpop.f32.mrb[107].mxu1  ;;  %v8365_v55 = vmax.f32 %v9090_v53, %v4179_v37  ;;  %v9096_v39 = vmax.f32 %v8121_v2, %v9095_v1  ;;  %v8415_v53 = vrot.slane %v4410_v23, %v6362_v58 }
 0x207   :  { %v8373_v52 = vmax.f32 %v9091_v32, %v4176_v18  ;;  %v4177_v57 = vsel %vm4169_vm0, %v4115_v15, %v8986_v3  ;;  %v4036_v25 = vpop.f32.mrb[110].mxu0  ;;  %v9099_v16 = vmax.f32 %v8133_v11, %v9098_v50  ;;  %vm5356_vm10 = vcmp.gt.f32.partialorder %v9054_v56, 15.0 }
 0x208   :  { %v8382_v20 = vmax.f32 %v9092_v12, %v4177_v57  ;;  %v4182_v31 = vsel %vm4166_vm12, %v4036_v25, %v6568_v46  ;;  %v4038_v40 = vpop.f32.mrb[111].mxu0  ;;  %v9100_v57 = vld [vmem:[#allocation17_spill] sm:$0xff]  ;;  %v8429_v12 = vrot.slane %v4414_v29, %v6362_v58  ;;  %v4662_v29 = vsel %vm5342_vm5, 1, %v8971_v44 }
 0x209   :  { %v4119_v34 = vpop.f32.mrb[108].mxu1  ;;  %v8391_v21 = vmax.f32 %v9093_v5, %v4182_v31  ;;  %v4183_v33 = vsel %vm4167_vm13, %v4038_v40, %v6581_v36  ;;  %vm4433_vm6 = vcmp.eq.s32.totalorder %v8415_v53, 1  ;;  %v4667_v8 = vrot.slane %v4662_v29, %v6362_v58 }
 0x20a   :  { %v4180_v9 = vsel %vm4168_vm15, %v4119_v34, %v6591_v42  ;;  %v4121_v48 = vpop.f32.mrb[109].mxu1  ;;  %v8403_v14 = vmax.f32 %v9094_v19, %v4183_v33  ;;  %v9101_v33 = vmax.f32 %v8159_v7, %v8290_v0  ;;  %vm4434_vm7 = vcmp.eq.s32.totalorder %v8429_v12, 1 }
 0x20b   :  { %v8409_v37 = vmax.f32 %v9096_v39, %v4180_v9  ;;  %v4181_v18 = vsel %vm4169_vm0, %v4121_v48, %v9097_v27  ;;  %v4283_v15 = vpop.f32.mrb[112].mxu0  ;;  %vm5357_vm13 = vcmp.gt.f32.partialorder %v7894_v43, 15.0 }
 0x20c   :  { %v8421_v32 = vmax.f32 %v9099_v16, %v4181_v18  ;;  %v8426_v2 = vsel %vm4431_vm3, %v4283_v15, %v9100_v57  ;;  %v4285_v25 = vpop.f32.mrb[113].mxu0  ;;  %v4671_v16 = vrot.slane %v4662_v29, %v6366_v62  ;;  %v4663_v29 = vsel %vm5343_vm8, 1, %v8971_v44 }
 0x20d   :  { %v4125_v31 = vpop.f32.mrb[110].mxu1  ;;  %v8436_v40 = vsel %vm4432_vm4, %v4285_v25, %v6448_v10  ;;  %v4675_v50 = vrot.slane %v4663_v29, %v6362_v58  ;;  %v4679_v47 = vrot.slane %v4663_v29, %v6366_v62 }
 0x20e   :  { %v4184_v11 = vsel %vm4168_vm15, %v4125_v31, %v6632_v30  ;;  %v4127_v34 = vpop.f32.mrb[111].mxu1  ;;  %v8514_v25 = vrot.slane %v4671_v16, %v6362_v58 }
 0x20f   :  { %v8447_v9 = vmax.f32 %v9101_v33, %v4184_v11  ;;  %v4185_v48 = vsel %vm4169_vm0, %v4127_v34, %v6645_v54  ;;  %v4289_v19 = vpop.f32.mrb[114].mxu0  ;;  %v8565_v5 = vrot.slane %v4679_v47, %v6362_v58  ;;  %v9105_v47 = vmax.f32 %v8295_v63, %v8436_v40 }
 0x210   :  { %v8456_v1 = vmax.f32 %v9102_v28, %v4185_v48  ;;  %v8462_v7 = vsel %vm4431_vm3, %v4289_v19, %v6484_v24  ;;  %v4291_v0 = vpop.f32.mrb[115].mxu0  ;;  %vm4697_vm9 = vcmp.eq.s32.totalorder %v8514_v25, 1  ;;  %v9118_v25 = vld [vmem:[#allocation10_spill] sm:$0xff] }
 0x211   :  { %v4372_v39 = vpop.f32.mrb[112].mxu1  ;;  %v8469_v18 = vsel %vm4432_vm4, %v4291_v0, %v6492_v35  ;;  %vm4699_vm12 = vcmp.eq.s32.totalorder %v8565_v5, 1 }
 0x212   :  { %v8476_v13 = vsel %vm4433_vm6, %v4372_v39, %v6502_v61  ;;  %v4374_v15 = vpop.f32.mrb[113].mxu1  ;;  %v8504_v39 = vrot.slane %v4667_v8, %v6362_v58 }
 0x213   :  { %v8486_v31 = vsel %vm4434_vm7, %v4374_v15, %v6514_v51  ;;  %v4295_v11 = vpop.f32.mrb[116].mxu0 }
 0x214   :  { %v8493_v33 = vsel %vm4431_vm3, %v4295_v11, %v6525_v22  ;;  %v4297_v48 = vpop.f32.mrb[117].mxu0  ;;  %vm4696_vm1 = vcmp.eq.s32.totalorder %v8504_v39, 1 }
 0x215   :  { %v4378_v19 = vpop.f32.mrb[114].mxu1  ;;  %v8501_v0 = vsel %vm4432_vm4, %v4297_v48, %v8981_v26 }
 0x216   :  { %v8509_v15 = vsel %vm4433_vm6, %v4378_v19, %v8982_v4  ;;  %v4380_v11 = vpop.f32.mrb[115].mxu1  ;;  %v8556_v19 = vrot.slane %v4675_v50, %v6362_v58 }
 0x217   :  { %v8521_v8 = vsel %vm4434_vm7, %v4380_v11, %v8986_v3  ;;  %v4301_v48 = vpop.f32.mrb[118].mxu0 }
 0x218   :  { %v8529_v34 = vsel %vm4431_vm3, %v4301_v48, %v6568_v46  ;;  %v4303_v16 = vpop.f32.mrb[119].mxu0  ;;  %vm4698_vm11 = vcmp.eq.s32.totalorder %v8556_v19, 1 }
 0x219   :  { %v4384_v28 = vpop.f32.mrb[116].mxu1  ;;  %v8537_v11 = vsel %vm4432_vm4, %v4303_v16, %v6581_v36 }
 0x21a   :  { %v8543_v60 = vsel %vm4433_vm6, %v4384_v28, %v6591_v42  ;;  %v4386_v48 = vpop.f32.mrb[117].mxu1 }
 0x21b   :  { %9103 = vst [vmem:[#allocation30_spill] sm:$0xff] %v8543_v60  ;;  %v8553_v45 = vsel %vm4434_vm7, %v4386_v48, %v9097_v27  ;;  %v4548_v16 = vpop.f32.mrb[120].mxu0  ;;  %v9104_v48 = vmax.f32 %v8282_v17, %v8426_v2 }
 0x21c   :  { %v4700_v29 = vsel %vm4696_vm1, %v4548_v16, %v9100_v57  ;;  %v4550_v23 = vpop.f32.mrb[121].mxu0  ;;  %v4927_v57 = vsel %vm5356_vm10, 1, %v8971_v44 }
 0x21d   :  { %v4390_v60 = vpop.f32.mrb[118].mxu1  ;;  %v8570_v27 = vmax.f32 %v9104_v48, %v4700_v29  ;;  %v4701_v56 = vsel %vm4697_vm9, %v4550_v23, %v6448_v10  ;;  %v9106_v29 = vmax.f32 %v8315_v6, %v8462_v7  ;;  %v4936_v6 = vrot.slane %v4927_v57, %v6366_v62 }
 0x21e   :  { %v8578_v50 = vsel %vm4433_vm6, %v4390_v60, %v6632_v30  ;;  %v4392_v16 = vpop.f32.mrb[119].mxu1  ;;  %v8583_v28 = vmax.f32 %v9105_v47, %v4701_v56  ;;  %v4932_v56 = vrot.slane %v4927_v57, %v6362_v58  ;;  %v9108_v7 = vmax.f32 %v8334_v59, %v8476_v13 }
 0x21f   :  { %v4465_v17 = vmax.f32 %v8447_v9, %v8578_v50  ;;  %v8591_v2 = vsel %vm4434_vm7, %v4392_v16, %v6645_v54  ;;  %v4554_v53 = vpop.f32.mrb[122].mxu0  ;;  %v9110_v13 = vmax.f32 %v8351_v49, %v8493_v33  ;;  %v8656_v49 = vrot.slane %v4936_v6, %v6362_v58 }
 0x220   :  { %v4704_v63 = vsel %vm4696_vm1, %v4554_v53, %v6484_v24  ;;  %v4556_v40 = vpop.f32.mrb[123].mxu0  ;;  %v9107_v53 = vmax.f32 %v8328_v41, %v8469_v18  ;;  %v4928_v18 = vsel %vm5357_vm13, 1, %v8971_v44  ;;  %v9111_v44 = vmax.f32 %v8365_v55, %v8501_v0 }
 0x221   :  { %v4637_v60 = vpop.f32.mrb[120].mxu1  ;;  %v8603_v12 = vmax.f32 %v9106_v29, %v4704_v63  ;;  %v4705_v48 = vsel %vm4697_vm9, %v4556_v40, %v6492_v35  ;;  %v9112_v33 = vmax.f32 %v8373_v52, %v8509_v15  ;;  %v9113_v55 = vmax.f32 %v8382_v20, %v8521_v8 }
 0x222   :  { %v4702_v16 = vsel %vm4698_vm11, %v4637_v60, %v6502_v61  ;;  %v4639_v47 = vpop.f32.mrb[121].mxu1  ;;  %v8616_v23 = vmax.f32 %v9107_v53, %v4705_v48  ;;  %v9109_v60 = vmax.f32 %v8342_v38, %v8486_v31  ;;  %v8645_v38 = vrot.slane %v4932_v56, %v6362_v58 }
 0x223   :  { %v8622_v63 = vmax.f32 %v9108_v7, %v4702_v16  ;;  %v4703_v43 = vsel %vm4699_vm12, %v4639_v47, %v6514_v51  ;;  %v4560_v40 = vpop.f32.mrb[124].mxu0  ;;  %v4944_v52 = vrot.slane %v4928_v18, %v6366_v62  ;;  %v9115_v62 = vmax.f32 %v8403_v14, %v8537_v11 }
 0x224   :  { %v8630_v29 = vmax.f32 %v9109_v60, %v4703_v43  ;;  %v4708_v41 = vsel %vm4696_vm1, %v4560_v40, %v6525_v22  ;;  %v4562_v57 = vpop.f32.mrb[125].mxu0  ;;  %v4940_v40 = vrot.slane %v4928_v18, %v6362_v58  ;;  %vm4961_vm14 = vcmp.eq.s32.totalorder %v8645_v38, 1 }
 0x225   :  { %v4643_v59 = vpop.f32.mrb[122].mxu1  ;;  %v8639_v48 = vmax.f32 %v9110_v13, %v4708_v41  ;;  %v4709_v16 = vsel %vm4697_vm9, %v4562_v57, %v8981_v26  ;;  %v9114_v41 = vmax.f32 %v8391_v21, %v8529_v34  ;;  %vm4962_vm15 = vcmp.eq.s32.totalorder %v8656_v49, 1  ;;  %v9116_v21 = vld [vmem:[#allocation30_spill] sm:$0xff] }
 0x226   :  { %v4706_v31 = vsel %vm4698_vm11, %v4643_v59, %v8982_v4  ;;  %v4645_v47 = vpop.f32.mrb[123].mxu1  ;;  %v8653_v53 = vmax.f32 %v9111_v44, %v4709_v16  ;;  %v9117_v34 = vmax.f32 %v8409_v37, %v9116_v21  ;;  %v9119_v14 = vmax.f32 %v8421_v32, %v8553_v45 }
 0x227   :  { %v8661_v7 = vmax.f32 %v9112_v33, %v4706_v31  ;;  %v4707_v56 = vsel %vm4699_vm12, %v4645_v47, %v8986_v3  ;;  %v4566_v43 = vpop.f32.mrb[126].mxu0  ;;  %v8703_v31 = vrot.slane %v4940_v40, %v6362_v58  ;;  %v9120_v47 = vld [vmem:[#allocation17_spill] sm:$0xff]  ;;  %v8714_v33 = vrot.slane %v4944_v52, %v6362_v58 }
 0x228   :  { %v8670_v0 = vmax.f32 %v9113_v55, %v4707_v56  ;;  %v4712_v6 = vsel %vm4696_vm1, %v4566_v43, %v6568_v46  ;;  %v4568_v60 = vpop.f32.mrb[127].mxu0  ;;  %v5020_v56 = vpop.permute.xlu0 %5019  ;;  %v9122_v19 = vmax.f32 %v8456_v1, %v8591_v2 }
 0x229   :  { %v4649_v15 = vpop.f32.mrb[124].mxu1  ;;  %v8679_v57 = vmax.f32 %v9114_v41, %v4712_v6  ;;  %v4713_v59 = vsel %vm4697_vm9, %v4568_v60, %v6581_v36  ;;  %v9121_v60 = vld [vmem:[#allocation9_spill] sm:$0xff]  ;;  %vm4963_vm0 = vcmp.eq.s32.totalorder %v8703_v31, 1  ;;  %vm4964_vm2 = vcmp.eq.s32.totalorder %v8714_v33, 1 }
 0x22a   :  { %v4710_v20 = vsel %vm4698_vm11, %v4649_v15, %v6591_v42  ;;  %v4651_v39 = vpop.f32.mrb[125].mxu1  ;;  %v8691_v8 = vmax.f32 %v9115_v62, %v4713_v59 }
 0x22b   :  { %v8697_v18 = vmax.f32 %v9117_v34, %v4710_v20  ;;  %v4711_v13 = vsel %vm4699_vm12, %v4651_v39, %v9118_v25  ;;  %v4813_v16 = vpop.f32.mrb[128].mxu0  ;;  %v9124_v34 = vld [vmem:[#allocation12_spill] sm:$0xff] }
 0x22c   :  { %v8708_v11 = vmax.f32 %v9119_v14, %v4711_v13  ;;  %v4965_v44 = vsel %vm4961_vm14, %v4813_v16, %v9120_v47  ;;  %v4815_v37 = vpop.f32.mrb[129].mxu0  ;;  %v5025_v21 = vpop.permute.xlu0 %5024 }
 0x22d   :  { %v4655_v43 = vpop.f32.mrb[126].mxu1  ;;  %v4981_v55 = vmax.f32 %v8570_v27, %v4965_v44  ;;  %v4966_v40 = vsel %vm4962_vm15, %v4815_v37, %v6448_v10  ;;  %v9125_v44 = vld [vmem:[#allocation21_spill] sm:$0xff] }
 0x22e   :  { %v4714_v32 = vsel %vm4698_vm11, %v4655_v43, %v6632_v30  ;;  %v4657_v45 = vpop.f32.mrb[127].mxu1  ;;  %v4982_v6 = vmax.f32 %v8583_v28, %v4966_v40  ;;  %v9123_v28 = vld [vmem:[#allocation20_spill] sm:$0xff] }
 0x22f   :  { %v8727_v58 = vmax.f32 %v4465_v17, %v4714_v32  ;;  %v4715_v27 = vsel %vm4699_vm12, %v4657_v45, %v6645_v54  ;;  %v4997_v52 = vadd.f32 %v4981_v55, %v9121_v60  ;;  %v4819_v10 = vpop.f32.mrb[130].mxu0  ;;  %v9126_v43 = vld [vmem:[#allocation8_spill] sm:$0xff] }
 0x230   :  { %v8737_v15 = vmax.f32 %v9122_v19, %v4715_v27  ;;  %v4998_v41 = vadd.f32 %v4982_v6, %v9123_v28  ;;  %v4969_v9 = vsel %vm4961_vm14, %v4819_v10, %v6484_v24  ;;  %v4821_v5 = vpop.f32.mrb[131].mxu0  ;;  %v9128_v19 = vld [vmem:[#allocation22_spill] sm:$0xff] }
 0x231   :  { %v4902_v50 = vpop.f32.mrb[128].mxu1  ;;  %v4985_v17 = vmax.f32 %v8603_v12, %v4969_v9  ;;  %v5037_v59 = vadd.f32 %v5020_v56, %v4997_v52  ;;  %v4970_v20 = vsel %vm4962_vm15, %v4821_v5, %v6492_v35 }
 0x232   :  { %v4967_v1 = vsel %vm4963_vm0, %v4902_v50, %v6502_v61  ;;  %v4904_v2 = vpop.f32.mrb[129].mxu1  ;;  %v5038_v39 = vadd.f32 %v5020_v56, %v4998_v41  ;;  %v4986_v62 = vmax.f32 %v8616_v23, %v4970_v20  ;;  %v5030_v50 = vpop.permute.xlu1 %5029 }
 0x233   :  { %v4983_v24 = vmax.f32 %v8622_v63, %v4967_v1  ;;  %v4968_v12 = vsel %vm4964_vm2, %v4904_v2, %v6514_v51  ;;  %v5001_v13 = vadd.f32 %v4985_v17, %v9124_v34  ;;  %v5053_v16 = vmax.f32 %v5037_v59, 0.0  ;;  %v4825_v14 = vpop.f32.mrb[132].mxu0  ;;  %v9129_v59 = vld [vmem:[#allocation15_spill] sm:$0xff] }
 0x234   :  { %v4984_v35 = vmax.f32 %v8630_v29, %v4968_v12  ;;  %v5054_v47 = vmax.f32 %v5038_v39, 0.0  ;;  %v5002_v61 = vadd.f32 %v4986_v62, %v9125_v44  ;;  %v4973_v23 = vsel %vm4961_vm14, %v4825_v14, %v6525_v22  ;;  %v4827_v37 = vpop.f32.mrb[133].mxu0  ;;  %v9127_v29 = vld [vmem:[#allocation14_spill] sm:$0xff] }
 0x235   :  { %v4999_v63 = vadd.f32 %v4983_v24, %v9126_v43  ;;  %v4908_v55 = vpop.f32.mrb[130].mxu1  ;;  %5069 = vst [vmem:[#allocation5] sm:$0xff] %v5053_v16  ;;  %v4989_v51 = vmax.f32 %v8639_v48, %v4973_v23  ;;  %v5041_v40 = vadd.f32 %v5025_v21, %v5001_v13  ;;  %v4974_v32 = vsel %vm4962_vm15, %v4827_v37, %v8981_v26  ;;  %v9131_v24 = vld [vmem:[#allocation23_spill] sm:$0xff] }
 0x236   :  { %v5000_v45 = vadd.f32 %v4984_v35, %v9127_v29  ;;  %v4971_v6 = vsel %vm4963_vm0, %v4908_v55, %v8982_v4  ;;  %5070 = vst [vmem:[#allocation5 + $0x8] sm:$0xff] %v5054_v47  ;;  %v4910_v22 = vpop.f32.mrb[131].mxu1  ;;  %v5042_v27 = vadd.f32 %v5025_v21, %v5002_v61  ;;  %v4990_v60 = vmax.f32 %v8653_v53, %v4974_v32  ;;  %v9132_v61 = vld [vmem:[#allocation24_spill] sm:$0xff]  ;;  %v9134_v55 = vld [vmem:[#allocation13_spill] sm:$0xff]  ;;  %v5035_v49 = vpop.permute.xlu1 %5034 }
 0x237   :  { %v4987_v52 = vmax.f32 %v8661_v7, %v4971_v6  ;;  %v5039_v10 = vadd.f32 %v5020_v56, %v4999_v63  ;;  %v4972_v48 = vsel %vm4964_vm2, %v4910_v22, %v8986_v3  ;;  %v5005_v26 = vadd.f32 %v4989_v51, %v9128_v19  ;;  %v4831_v28 = vpop.f32.mrb[134].mxu0  ;;  %v9130_v7 = vld [vmem:[#allocation11_spill] sm:$0xff]  ;;  %v9133_v63 = vld [vmem:[#allocation25_spill] sm:$0xff] }
 0x238   :  { %v5040_v41 = vadd.f32 %v5020_v56, %v5000_v45  ;;  %v4988_v9 = vmax.f32 %v8670_v0, %v4972_v48  ;;  %v5057_v5 = vmax.f32 %v5041_v40, 0.0  ;;  %v5058_v4 = vmax.f32 %v5042_v27, 0.0  ;;  %v4833_v17 = vpop.f32.mrb[135].mxu0  ;;  %v9136_v27 = vld [vmem:[#allocation16_spill] sm:$0xff] }
 0x239   :  { %v5003_v20 = vadd.f32 %v4987_v52, %v9129_v59  ;;  %v5055_v53 = vmax.f32 %v5039_v10, 0.0  ;;  %v4914_v1 = vpop.f32.mrb[132].mxu1  ;;  %v5006_v2 = vadd.f32 %v4990_v60, %v9130_v7  ;;  %v5045_v39 = vadd.f32 %v5030_v50, %v5005_v26  ;;  %v9137_v10 = vld [vmem:[#allocation26_spill] sm:$0xff] }
 0x23a   :  { %v5056_v62 = vmax.f32 %v5040_v41, 0.0  ;;  %v5004_v3 = vadd.f32 %v4988_v9, %v9131_v24  ;;  %v4975_v56 = vsel %vm4963_vm0, %v4914_v1, %v6591_v42  ;;  %5073 = vst [vmem:[#allocation5 + $0x20] sm:$0xff] %v5057_v5  ;;  %5074 = vst [vmem:[#allocation5 + $0x28] sm:$0xff] %v5058_v4  ;;  %v4916_v0 = vpop.f32.mrb[133].mxu1  ;;  %v4977_v12 = vsel %vm4961_vm14, %v4831_v28, %v6568_v46 }
 0x23b   :  { %5071 = vst [vmem:[#allocation5 + $0x10] sm:$0xff] %v5055_v53  ;;  %v4991_v34 = vmax.f32 %v8697_v18, %v4975_v56  ;;  %v5043_v13 = vadd.f32 %v5025_v21, %v5003_v20  ;;  %v4976_v16 = vsel %vm4964_vm2, %v4916_v0, %v9118_v25  ;;  %v5046_v14 = vadd.f32 %v5030_v50, %v5006_v2 }
 0x23c   :  { %5072 = vst [vmem:[#allocation5 + $0x18] sm:$0xff] %v5056_v62  ;;  %v5044_v35 = vadd.f32 %v5025_v21, %v5004_v3  ;;  %v4992_v42 = vmax.f32 %v8708_v11, %v4976_v16  ;;  %v5061_v47 = vmax.f32 %v5045_v39, 0.0  ;;  %v4993_v44 = vmax.f32 %v8679_v57, %v4977_v12 }
 0x23d   :  { %v5007_v23 = vadd.f32 %v4991_v34, %v9132_v61  ;;  %v5059_v38 = vmax.f32 %v5043_v13, 0.0  ;;  %v5062_v46 = vmax.f32 %v5046_v14, 0.0  ;;  %v4920_v37 = vpop.f32.mrb[134].mxu1  ;;  %v4978_v18 = vsel %vm4962_vm15, %v4833_v17, %v6581_v36 }
 0x23e   :  { %v5060_v43 = vmax.f32 %v5044_v35, 0.0  ;;  %v5008_v25 = vadd.f32 %v4992_v42, %v9133_v63  ;;  %5077 = vst [vmem:[#allocation5 + $0x40] sm:$0xff] %v5061_v47  ;;  %v5009_v21 = vadd.f32 %v4993_v44, %v9134_v55  ;;  %v4979_v11 = vsel %vm4963_vm0, %v4920_v37, %v6632_v30  ;;  %v4922_v57 = vpop.f32.mrb[135].mxu1  ;;  %v9135_v30 = vld [vmem:[#allocation18_spill] sm:$0xff] }
 0x23f   :  { %5075 = vst [vmem:[#allocation5 + $0x30] sm:$0xff] %v5059_v38  ;;  %v5047_v51 = vadd.f32 %v5030_v50, %v5007_v23  ;;  %5078 = vst [vmem:[#allocation5 + $0x48] sm:$0xff] %v5062_v46  ;;  %v4995_v40 = vmax.f32 %v8727_v58, %v4979_v11  ;;  %v4994_v32 = vmax.f32 %v8691_v8, %v4978_v18 }
 0x240   :  { %v4980_v36 = vsel %vm4964_vm2, %v4922_v57, %v6645_v54  ;;  %5076 = vst [vmem:[#allocation5 + $0x38] sm:$0xff] %v5060_v43  ;;  %v5048_v29 = vadd.f32 %v5030_v50, %v5008_v25  ;;  %v5049_v6 = vadd.f32 %v5035_v49, %v5009_v21 }
 0x241   :  { %v4996_v45 = vmax.f32 %v8737_v15, %v4980_v36  ;;  %v5063_v31 = vmax.f32 %v5047_v51, 0.0  ;;  %v5011_v22 = vadd.f32 %v4995_v40, %v9135_v30  ;;  %v5010_v60 = vadd.f32 %v4994_v32, %v9136_v27 }
 0x242   :  { %v5064_v52 = vmax.f32 %v5048_v29, 0.0  ;;  %v5065_v48 = vmax.f32 %v5049_v6, 0.0 }
 0x243   :  { %v5012_v58 = vadd.f32 %v4996_v45, %v9137_v10  ;;  %5079 = vst [vmem:[#allocation5 + $0x50] sm:$0xff] %v5063_v31  ;;  %v5050_v8 = vadd.f32 %v5035_v49, %v5010_v60  ;;  %v5051_v54 = vadd.f32 %v5035_v49, %v5011_v22 }
 0x244   :  { %5080 = vst [vmem:[#allocation5 + $0x58] sm:$0xff] %v5064_v52  ;;  %5081 = vst [vmem:[#allocation5 + $0x60] sm:$0xff] %v5065_v48 }
 0x245   :  { %v5052_v33 = vadd.f32 %v5035_v49, %v5012_v58  ;;  %v5066_v19 = vmax.f32 %v5050_v8, 0.0  ;;  %v5067_v15 = vmax.f32 %v5051_v54, 0.0 }
 0x247   :  { %v5068_v26 = vmax.f32 %v5052_v33, 0.0  ;;  %5082 = vst [vmem:[#allocation5 + $0x68] sm:$0xff] %v5066_v19  ;;  %5083 = vst [vmem:[#allocation5 + $0x70] sm:$0xff] %v5067_v15 }
 0x249   :  { %5084 = vst [vmem:[#allocation5 + $0x78] sm:$0xff] %v5068_v26 }
 0x24a   :  { %5463 = shalt.err (!%p5460_p12)
}
 0x24b   :  { %s5464_s25 = scalar_lea.hbm %s8827_s4, 2048 }
 0x24c   :  { %p5465_p13 = scmp.ne.s32.totalorder %s8827_s4, %s5464_s25  ;;  %p5468_p0 = scmp.lt.u32.totalorder %s5464_s25, %s8827_s4 }
 0x24e   :  { %p5470_p1 = pnand %p5468_p0, %p5465_p13 }
 0x250   :  { %5473 = shalt.err (!%p5470_p1)
}
 0x251   :  { %s5484_s29 = smov 512   ;;  %s5485_s30 = smov 32  }
 0x252   :  { %5096 = dma.vmem_to_hbm [thread:$0]  %s5091_s21, 2048, %s8827_s4, [#allocation4], %s5484_s29, %s5484_s29, %s5485_s30  }
 0x253   :  { %5476 = dma.done.wait [#allocation4], 2048  }
 0x254   :  { %5477 = vsyncadd [#allocation4], 4294965248 }
 0x255   :  { %5100 = vsyncpa [#allocation3], 1 }
 0x256   :  { %5101 = vsyncpa [#allocation4], 1 }

</bundles_post_ra>
